<compile_context>
chip_gen: v5e
topology: v5e:2x2
jax: 0.10.0
libtpu: 0.0.40
codegen_flags: <defaults>
</compile_context>

<pallas_src>
import math
import functools

import jax
import jax.numpy as jnp
from jax import lax
from jax.experimental import pallas as pl
from jax.experimental.pallas import tpu as pltpu

_VMEM_LIMIT = 32 * 1024 * 1024  # safe on v5e/v6e/v7x, far above the tiles used here
_NCORES = 2                     # stats-pass core split; harmless on 1-TC chips


def _round_up(x, m):
    return ((x + m - 1) // m) * m


def _pick_tile(rows, target, min_steps, align=8):
    """Largest align-multiple tile <= target that still leaves >= min_steps steps."""
    tile = min(target, _round_up(max(rows, 1), align))
    if rows >= align * min_steps:
        tile = min(tile, _round_up(pl.cdiv(rows, min_steps), align))
    return max(tile, align)


# ----------------------------------------------------------------------------
# Kernel 1: GroupNorm statistics. Grid = (core, row-tile): leading "parallel"
# axis gives each TensorCore its own (1, 8, L) accumulator slab, trailing
# "arbitrary" axis streams the (packed) vertex tiles. Row reductions are
# offloaded to the MXU via a ones-matmul.
# ----------------------------------------------------------------------------
def _gn_stats_kernel(x_ref, sum_ref, sq_ref):
    @pl.when(pl.program_id(1) == 0)
    def _():
        sum_ref[...] = jnp.zeros_like(sum_ref)
        sq_ref[...] = jnp.zeros_like(sq_ref)

    x = x_ref[...].astype(jnp.float32)                      # (tile, L)
    ones = jnp.ones((8, x.shape[0]), dtype=jnp.float32)     # MXU row-reduction
    sum_ref[...] += jnp.dot(ones, x, preferred_element_type=jnp.float32)[None]
    sq_ref[...] += jnp.dot(ones, x * x, preferred_element_type=jnp.float32)[None]


# ----------------------------------------------------------------------------
# Kernel 2: normalize + affine + ReLU, emitting bf16. Tiled over (packed)
# vertex rows, "parallel" (megacore-shardable). scale/shift arrive as (8, L)
# blocks (no sub-8-sublane blocks); per-element work is mul, add, max.
# ----------------------------------------------------------------------------
def _gn_norm_relu_kernel(x_ref, scale_ref, shift_ref, o_ref):
    x = x_ref[...].astype(jnp.float32)                      # (tile, L)
    y = jnp.maximum(x * scale_ref[0:1, :] + shift_ref[0:1, :], 0.0)
    o_ref[...] = y.astype(o_ref.dtype)                      # bf16 out


# ----------------------------------------------------------------------------
# Kernel 3: Finefy contraction. bf16 x bf16 -> f32 accumulate on the MXU.
# When nr_filters < 128, fine rows are lane-packed 128/nr_filters per output
# row via a block-diagonal weight, so every stored f32 lane is useful.
# ----------------------------------------------------------------------------
def _finefy_matmul_kernel(x_ref, w_ref, o_ref):
    o_ref[...] = jnp.dot(
        x_ref[...], w_ref[...], preferred_element_type=jnp.float32
    ).astype(o_ref.dtype)


# ----------------------------------------------------------------------------
# GroupNorm + ReLU wrapper (returns bf16 normalized lattice values).
# ----------------------------------------------------------------------------
def group_norm_relu(x, gamma, beta, nr_groups, eps=1e-5, row_tile=2048):
    n, c = x.shape

    # Lane packing: view (N, C) as (N/p, C*p) so the last dim fills 128 lanes.
    p = 128 // c if (c < 128 and 128 % c == 0) else 1
    l = c * p

    rows = pl.cdiv(n, p)
    rows_per_core = pl.cdiv(rows, _NCORES)
    tile = _pick_tile(rows_per_core, row_tile, min_steps=2, align=8)
    steps = pl.cdiv(rows_per_core, tile)
    rows_pad = _NCORES * steps * tile
    n_pad = rows_pad * p

    x_pad = jnp.pad(x, ((0, n_pad - n), (0, 0))) if n_pad != n else x
    xp = x_pad.reshape(rows_pad, l)          # free, row-major contiguous

    # --- pass 1: per-packed-column sums, per-core partial slabs -------------
    col_sum, col_sq = pl.pallas_call(
        _gn_stats_kernel,
        out_shape=(jax.ShapeDtypeStruct((_NCORES, 8, l), jnp.float32),
                   jax.ShapeDtypeStruct((_NCORES, 8, l), jnp.float32)),
        grid=(_NCORES, steps),
        in_specs=[pl.BlockSpec((tile, l), lambda cc, i: (cc * steps + i, 0))],
        out_specs=(pl.BlockSpec((1, 8, l), lambda cc, i: (cc, 0, 0)),
                   pl.BlockSpec((1, 8, l), lambda cc, i: (cc, 0, 0))),
        compiler_params=pltpu.CompilerParams(
            dimension_semantics=("parallel", "arbitrary"),
            vmem_limit_bytes=_VMEM_LIMIT),
    )(xp)

    # --- finalize on tiny (C,) arrays using the GLOBAL count -----------------
    csum = col_sum[:, 0, :].sum(axis=0).reshape(p, c).sum(axis=0)
    csq = col_sq[:, 0, :].sum(axis=0).reshape(p, c).sum(axis=0)
    cg = c // nr_groups
    count = float(n * cg)
    gsum = csum.reshape(nr_groups, cg).sum(axis=1)
    gsq = csq.reshape(nr_groups, cg).sum(axis=1)
    mean = gsum / count
    # TODO(synk): single-pass E[x^2]-E[x]^2 in f32 (clamped at 0); a centered
    # two-pass form would need a third sweep over the vertices.
    var = jnp.maximum(gsq / count - mean * mean, 0.0)
    inv = lax.rsqrt(var + eps)
    mean_c = jnp.repeat(mean, cg)
    inv_c = jnp.repeat(inv, cg)
    scale = (gamma * inv_c).astype(jnp.float32)
    shift = (beta - mean_c * gamma * inv_c).astype(jnp.float32)
    scale8 = jnp.tile(jnp.tile(scale, p).reshape(1, l), (8, 1))   # (8, L)
    shift8 = jnp.tile(jnp.tile(shift, p).reshape(1, l), (8, 1))

    # --- pass 2: normalize + ReLU, bf16 output -------------------------------
    # TODO(synk): for lattices that fit in VMEM a single resident pass would
    # read x once instead of twice; the tiled two-pass form is kept for
    # generality (works for any lattice size, shards across cores).
    grid_norm = rows_pad // tile
    y = pl.pallas_call(
        _gn_norm_relu_kernel,
        out_shape=jax.ShapeDtypeStruct((rows_pad, l), jnp.bfloat16),
        grid=(grid_norm,),
        in_specs=[pl.BlockSpec((tile, l), lambda i: (i, 0)),
                  pl.BlockSpec((8, l), lambda i: (0, 0)),
                  pl.BlockSpec((8, l), lambda i: (0, 0))],
        out_specs=pl.BlockSpec((tile, l), lambda i: (i, 0)),
        compiler_params=pltpu.CompilerParams(
            dimension_semantics=("parallel",),
            vmem_limit_bytes=_VMEM_LIMIT),
    )(xp, scale8, shift8)

    return y.reshape(n_pad, c)[:n]


# ----------------------------------------------------------------------------
# Finefy convolution wrapper. Neighbor gather stays in XLA glue (bf16, sentinel
# zero row for missing neighbours -> no where pass over the amplified tensor);
# the contraction runs in Pallas with fine rows lane-packed into 128 output
# lanes via a block-diagonal weight (no padded f32 writes, no post-slice copy).
# ----------------------------------------------------------------------------
def finefy(lv_coarse_bf16, neighbor_idx, weight, tm=1024):
    n_fine, filter_extent = neighbor_idx.shape
    n_coarse, val_dim = lv_coarse_bf16.shape
    k = filter_extent * val_dim
    nf = weight.shape[1]

    # TODO(synk): gather of coarse neighbors is XLA glue (no in-kernel Pallas
    # row gather); sentinel zero row replaces the old post-gather where pass.
    lv_ext = jnp.concatenate(
        [lv_coarse_bf16, jnp.zeros((1, val_dim), lv_coarse_bf16.dtype)], axis=0)
    idx = jnp.where(neighbor_idx >= 0, neighbor_idx, n_coarse)      # tiny int op
    x = jnp.take(lv_ext, idx, axis=0).reshape(n_fine, k)            # bf16

    # Lane-pack p_out fine rows into the 128 output lanes when nf < 128.
    p_out = 128 // nf if (nf < 128 and 128 % nf == 0) else 1
    align = 8 * p_out
    tm = _pick_tile(n_fine, tm, min_steps=4, align=align)
    n_fine_pad = _round_up(n_fine, tm)
    if n_fine_pad != n_fine:
        x = jnp.pad(x, ((0, n_fine_pad - n_fine), (0, 0)))

    w = weight.astype(jnp.bfloat16)
    if p_out > 1:
        nf_l = nf * p_out                         # = 128
        kp = k * p_out
        xp = x.reshape(n_fine_pad // p_out, kp)   # free, row-major contiguous
        wbd = jnp.zeros((kp, nf_l), jnp.bfloat16)
        for j in range(p_out):                    # block-diagonal weight
            wbd = wbd.at[j * k:(j + 1) * k, j * nf:(j + 1) * nf].set(w)
    else:
        nf_l = _round_up(nf, 128)
        kp = k
        xp = x
        wbd = jnp.pad(w, ((0, 0), (0, nf_l - nf)))

    tmp = tm // p_out
    out = pl.pallas_call(
        _finefy_matmul_kernel,
        out_shape=jax.ShapeDtypeStruct((n_fine_pad // p_out, nf_l), jnp.float32),
        grid=(n_fine_pad // tm,),
        in_specs=[pl.BlockSpec((tmp, kp), lambda i: (i, 0)),
                  pl.BlockSpec((kp, nf_l), lambda i: (0, 0))],
        out_specs=pl.BlockSpec((tmp, nf_l), lambda i: (i, 0)),
        compiler_params=pltpu.CompilerParams(
            dimension_semantics=("parallel",),
            vmem_limit_bytes=_VMEM_LIMIT),
    )(xp, wbd)

    if p_out > 1:
        out = out.reshape(n_fine_pad, nf)         # free reshape, lanes all useful
    return out[:n_fine, :nf]


# ----------------------------------------------------------------------------
# GnReluFinefy forward (functional): GN -> ReLU -> Finefy(conv, no bias)
# ----------------------------------------------------------------------------
def gn_relu_finefy(lv_coarse, neighbor_idx, gn_gamma, gn_beta, finefy_weight,
                   nr_groups):
    lv = group_norm_relu(lv_coarse, gn_gamma, gn_beta, nr_groups)
    return finefy(lv, neighbor_idx, finefy_weight)


def _reference(lv, idx, gamma, beta, w, groups, eps=1e-5):
    n, c = lv.shape
    xg = lv.reshape(n, groups, c // groups)
    m = xg.mean(axis=(0, 2), keepdims=True)
    v = jnp.mean((xg - m) ** 2, axis=(0, 2), keepdims=True)
    xn = ((xg - m) / jnp.sqrt(v + eps)).reshape(n, c) * gamma + beta
    xr = jnp.maximum(xn, 0.0)
    g = jnp.where(idx[..., None] >= 0, xr[jnp.clip(idx, 0, n - 1)], 0.0)
    return g.reshape(idx.shape[0], -1) @ w


if __name__ == "__main__":
    key = jax.random.PRNGKey(0)

    # Small, module-consistent shapes.
    n_coarse = 2048        # coarse lattice vertices
    n_fine = 2048          # fine lattice vertices
    val_dim = 64           # coarse value dim (divisible by 32 -> 32 GN groups)
    pos_dim = 3
    filter_extent = 2 * (pos_dim + 1) + 1   # lattice_fine.get_filter_extent(1) = 9
    nr_filters = 32

    nr_groups = 32 if val_dim % 32 == 0 else val_dim // 2

    k_lv, k_idx, k_w = jax.random.split(key, 3)

    lv_coarse = jax.random.normal(k_lv, (n_coarse, val_dim), dtype=jnp.float32)

    # Neighbor table for each fine vertex; -1 models a missing lattice neighbor.
    neighbor_idx = jax.random.randint(
        k_idx, (n_fine, filter_extent), -1, n_coarse, dtype=jnp.int32)

    # Deterministic weight init replicating FinefyLatticeModule.reset_parameters:
    # fan_out = filter_extent * val_dim, fan = fan_out / 2, gain = sqrt(2) (relu),
    # std = gain / sqrt(fan) * 2, bound = sqrt(3) * std, U(-bound, bound).
    fan = (filter_extent * val_dim) / 2.0
    gain = math.sqrt(2.0)
    std = gain / math.sqrt(fan) * 2.0
    bound = math.sqrt(3.0) * std
    finefy_weight = jax.random.uniform(
        k_w, (filter_extent * val_dim, nr_filters),
        minval=-bound, maxval=bound, dtype=jnp.float32)

    # torch GroupNorm default affine params
    gn_gamma = jnp.ones((val_dim,), dtype=jnp.float32)
    gn_beta = jnp.zeros((val_dim,), dtype=jnp.float32)

    fwd = jax.jit(functools.partial(gn_relu_finefy, nr_groups=nr_groups))
    lv_1 = fwd(lv_coarse, neighbor_idx, gn_gamma, gn_beta, finefy_weight)
    jax.block_until_ready(lv_1)

    assert lv_1.shape == (n_fine, nr_filters)

    # Loose check vs. a pure-f32 reference (kernel matmul stream is bf16).
    ref = _reference(lv_coarse, neighbor_idx, gn_gamma, gn_beta, finefy_weight,
                     nr_groups)
    max_err = float(jnp.max(jnp.abs(lv_1 - ref)))
    assert max_err < 0.5, f"max abs err {max_err}"

    print("KERNEL_OK")
</pallas_src>

<mosaic_0001>
module attributes {stable_mosaic.version = 11 : i64} {
  func.func @_gn_stats_kernel(%arg0: i32, %arg1: i32, %arg2: memref<256x128xf32, #tpu.memory_space<vmem>>, %arg3: memref<1x8x128xf32, #tpu.memory_space<vmem>>, %arg4: memref<1x8x128xf32, #tpu.memory_space<vmem>>) attributes {dimension_semantics = [#tpu.dimension_semantics<parallel>, #tpu.dimension_semantics<arbitrary>], iteration_bounds = array<i64: 2, 2>, scalar_prefetch = 0 : i64, scratch_operands = 0 : i64, tpu.core_type = #tpu.core_type<tc>, window_params = [{transform_indices = @transform_0, window_bounds = array<i64: 256, 128>}, {transform_indices = @transform_1, window_bounds = array<i64: 1, 8, 128>}, {transform_indices = @transform_2, window_bounds = array<i64: 1, 8, 128>}]} {
    %c0_i32 = arith.constant 0 : i32
    %0 = arith.cmpi eq, %arg1, %c0_i32 : i32
    %1 = arith.extui %0 : i1 to i32
    %c0_i32_0 = arith.constant 0 : i32
    %2 = arith.cmpi ne, %1, %c0_i32_0 : i32
    scf.if %2 {
      %cst_16 = arith.constant 0.000000e+00 : f32
      %16 = vector.broadcast %cst_16 : f32 to vector<1x8x128xf32>
      %c0_17 = arith.constant 0 : index
      %c0_18 = arith.constant 0 : index
      %c0_19 = arith.constant 0 : index
      %17 = vector.load %arg3[%c0_17, %c0_18, %c0_19] : memref<1x8x128xf32, #tpu.memory_space<vmem>>, vector<1x8x128xf32>
      tpu.vector_store %arg3[%c0_17, %c0_18, %c0_19], %16 {strides = array<i32>} : memref<1x8x128xf32, #tpu.memory_space<vmem>>, vector<1x8x128xf32>,
      %cst_20 = arith.constant 0.000000e+00 : f32
      %18 = vector.broadcast %cst_20 : f32 to vector<1x8x128xf32>
      %c0_21 = arith.constant 0 : index
      %c0_22 = arith.constant 0 : index
      %c0_23 = arith.constant 0 : index
      %19 = vector.load %arg4[%c0_21, %c0_22, %c0_23] : memref<1x8x128xf32, #tpu.memory_space<vmem>>, vector<1x8x128xf32>
      tpu.vector_store %arg4[%c0_21, %c0_22, %c0_23], %18 {strides = array<i32>} : memref<1x8x128xf32, #tpu.memory_space<vmem>>, vector<1x8x128xf32>,
    } else {
    }
    %c0 = arith.constant 0 : index
    %c0_1 = arith.constant 0 : index
    %3 = vector.load %arg2[%c0, %c0_1] : memref<256x128xf32, #tpu.memory_space<vmem>>, vector<256x128xf32>
    %cst = arith.constant 1.000000e+00 : f32
    %4 = vector.broadcast %cst : f32 to vector<8x256xf32>
    %c0_2 = arith.constant 0 : index
    %c0_3 = arith.constant 0 : index
    %c0_4 = arith.constant 0 : index
    %5 = vector.load %arg3[%c0_2, %c0_3, %c0_4] : memref<1x8x128xf32, #tpu.memory_space<vmem>>, vector<1x8x128xf32>
    %cst_5 = arith.constant dense<0.000000e+00> : vector<8x128xf32>
    %6 = tpu.matmul %4, %3, %cst_5 {dimension_numbers = #tpu.dot_dimension_numbers<[1], [0], [0], [1], [0, 0, 1, 1], [], []>} : vector<8x256xf32>, vector<256x128xf32>, vector<8x128xf32> -> vector<8x128xf32>
    %7 = vector.shape_cast %6 : vector<8x128xf32> to vector<1x8x128xf32>
    %8 = arith.addf %5, %7 : vector<1x8x128xf32>
    %c0_6 = arith.constant 0 : index
    %c0_7 = arith.constant 0 : index
    %c0_8 = arith.constant 0 : index
    %9 = vector.load %arg3[%c0_6, %c0_7, %c0_8] : memref<1x8x128xf32, #tpu.memory_space<vmem>>, vector<1x8x128xf32>
    tpu.vector_store %arg3[%c0_6, %c0_7, %c0_8], %8 {strides = array<i32>} : memref<1x8x128xf32, #tpu.memory_space<vmem>>, vector<1x8x128xf32>,
    %c0_9 = arith.constant 0 : index
    %c0_10 = arith.constant 0 : index
    %c0_11 = arith.constant 0 : index
    %10 = vector.load %arg4[%c0_9, %c0_10, %c0_11] : memref<1x8x128xf32, #tpu.memory_space<vmem>>, vector<1x8x128xf32>
    %11 = arith.mulf %3, %3 : vector<256x128xf32>
    %cst_12 = arith.constant dense<0.000000e+00> : vector<8x128xf32>
    %12 = tpu.matmul %4, %11, %cst_12 {dimension_numbers = #tpu.dot_dimension_numbers<[1], [0], [0], [1], [0, 0, 1, 1], [], []>} : vector<8x256xf32>, vector<256x128xf32>, vector<8x128xf32> -> vector<8x128xf32>
    %13 = vector.shape_cast %12 : vector<8x128xf32> to vector<1x8x128xf32>
    %14 = arith.addf %10, %13 : vector<1x8x128xf32>
    %c0_13 = arith.constant 0 : index
    %c0_14 = arith.constant 0 : index
    %c0_15 = arith.constant 0 : index
    %15 = vector.load %arg4[%c0_13, %c0_14, %c0_15] : memref<1x8x128xf32, #tpu.memory_space<vmem>>, vector<1x8x128xf32>
    tpu.vector_store %arg4[%c0_13, %c0_14, %c0_15], %14 {strides = array<i32>} : memref<1x8x128xf32, #tpu.memory_space<vmem>>, vector<1x8x128xf32>,
    return
  }
  func.func @transform_0(%arg0: i32, %arg1: i32) -> (i32, i32) {
    %c2_i32 = arith.constant 2 : i32
    %0 = arith.muli %arg0, %c2_i32 : i32
    %1 = arith.addi %0, %arg1 : i32
    %c0_i32 = arith.constant 0 : i32
    %c0_i32_0 = arith.constant 0 : i32
    return %1, %c0_i32 : i32, i32
  }
  func.func @transform_1(%arg0: i32, %arg1: i32) -> (i32, i32, i32) {
    %c0_i32 = arith.constant 0 : i32
    %c0_i32_0 = arith.constant 0 : i32
    %c0_i32_1 = arith.constant 0 : i32
    return %arg0, %c0_i32, %c0_i32_0 : i32, i32, i32
  }
  func.func @transform_2(%arg0: i32, %arg1: i32) -> (i32, i32, i32) {
    %c0_i32 = arith.constant 0 : i32
    %c0_i32_0 = arith.constant 0 : i32
    %c0_i32_1 = arith.constant 0 : i32
    return %arg0, %c0_i32, %c0_i32_0 : i32, i32, i32
  }
}

module attributes {stable_mosaic.version = 11 : i64} {
  func.func @_gn_norm_relu_kernel(%arg0: i32, %arg1: memref<256x128xf32, #tpu.memory_space<vmem>>, %arg2: memref<8x128xf32, #tpu.memory_space<vmem>>, %arg3: memref<8x128xf32, #tpu.memory_space<vmem>>, %arg4: memref<256x128xbf16, #tpu.memory_space<vmem>>) attributes {dimension_semantics = [#tpu.dimension_semantics<parallel>], iteration_bounds = array<i64: 4>, scalar_prefetch = 0 : i64, scratch_operands = 0 : i64, tpu.core_type = #tpu.core_type<tc>, window_params = [{transform_indices = @transform_0, window_bounds = array<i64: 256, 128>}, {pipeline_mode = #tpu.pipeline_mode<synchronous>, transform_indices = @transform_1, window_bounds = array<i64: 8, 128>}, {pipeline_mode = #tpu.pipeline_mode<synchronous>, transform_indices = @transform_2, window_bounds = array<i64: 8, 128>}, {transform_indices = @transform_3, window_bounds = array<i64: 256, 128>}]} {
    %c0 = arith.constant 0 : index
    %c0_0 = arith.constant 0 : index
    %0 = vector.load %arg1[%c0, %c0_0] : memref<256x128xf32, #tpu.memory_space<vmem>>, vector<256x128xf32>
    %c0_1 = arith.constant 0 : index
    %c0_2 = arith.constant 0 : index
    %1 = vector.load %arg2[%c0_1, %c0_2] : memref<8x128xf32, #tpu.memory_space<vmem>>, vector<1x128xf32>
    %2 = vector.broadcast %1 : vector<1x128xf32> to vector<256x128xf32>
    %3 = arith.mulf %0, %2 : vector<256x128xf32>
    %c0_3 = arith.constant 0 : index
    %c0_4 = arith.constant 0 : index
    %4 = vector.load %arg3[%c0_3, %c0_4] : memref<8x128xf32, #tpu.memory_space<vmem>>, vector<1x128xf32>
    %5 = vector.broadcast %4 : vector<1x128xf32> to vector<256x128xf32>
    %6 = arith.addf %3, %5 : vector<256x128xf32>
    %cst = arith.constant 0.000000e+00 : f32
    %7 = vector.broadcast %cst : f32 to vector<256x128xf32>
    %8 = arith.maximumf %6, %7 : vector<256x128xf32>
    %9 = arith.truncf %8 : vector<256x128xf32> to vector<256x128xbf16>
    %c0_5 = arith.constant 0 : index
    %c0_6 = arith.constant 0 : index
    %10 = vector.load %arg4[%c0_5, %c0_6] : memref<256x128xbf16, #tpu.memory_space<vmem>>, vector<256x128xbf16>
    tpu.vector_store %arg4[%c0_5, %c0_6], %9 {strides = array<i32>} : memref<256x128xbf16, #tpu.memory_space<vmem>>, vector<256x128xbf16>,
    return
  }
  func.func @transform_0(%arg0: i32) -> (i32, i32) {
    %c0_i32 = arith.constant 0 : i32
    %c0_i32_0 = arith.constant 0 : i32
    return %arg0, %c0_i32 : i32, i32
  }
  func.func @transform_1(%arg0: i32) -> (i32, i32) {
    %c0_i32 = arith.constant 0 : i32
    %c0_i32_0 = arith.constant 0 : i32
    %c0_i32_1 = arith.constant 0 : i32
    return %c0_i32, %c0_i32_0 : i32, i32
  }
  func.func @transform_2(%arg0: i32) -> (i32, i32) {
    %c0_i32 = arith.constant 0 : i32
    %c0_i32_0 = arith.constant 0 : i32
    %c0_i32_1 = arith.constant 0 : i32
    return %c0_i32, %c0_i32_0 : i32, i32
  }
  func.func @transform_3(%arg0: i32) -> (i32, i32) {
    %c0_i32 = arith.constant 0 : i32
    %c0_i32_0 = arith.constant 0 : i32
    return %arg0, %c0_i32 : i32, i32
  }
}

module attributes {stable_mosaic.version = 11 : i64} {
  func.func @_finefy_matmul_kernel(%arg0: i32, %arg1: memref<128x2304xbf16, #tpu.memory_space<vmem>>, %arg2: memref<2304x128xbf16, #tpu.memory_space<vmem>>, %arg3: memref<128x128xf32, #tpu.memory_space<vmem>>) attributes {dimension_semantics = [#tpu.dimension_semantics<parallel>], iteration_bounds = array<i64: 4>, scalar_prefetch = 0 : i64, scratch_operands = 0 : i64, tpu.core_type = #tpu.core_type<tc>, window_params = [{transform_indices = @transform_0, window_bounds = array<i64: 128, 2304>}, {pipeline_mode = #tpu.pipeline_mode<synchronous>, transform_indices = @transform_1, window_bounds = array<i64: 2304, 128>}, {transform_indices = @transform_2, window_bounds = array<i64: 128, 128>}]} {
    %c0 = arith.constant 0 : index
    %c0_0 = arith.constant 0 : index
    %0 = vector.load %arg1[%c0, %c0_0] : memref<128x2304xbf16, #tpu.memory_space<vmem>>, vector<128x2304xbf16>
    %c0_1 = arith.constant 0 : index
    %c0_2 = arith.constant 0 : index
    %1 = vector.load %arg2[%c0_1, %c0_2] : memref<2304x128xbf16, #tpu.memory_space<vmem>>, vector<2304x128xbf16>
    %cst = arith.constant dense<0.000000e+00> : vector<128x128xf32>
    %2 = tpu.matmul %0, %1, %cst {dimension_numbers = #tpu.dot_dimension_numbers<[1], [0], [0], [1], [0, 0, 1, 1], [], []>} : vector<128x2304xbf16>, vector<2304x128xbf16>, vector<128x128xf32> -> vector<128x128xf32>
    %c0_3 = arith.constant 0 : index
    %c0_4 = arith.constant 0 : index
    %3 = vector.load %arg3[%c0_3, %c0_4] : memref<128x128xf32, #tpu.memory_space<vmem>>, vector<128x128xf32>
    tpu.vector_store %arg3[%c0_3, %c0_4], %2 {strides = array<i32>} : memref<128x128xf32, #tpu.memory_space<vmem>>, vector<128x128xf32>,
    return
  }
  func.func @transform_0(%arg0: i32) -> (i32, i32) {
    %c0_i32 = arith.constant 0 : i32
    %c0_i32_0 = arith.constant 0 : i32
    return %arg0, %c0_i32 : i32, i32
  }
  func.func @transform_1(%arg0: i32) -> (i32, i32) {
    %c0_i32 = arith.constant 0 : i32
    %c0_i32_0 = arith.constant 0 : i32
    %c0_i32_1 = arith.constant 0 : i32
    return %c0_i32, %c0_i32_0 : i32, i32
  }
  func.func @transform_2(%arg0: i32) -> (i32, i32) {
    %c0_i32 = arith.constant 0 : i32
    %c0_i32_0 = arith.constant 0 : i32
    return %arg0, %c0_i32 : i32, i32
  }
}

</mosaic_0001>

<bundles_post_ra>
// kernel: tile.21
= control target key start
LH: loop header
LB: loop body
LE: loop exit
PB: predicated region body
PF: predicated region fallthrough
CT: control target
= control target key end

     0   :  { %s22_s0 = inlined_call_operand.vmem [shape: f32[64], index: 0, kind: input, shape index: {}]   ;;  %s23_s1 = inlined_call_operand.vmem [shape: f32[2,64], index: 1, kind: output, shape index: {}]  }
   0x1   :  { %v4_v0 = vld [vmem:[%s22_s0] ss:$0 sm:$0xff] }
   0x2   :  { %5 = vst [vmem:[%s23_s1] sm:$0x3] %v4_v0 }

// kernel: gn_relu_finefy.3
= control target key start
LH: loop header
LB: loop body
LE: loop exit
PB: predicated region body
PF: predicated region fallthrough
CT: control target
= control target key end

     0   :  { %s546_s9 = smov 0   ;;  %s548_s10 = smov 0   ;;  %s644_s0 = inlined_call_operand.vmem [shape: f32[1024,128], index: 0, kind: input, shape index: {}]   ;;  %s645_s1 = inlined_call_operand.vmem [shape: f32[2,8,128], index: 1, kind: output, shape index: {0}]   ;;  %s646_s2 = inlined_call_operand.vmem [shape: f32[2,8,128], index: 2, kind: output, shape index: {1}]  }
   0x1   :  { %s550_s11 = smov 0   ;;  %s552_s12 = smov 0  }
   0x2   :  { %s554_s13 = smov 0  }
   0x3 LB: > { %s22_s14 = sadd.s32 1, %s519_s11  ;;  %s25_s15 = sadd.s32 1, %s523_s12  ;;  %s527_s13 = sphi %s554_s13, %s13_s13   ;;  %s523_s12 = sphi %s552_s12, %s650_s12   ;;  %s519_s11 = sphi %s550_s11, %s649_s11   ;;  %s515_s10 = sphi %s548_s10, %s648_s10   ;;  %s511_s9 = sphi %s546_s9, %s647_s9  }
   0x4   : > { %p23_p0 = scmp.ge.s32.totalorder %s22_s14, 2  ;;  %p438_p1 = scmp.ge.s32.totalorder %s527_s13, 1 }
   0x5   : > { %p136_p2 = scmp.lt.s32.totalorder %s527_s13, 5 }
   0x6   : > { %s652_s14 = smov (%p23_p0, %s22_s14), 0  ;;  %s654_s15 = smov (!%p23_p0, %s25_s15), %s523_s12 }
   0x7   : > { %p137_p3 = pnand %p438_p1, %p136_p2  ;;  %p27_p4 = scmp.ge.s32.totalorder %s654_s15, 2 }
   0x8   : > { %s439_s16 = sshll.u32 (!%p137_p3), %s515_s10, 1  ;;  %p173_p5 = scmp.lt.s32.totalorder (!%p137_p3), %s515_s10, 1 }
   0x9   : > { %s656_s15 = smov (%p27_p4, %s654_s15), 0  ;;  %140 = sbr.rel (%p137_p3) target bundleno = 197 (0xc5), region = 24 }
   0xa   : > { %s164_s17 = sadd.s32 (!%p137_p3), %s511_s9, %s439_s16  ;;  %p444_p7 = scmp.ne.s32.totalorder (!%p137_p3), %s511_s9, 0 }
   0xb   : > { %s440_s18 = sshll.u32 (!%p137_p3), %s164_s17, 5 }
   0xc   : > { %p166_p6 = scmp.lt.s32.totalorder (!%p137_p3), %s440_s18, 127 }
   0xe   : > { %s658_s10 = smov (!%p173_p5, %s515_s10), 1  ;;  %s660_s18 = smov (!%p166_p6, %s440_s18), 127 }
   0xf   : > { %s442_s19 = sshll.u32 %s658_s10, 3  ;;  %s441_s20 = sshll.u32 %s660_s18, 3 }
  0x10   : > { %s579_s23 = scalar_lea.vmem %s645_s1, %s442_s19  ;;  %s584_s26 = scalar_lea.vmem %s644_s0, %s441_s20 }
  0x11   : > { %s589_s29 = scalar_lea.vmem %s646_s2, %s442_s19  ;;  %184 = sbr.rel (%p444_p7) target bundleno = 25 (0x19), region = 28 }
  0x16   : > { %v529_v0 = vmov 0.0  }
  0x17   : > { %185 = vst [vmem:[%s579_s23] sm:$0xff] %v529_v0 }
  0x18   : > { %186 = vst [vmem:[%s589_s29] sm:$0xff] %v529_v0 }
  0x19 PF: > { %v202_v1 = vld [vmem:[%s584_s26 + $0x78] sm:$0xff]  ;;  %v201_v3 = vld [vmem:[%s584_s26 + $0x70] sm:$0xff]  ;;  %v200_v8 = vld [vmem:[%s584_s26 + $0x68] sm:$0xff] }
  0x1a   : > { %v218_v2 = vld [vmem:[%s584_s26 + $0xf8] sm:$0xff]  ;;  %v278_v4 = vmul.f32 %v202_v1, %v202_v1  ;;  %v277_v6 = vmul.f32 %v201_v3, %v201_v3  ;;  %v217_v7 = vld [vmem:[%s584_s26 + $0xf0] sm:$0xff]  ;;  %v216_v9 = vld [vmem:[%s584_s26 + $0xe8] sm:$0xff]  ;;  %220 = vmatpush.msra.mxu0 %v202_v1  ;;  %v276_v13 = vmul.f32 %v200_v8, %v200_v8  ;;  %v530_v1 = vmov 1.0  }
  0x1b   : > { %v294_v5 = vmul.f32 %v218_v2, %v218_v2  ;;  %240 = vmatpush.msra.mxu1 %v218_v2  ;;  %v293_v10 = vmul.f32 %v217_v7, %v217_v7  ;;  %v199_v11 = vld [vmem:[%s584_s26 + $0x60] sm:$0xff]  ;;  %v292_v14 = vmul.f32 %v216_v9, %v216_v9  ;;  %v198_v15 = vld [vmem:[%s584_s26 + $0x58] sm:$0xff]  ;;  %v197_v19 = vld [vmem:[%s584_s26 + $0x50] sm:$0xff] }
  0x1c   : > { %v215_v12 = vld [vmem:[%s584_s26 + $0xe0] sm:$0xff]  ;;  %295 = vmatpush.msra.mxu2 %v278_v4  ;;  %221 = vmatpush.msra.mxu0 %v201_v3  ;;  %v214_v16 = vld [vmem:[%s584_s26 + $0xd8] sm:$0xff]  ;;  %v275_v17 = vmul.f32 %v199_v11, %v199_v11  ;;  %v213_v20 = vld [vmem:[%s584_s26 + $0xd0] sm:$0xff]  ;;  %v274_v21 = vmul.f32 %v198_v15, %v198_v15  ;;  %v273_v25 = vmul.f32 %v197_v19, %v197_v19 }
  0x1d   : > { %315 = vmatpush.msra.mxu3 %v294_v5  ;;  %241 = vmatpush.msra.mxu1 %v217_v7  ;;  %v291_v18 = vmul.f32 %v215_v12, %v215_v12  ;;  %v290_v22 = vmul.f32 %v214_v16, %v214_v16  ;;  %v196_v23 = vld [vmem:[%s584_s26 + $0x48] sm:$0xff]  ;;  %v289_v26 = vmul.f32 %v213_v20, %v213_v20  ;;  %v195_v27 = vld [vmem:[%s584_s26 + $0x40] sm:$0xff]  ;;  %v194_v31 = vld [vmem:[%s584_s26 + $0x38] sm:$0xff] }
  0x1e   : > { %296 = vmatpush.msra.mxu2 %v277_v6  ;;  %222 = vmatpush.msra.mxu0 %v200_v8  ;;  %v212_v24 = vld [vmem:[%s584_s26 + $0xc8] sm:$0xff]  ;;  %v211_v28 = vld [vmem:[%s584_s26 + $0xc0] sm:$0xff]  ;;  %v272_v29 = vmul.f32 %v196_v23, %v196_v23  ;;  %v210_v32 = vld [vmem:[%s584_s26 + $0xb8] sm:$0xff]  ;;  %v271_v33 = vmul.f32 %v195_v27, %v195_v27  ;;  %v270_v37 = vmul.f32 %v194_v31, %v194_v31 }
  0x1f   : > { %316 = vmatpush.msra.mxu3 %v293_v10  ;;  %242 = vmatpush.msra.mxu1 %v216_v9  ;;  %v288_v30 = vmul.f32 %v212_v24, %v212_v24  ;;  %v287_v34 = vmul.f32 %v211_v28, %v211_v28  ;;  %v193_v35 = vld [vmem:[%s584_s26 + $0x30] sm:$0xff]  ;;  %v286_v38 = vmul.f32 %v210_v32, %v210_v32  ;;  %v192_v39 = vld [vmem:[%s584_s26 + $0x28] sm:$0xff]  ;;  %v191_v43 = vld [vmem:[%s584_s26 + $0x20] sm:$0xff] }
  0x20   : > { %297 = vmatpush.msra.mxu2 %v276_v13  ;;  %223 = vmatpush.msra.mxu0 %v199_v11  ;;  %v209_v36 = vld [vmem:[%s584_s26 + $0xb0] sm:$0xff]  ;;  %v208_v40 = vld [vmem:[%s584_s26 + $0xa8] sm:$0xff]  ;;  %v269_v41 = vmul.f32 %v193_v35, %v193_v35  ;;  %v207_v44 = vld [vmem:[%s584_s26 + $0xa0] sm:$0xff]  ;;  %v268_v45 = vmul.f32 %v192_v39, %v192_v39  ;;  %v267_v49 = vmul.f32 %v191_v43, %v191_v43 }
  0x21   : > { %317 = vmatpush.msra.mxu3 %v292_v14  ;;  %243 = vmatpush.msra.mxu1 %v215_v12  ;;  %v285_v42 = vmul.f32 %v209_v36, %v209_v36  ;;  %v284_v46 = vmul.f32 %v208_v40, %v208_v40  ;;  %v190_v47 = vld [vmem:[%s584_s26 + $0x18] sm:$0xff]  ;;  %v283_v50 = vmul.f32 %v207_v44, %v207_v44  ;;  %v189_v51 = vld [vmem:[%s584_s26 + $0x10] sm:$0xff]  ;;  %v188_v55 = vld [vmem:[%s584_s26 + $0x8] sm:$0xff] }
  0x22   : > { %298 = vmatpush.msra.mxu2 %v275_v17  ;;  %224 = vmatpush.msra.mxu0 %v198_v15  ;;  %v206_v48 = vld [vmem:[%s584_s26 + $0x98] sm:$0xff]  ;;  %v205_v52 = vld [vmem:[%s584_s26 + $0x90] sm:$0xff]  ;;  %v266_v53 = vmul.f32 %v190_v47, %v190_v47  ;;  %v204_v56 = vld [vmem:[%s584_s26 + $0x88] sm:$0xff]  ;;  %v265_v57 = vmul.f32 %v189_v51, %v189_v51  ;;  %v264_v61 = vmul.f32 %v188_v55, %v188_v55 }
  0x23   : > { %318 = vmatpush.msra.mxu3 %v291_v18  ;;  %244 = vmatpush.msra.mxu1 %v214_v16  ;;  %v282_v54 = vmul.f32 %v206_v48, %v206_v48  ;;  %v281_v58 = vmul.f32 %v205_v52, %v205_v52  ;;  %v187_v59 = vld [vmem:[%s584_s26] sm:$0xff]  ;;  %v280_v62 = vmul.f32 %v204_v56, %v204_v56 }
  0x24   : > { %299 = vmatpush.msra.mxu2 %v274_v21  ;;  %225 = vmatpush.msra.mxu0 %v197_v19  ;;  %v203_v60 = vld [vmem:[%s584_s26 + $0x80] sm:$0xff]  ;;  %v263_v63 = vmul.f32 %v187_v59, %v187_v59 }
  0x25   : > { %319 = vmatpush.msra.mxu3 %v290_v22  ;;  %245 = vmatpush.msra.mxu1 %v213_v20  ;;  %v279_v0 = vmul.f32 %v203_v60, %v203_v60  ;;  %v219_v3 = vld [vmem:[%s579_s23] sm:$0xff] }
  0x26   : > { %300 = vmatpush.msra.mxu2 %v273_v25  ;;  %226 = vmatpush.msra.mxu0 %v196_v23  ;;  %v262_v8 = vld [vmem:[%s589_s29] sm:$0xff] }
  0x27   : > { %320 = vmatpush.msra.mxu3 %v289_v26  ;;  %246 = vmatpush.msra.mxu1 %v212_v24 }
  0x28   : > { %301 = vmatpush.msra.mxu2 %v272_v29  ;;  %227 = vmatpush.msra.mxu0 %v195_v27 }
  0x29   : > { %321 = vmatpush.msra.mxu3 %v288_v30  ;;  %247 = vmatpush.msra.mxu1 %v211_v28 }
  0x2a   : > { %302 = vmatpush.msra.mxu2 %v271_v33  ;;  %228 = vmatpush.msra.mxu0 %v194_v31 }
  0x2b   : > { %322 = vmatpush.msra.mxu3 %v287_v34  ;;  %248 = vmatpush.msra.mxu1 %v210_v32 }
  0x2c   : > { %303 = vmatpush.msra.mxu2 %v270_v37  ;;  %229 = vmatpush.msra.mxu0 %v193_v35 }
  0x2d   : > { %323 = vmatpush.msra.mxu3 %v286_v38  ;;  %249 = vmatpush.msra.mxu1 %v209_v36 }
  0x2e   : > { %304 = vmatpush.msra.mxu2 %v269_v41  ;;  %230 = vmatpush.msra.mxu0 %v192_v39 }
  0x2f   : > { %324 = vmatpush.msra.mxu3 %v285_v42  ;;  %250 = vmatpush.msra.mxu1 %v208_v40 }
  0x30   : > { %305 = vmatpush.msra.mxu2 %v268_v45  ;;  %231 = vmatpush.msra.mxu0 %v191_v43 }
  0x31   : > { %325 = vmatpush.msra.mxu3 %v284_v46  ;;  %251 = vmatpush.msra.mxu1 %v207_v44 }
  0x32   : > { %306 = vmatpush.msra.mxu2 %v267_v49  ;;  %232 = vmatpush.msra.mxu0 %v190_v47 }
  0x33   : > { %326 = vmatpush.msra.mxu3 %v283_v50  ;;  %252 = vmatpush.msra.mxu1 %v206_v48 }
  0x34   : > { %307 = vmatpush.msra.mxu2 %v266_v53  ;;  %233 = vmatpush.msra.mxu0 %v189_v51 }
  0x35   : > { %327 = vmatpush.msra.mxu3 %v282_v54  ;;  %253 = vmatpush.msra.mxu1 %v205_v52 }
  0x36   : > { %308 = vmatpush.msra.mxu2 %v265_v57  ;;  %234 = vmatpush.msra.mxu0 %v188_v55 }
  0x37   : > { %328 = vmatpush.msra.mxu3 %v281_v58  ;;  %254 = vmatpush.msra.mxu1 %v204_v56 }
  0x38   : > { %309 = vmatpush.msra.mxu2 %v264_v61  ;;  %235 = vmatpush.msra.mxu0 %v187_v59 }
  0x39   : > { %329 = vmatpush.msra.mxu3 %v280_v62  ;;  %255 = vmatpush.msra.mxu1 %v203_v60 }
  0x3a   : > { %310 = vmatpush.msra.mxu2 %v263_v63  ;;  %236 = vmatmul.f32.vlgmr.msra.gmra.mxu0 %v530_v1 }
  0x3b   : > { %330 = vmatpush.msra.mxu3 %v279_v0  ;;  %311 = vmatmul.f32.vlgmr.msra.gmra.mxu2 %v530_v1 }
  0x3c   : > { %331 = vmatmul.f32.vlgmr.msra.gmra.mxu3 %v530_v1  ;;  %256 = vmatmul.f32.vlgmr.msra.gmra.mxu1 %v530_v1 }
  0xb7   : > { %v237_v2 = vpop.f32.mrf.mxu0 }
  0xb9   : > { %v257_v4 = vpop.f32.mrf.mxu1 }
  0xba   : > { %v258_v5 = vadd.f32 %v257_v4, %v237_v2 }
  0xbc   : > { %v260_v6 = vadd.f32 %v258_v5, %v219_v3 }
  0xbe   : > { %261 = vst [vmem:[%s579_s23] sm:$0xff] %v260_v6  ;;  %v312_v7 = vpop.f32.mrf.mxu2 }
  0xbf   : > { %v332_v9 = vpop.f32.mrf.mxu3 }
  0xc0   : > { %v333_v10 = vadd.f32 %v332_v9, %v312_v7 }
  0xc2   : > { %v335_v11 = vadd.f32 %v333_v10, %v262_v8 }
  0xc4   : > { %336 = vst [vmem:[%s589_s29] sm:$0xff] %v335_v11 }
  0xc5 PF: > { %s13_s13 = sadd.s32 1, %s527_s13   ;;  %s647_s9 = smov %s519_s11 }
  0xc6   : > { %p10_p8 = scmp.ge.s32.totalorder %s13_s13, 6   ;;  %s648_s10 = smov %s523_s12 }
  0xc7   : > { %s649_s11 = smov %s652_s14  ;;  %s650_s12 = smov %s656_s15 }
  0xc8   :  { %12 = sbr.rel (!%p10_p8) target bundleno = 3 (0x3), region = 70 }

// kernel: gn_relu_finefy.4
= control target key start
LH: loop header
LB: loop body
LE: loop exit
PB: predicated region body
PF: predicated region fallthrough
CT: control target
= control target key end

     0   :  { %s570_s12 = smov 0   ;;  %s717_s0 = inlined_call_operand.vmem [shape: f32[1024,128], index: 0, kind: input, shape index: {}]   ;;  %s718_s1 = inlined_call_operand.vmem [shape: f32[8,128], index: 1, kind: input, shape index: {}]   ;;  %s719_s2 = inlined_call_operand.vmem [shape: f32[8,128], index: 2, kind: input, shape index: {}]   ;;  %s720_s3 = inlined_call_operand.vmem [shape: bf16[1024,128], index: 3, kind: output, shape index: {}]  }
   0x1 LB: > { %s426_s13 = sadd.s32 4294967295, %s548_s12   ;;  %p430_p0 = scmp.ge.s32.totalorder %s548_s12, 1  ;;  %s548_s12 = sphi %s570_s12, %s13_s12  }
   0x2   : > { %p138_p1 = scmp.lt.s32.totalorder %s548_s12, 5 }
   0x4   : > { %p139_p2 = pnand %p430_p0, %p138_p1 }
   0x5   : > { %s431_s14 = sshll.u32 (!%p139_p2), %s426_s13, 5 }
   0x6   : > { %142 = sbr.rel (%p139_p2) target bundleno = 49 (0x31), region = 32  ;;  %p163_p3 = scmp.lt.s32.totalorder (!%p139_p2), %s431_s14, 127 }
   0xb   : > { %s722_s14 = smov (!%p163_p3, %s431_s14), 127  ;;  %v583_v0 = vld [vmem:[%s718_s1] ss:$0 sm:$0xff] }
   0xc   : > { %s432_s17 = sshll.u32 %s722_s14, 3  ;;  %v594_v1 = vld [vmem:[%s719_s2] ss:$0 sm:$0xff]  ;;  %s434_s23 = sshll.u32 %s722_s14, 2 }
   0xd   : > { %s589_s20 = scalar_lea.vmem %s717_s0, %s432_s17  ;;  %s626_s26 = scalar_lea.vmem %s720_s3, %s434_s23 }
   0xe   : > { %v174_v2 = vld [vmem:[%s589_s20] sm:$0xff]  ;;  %v175_v3 = vld [vmem:[%s589_s20 + $0x8] sm:$0xff]  ;;  %v176_v4 = vld [vmem:[%s589_s20 + $0x10] sm:$0xff] }
   0xf   : > { %v208_v5 = vmul.f32 %v583_v0, %v174_v2  ;;  %v209_v6 = vmul.f32 %v583_v0, %v175_v3  ;;  %v177_v7 = vld [vmem:[%s589_s20 + $0x18] sm:$0xff]  ;;  %v210_v8 = vmul.f32 %v583_v0, %v176_v4  ;;  %v178_v9 = vld [vmem:[%s589_s20 + $0x20] sm:$0xff]  ;;  %v179_v10 = vld [vmem:[%s589_s20 + $0x28] sm:$0xff] }
  0x10   : > { %v211_v11 = vmul.f32 %v583_v0, %v177_v7  ;;  %v212_v12 = vmul.f32 %v583_v0, %v178_v9  ;;  %v213_v13 = vmul.f32 %v583_v0, %v179_v10  ;;  %v180_v14 = vld [vmem:[%s589_s20 + $0x30] sm:$0xff]  ;;  %v181_v15 = vld [vmem:[%s589_s20 + $0x38] sm:$0xff]  ;;  %v182_v24 = vld [vmem:[%s589_s20 + $0x40] sm:$0xff] }
  0x11   : > { %v242_v16 = vadd.f32 %v594_v1, %v208_v5  ;;  %v243_v17 = vadd.f32 %v594_v1, %v209_v6  ;;  %v244_v18 = vadd.f32 %v594_v1, %v210_v8  ;;  %v214_v19 = vmul.f32 %v583_v0, %v180_v14  ;;  %v183_v25 = vld [vmem:[%s589_s20 + $0x48] sm:$0xff]  ;;  %v184_v30 = vld [vmem:[%s589_s20 + $0x50] sm:$0xff]  ;;  %v185_v35 = vld [vmem:[%s589_s20 + $0x58] sm:$0xff] }
  0x12   : > { %v245_v20 = vadd.f32 %v594_v1, %v211_v11  ;;  %v246_v21 = vadd.f32 %v594_v1, %v212_v12  ;;  %v247_v22 = vadd.f32 %v594_v1, %v213_v13  ;;  %v215_v23 = vmul.f32 %v583_v0, %v181_v15  ;;  %v186_v36 = vld [vmem:[%s589_s20 + $0x60] sm:$0xff]  ;;  %v187_v41 = vld [vmem:[%s589_s20 + $0x68] sm:$0xff]  ;;  %v188_v42 = vld [vmem:[%s589_s20 + $0x70] sm:$0xff] }
  0x13   : > { %v274_v26 = vmax.f32 %v242_v16, 0.0  ;;  %v275_v27 = vmax.f32 %v243_v17, 0.0  ;;  %v276_v28 = vmax.f32 %v244_v18, 0.0  ;;  %v248_v29 = vadd.f32 %v594_v1, %v214_v19  ;;  %v189_v51 = vld [vmem:[%s589_s20 + $0x78] sm:$0xff]  ;;  %v190_v56 = vld [vmem:[%s589_s20 + $0x80] sm:$0xff]  ;;  %v191_v61 = vld [vmem:[%s589_s20 + $0x88] sm:$0xff] }
  0x14   : > { %v277_v31 = vmax.f32 %v245_v20, 0.0  ;;  %v278_v32 = vmax.f32 %v246_v21, 0.0  ;;  %v279_v33 = vmax.f32 %v247_v22, 0.0  ;;  %v249_v34 = vadd.f32 %v594_v1, %v215_v23  ;;  %v192_v4 = vld [vmem:[%s589_s20 + $0x90] sm:$0xff]  ;;  %v193_v5 = vld [vmem:[%s589_s20 + $0x98] sm:$0xff]  ;;  %v194_v10 = vld [vmem:[%s589_s20 + $0xa0] sm:$0xff] }
  0x15   : > { %v440_v37 = vpack.c.bf16 %v275_v27, %v274_v26  ;;  %v280_v38 = vmax.f32 %v248_v29, 0.0  ;;  %v216_v39 = vmul.f32 %v583_v0, %v182_v24  ;;  %v217_v40 = vmul.f32 %v583_v0, %v183_v25  ;;  %v195_v15 = vld [vmem:[%s589_s20 + $0xa8] sm:$0xff]  ;;  %v196_v20 = vld [vmem:[%s589_s20 + $0xb0] sm:$0xff]  ;;  %v197_v25 = vld [vmem:[%s589_s20 + $0xb8] sm:$0xff] }
  0x16   : > { %v445_v43 = vpack.c.bf16 %v277_v31, %v276_v28  ;;  %v450_v44 = vpack.c.bf16 %v279_v33, %v278_v32  ;;  %v281_v45 = vmax.f32 %v249_v34, 0.0  ;;  %v218_v46 = vmul.f32 %v583_v0, %v184_v30  ;;  %v198_v30 = vld [vmem:[%s589_s20 + $0xc0] sm:$0xff] }
  0x17   : > { %441 = vst [vmem:[%s626_s26] sm:$0xff] %v440_v37   ;;  %v250_v47 = vadd.f32 %v594_v1, %v216_v39  ;;  %v251_v48 = vadd.f32 %v594_v1, %v217_v40  ;;  %v219_v49 = vmul.f32 %v583_v0, %v185_v35  ;;  %v220_v50 = vmul.f32 %v583_v0, %v186_v36  ;;  %v199_v35 = vld [vmem:[%s589_s20 + $0xc8] sm:$0xff]  ;;  %v200_v40 = vld [vmem:[%s589_s20 + $0xd0] sm:$0xff] }
  0x18   : > { %517 = vst [vmem:[%s626_s26 + $0x8] sm:$0xff] %v445_v43   ;;  %v455_v52 = vpack.c.bf16 %v281_v45, %v280_v38  ;;  %v252_v53 = vadd.f32 %v594_v1, %v218_v46  ;;  %v221_v54 = vmul.f32 %v583_v0, %v187_v41  ;;  %v222_v55 = vmul.f32 %v583_v0, %v188_v42  ;;  %v201_v41 = vld [vmem:[%s589_s20 + $0xd8] sm:$0xff]  ;;  %v202_v46 = vld [vmem:[%s589_s20 + $0xe0] sm:$0xff] }
  0x19   : > { %518 = vst [vmem:[%s626_s26 + $0x10] sm:$0xff] %v450_v44   ;;  %v282_v57 = vmax.f32 %v250_v47, 0.0  ;;  %v283_v58 = vmax.f32 %v251_v48, 0.0  ;;  %v253_v59 = vadd.f32 %v594_v1, %v219_v49  ;;  %v254_v60 = vadd.f32 %v594_v1, %v220_v50 }
  0x1a   : > { %519 = vst [vmem:[%s626_s26 + $0x18] sm:$0xff] %v455_v52   ;;  %v284_v62 = vmax.f32 %v252_v53, 0.0  ;;  %v255_v63 = vadd.f32 %v594_v1, %v221_v54  ;;  %v223_v2 = vmul.f32 %v583_v0, %v189_v51  ;;  %v256_v3 = vadd.f32 %v594_v1, %v222_v55  ;;  %v203_v51 = vld [vmem:[%s589_s20 + $0xe8] sm:$0xff] }
  0x1b   : > { %v460_v6 = vpack.c.bf16 %v283_v58, %v282_v57  ;;  %v285_v7 = vmax.f32 %v253_v59, 0.0  ;;  %v286_v8 = vmax.f32 %v254_v60, 0.0  ;;  %v224_v9 = vmul.f32 %v583_v0, %v190_v56  ;;  %v204_v56 = vld [vmem:[%s589_s20 + $0xf0] sm:$0xff] }
  0x1c   : > { %v287_v11 = vmax.f32 %v255_v63, 0.0  ;;  %v257_v12 = vadd.f32 %v594_v1, %v223_v2  ;;  %v288_v13 = vmax.f32 %v256_v3, 0.0  ;;  %v225_v14 = vmul.f32 %v583_v0, %v191_v61  ;;  %v205_v61 = vld [vmem:[%s589_s20 + $0xf8] sm:$0xff] }
  0x1d   : > { %520 = vst [vmem:[%s626_s26 + $0x20] sm:$0xff] %v460_v6   ;;  %v465_v16 = vpack.c.bf16 %v285_v7, %v284_v62  ;;  %v258_v17 = vadd.f32 %v594_v1, %v224_v9  ;;  %v226_v18 = vmul.f32 %v583_v0, %v192_v4  ;;  %v227_v19 = vmul.f32 %v583_v0, %v193_v5 }
  0x1e   : > { %v470_v21 = vpack.c.bf16 %v287_v11, %v286_v8  ;;  %v289_v22 = vmax.f32 %v257_v12, 0.0  ;;  %v259_v23 = vadd.f32 %v594_v1, %v225_v14  ;;  %v228_v24 = vmul.f32 %v583_v0, %v194_v10 }
  0x1f   : > { %521 = vst [vmem:[%s626_s26 + $0x28] sm:$0xff] %v465_v16   ;;  %v290_v26 = vmax.f32 %v258_v17, 0.0  ;;  %v260_v27 = vadd.f32 %v594_v1, %v226_v18  ;;  %v261_v28 = vadd.f32 %v594_v1, %v227_v19  ;;  %v229_v29 = vmul.f32 %v583_v0, %v195_v15 }
  0x20   : > { %522 = vst [vmem:[%s626_s26 + $0x30] sm:$0xff] %v470_v21   ;;  %v475_v31 = vpack.c.bf16 %v289_v22, %v288_v13  ;;  %v291_v32 = vmax.f32 %v259_v23, 0.0  ;;  %v262_v33 = vadd.f32 %v594_v1, %v228_v24  ;;  %v230_v34 = vmul.f32 %v583_v0, %v196_v20 }
  0x21   : > { %v292_v36 = vmax.f32 %v260_v27, 0.0  ;;  %v293_v37 = vmax.f32 %v261_v28, 0.0  ;;  %v263_v38 = vadd.f32 %v594_v1, %v229_v29  ;;  %v231_v39 = vmul.f32 %v583_v0, %v197_v25 }
  0x22   : > { %523 = vst [vmem:[%s626_s26 + $0x38] sm:$0xff] %v475_v31   ;;  %v480_v42 = vpack.c.bf16 %v291_v32, %v290_v26  ;;  %v294_v43 = vmax.f32 %v262_v33, 0.0  ;;  %v264_v44 = vadd.f32 %v594_v1, %v230_v34  ;;  %v232_v45 = vmul.f32 %v583_v0, %v198_v30 }
  0x23   : > { %v485_v47 = vpack.c.bf16 %v293_v37, %v292_v36  ;;  %v295_v48 = vmax.f32 %v263_v38, 0.0  ;;  %v265_v49 = vadd.f32 %v594_v1, %v231_v39  ;;  %v233_v50 = vmul.f32 %v583_v0, %v199_v35 }
  0x24   : > { %524 = vst [vmem:[%s626_s26 + $0x40] sm:$0xff] %v480_v42   ;;  %v296_v52 = vmax.f32 %v264_v44, 0.0  ;;  %v266_v53 = vadd.f32 %v594_v1, %v232_v45  ;;  %v234_v54 = vmul.f32 %v583_v0, %v200_v40  ;;  %v235_v55 = vmul.f32 %v583_v0, %v201_v41 }
  0x25   : > { %525 = vst [vmem:[%s626_s26 + $0x48] sm:$0xff] %v485_v47   ;;  %v490_v57 = vpack.c.bf16 %v295_v48, %v294_v43  ;;  %v297_v58 = vmax.f32 %v265_v49, 0.0  ;;  %v267_v59 = vadd.f32 %v594_v1, %v233_v50  ;;  %v236_v60 = vmul.f32 %v583_v0, %v202_v46 }
  0x26   : > { %v298_v62 = vmax.f32 %v266_v53, 0.0  ;;  %v268_v63 = vadd.f32 %v594_v1, %v234_v54  ;;  %v269_v2 = vadd.f32 %v594_v1, %v235_v55  ;;  %v237_v3 = vmul.f32 %v583_v0, %v203_v51 }
  0x27   : > { %526 = vst [vmem:[%s626_s26 + $0x50] sm:$0xff] %v490_v57   ;;  %v495_v4 = vpack.c.bf16 %v297_v58, %v296_v52  ;;  %v299_v5 = vmax.f32 %v267_v59, 0.0  ;;  %v270_v6 = vadd.f32 %v594_v1, %v236_v60  ;;  %v238_v7 = vmul.f32 %v583_v0, %v204_v56 }
  0x28   : > { %v300_v8 = vmax.f32 %v268_v63, 0.0  ;;  %v301_v9 = vmax.f32 %v269_v2, 0.0  ;;  %v271_v10 = vadd.f32 %v594_v1, %v237_v3  ;;  %v239_v11 = vmul.f32 %v583_v0, %v205_v61 }
  0x29   : > { %527 = vst [vmem:[%s626_s26 + $0x58] sm:$0xff] %v495_v4   ;;  %v500_v12 = vpack.c.bf16 %v299_v5, %v298_v62  ;;  %v302_v13 = vmax.f32 %v270_v6, 0.0  ;;  %v272_v14 = vadd.f32 %v594_v1, %v238_v7 }
  0x2a   : > { %v505_v15 = vpack.c.bf16 %v301_v9, %v300_v8  ;;  %v303_v16 = vmax.f32 %v271_v10, 0.0  ;;  %v273_v17 = vadd.f32 %v594_v1, %v239_v11 }
  0x2b   : > { %528 = vst [vmem:[%s626_s26 + $0x60] sm:$0xff] %v500_v12   ;;  %v304_v18 = vmax.f32 %v272_v14, 0.0 }
  0x2c   : > { %529 = vst [vmem:[%s626_s26 + $0x68] sm:$0xff] %v505_v15   ;;  %v510_v19 = vpack.c.bf16 %v303_v16, %v302_v13  ;;  %v305_v20 = vmax.f32 %v273_v17, 0.0 }
  0x2e   : > { %530 = vst [vmem:[%s626_s26 + $0x70] sm:$0xff] %v510_v19   ;;  %v515_v21 = vpack.c.bf16 %v305_v20, %v304_v18 }
  0x30   : > { %531 = vst [vmem:[%s626_s26 + $0x78] sm:$0xff] %v515_v21  }
  0x31 PF: > { %s13_s12 = sadd.s32 1, %s548_s12  }
  0x32   : > { %p10_p4 = scmp.ge.s32.totalorder %s13_s12, 6  }
  0x34   :  { %12 = sbr.rel (!%p10_p4) target bundleno = 1 (0x1), region = 62 }

// kernel: gn_relu_finefy.5
= control target key start
LH: loop header
LB: loop body
LE: loop exit
PB: predicated region body
PF: predicated region fallthrough
CT: control target
= control target key end

     0   :  { %s4619_s9 = smov 0   ;;  %s5572_s0 = inlined_call_operand.vmem [shape: bf16[512,2304], index: 0, kind: input, shape index: {}]   ;;  %s5573_s1 = inlined_call_operand.vmem [shape: bf16[2304,128], index: 1, kind: input, shape index: {}]   ;;  %s5574_s2 = inlined_call_operand.vmem [shape: f32[512,128], index: 2, kind: output, shape index: {}]  }
   0x1 LB: > { %s3120_s10 = sadd.s32 4294967295, %s4602_s9   ;;  %p3124_p0 = scmp.ge.s32.totalorder %s4602_s9, 1  ;;  %s4602_s9 = sphi %s4619_s9, %s12_s9  }
   0x2   : > { %p114_p1 = scmp.lt.s32.totalorder %s4602_s9, 5 }
   0x4   : > { %p115_p2 = pnand %p3124_p0, %p114_p1 }
   0x5   : > { %s3125_s23 = sshll.u32 (!%p115_p2), %s3120_s10, 4 }
   0x6   : > { %118 = sbr.rel (%p115_p2) target bundleno = 752 (0x2f0), region = 28  ;;  %p138_p3 = scmp.lt.s32.totalorder (!%p115_p2), %s3125_s23, 63 }
   0xb   : > { %v4434_v0 = vld [vmem:[%s5573_s1 + $0x38] sm:$0xff]  ;;  %v4433_v2 = vld [vmem:[%s5573_s1 + $0x30] sm:$0xff]  ;;  %v4432_v4 = vld [vmem:[%s5573_s1 + $0x28] sm:$0xff]  ;;  %s5576_s23 = smov (!%p138_p3, %s3125_s23), 63 }
   0xc   : > { %v4442_v1 = vld [vmem:[%s5573_s1 + $0x78] sm:$0xff]  ;;  %4571 = vmatpush.bf16.msra.mxu2 %v4434_v0  ;;  %v4441_v3 = vld [vmem:[%s5573_s1 + $0x70] sm:$0xff]  ;;  %2166 = vmatpush.bf16.msra.mxu0 %v4434_v0  ;;  %v4440_v5 = vld [vmem:[%s5573_s1 + $0x68] sm:$0xff]  ;;  %s4587_s8 = smul.u32 72, %s5576_s23 }
   0xd   : > { %4579 = vmatpush.bf16.msra.mxu3 %v4442_v1  ;;  %2215 = vmatpush.bf16.msra.mxu1 %v4442_v1  ;;  %v4431_v6 = vld [vmem:[%s5573_s1 + $0x20] sm:$0xff]  ;;  %v4430_v8 = vld [vmem:[%s5573_s1 + $0x18] sm:$0xff]  ;;  %v4429_v10 = vld [vmem:[%s5573_s1 + $0x10] sm:$0xff] }
   0xe   : > { %v4439_v7 = vld [vmem:[%s5573_s1 + $0x60] sm:$0xff]  ;;  %v4438_v9 = vld [vmem:[%s5573_s1 + $0x58] sm:$0xff]  ;;  %v4437_v11 = vld [vmem:[%s5573_s1 + $0x50] sm:$0xff]  ;;  %s4675_s16 = scalar_lea.vmem %s5572_s0, %s4587_s8 }
   0xf   : > { %v4428_v12 = vld [vmem:[%s5573_s1 + $0x8] sm:$0xff]  ;;  %v4427_v14 = vld [vmem:[%s5573_s1] sm:$0xff]  ;;  %v4450_v24 = vld [vmem:[%s5573_s1 + $0xb8] sm:$0xff] }
  0x10   : > { %4572 = vmatpush.bf16.msra.mxu2 %v4433_v2  ;;  %2167 = vmatpush.bf16.msra.mxu0 %v4433_v2  ;;  %v4436_v13 = vld [vmem:[%s5573_s1 + $0x48] sm:$0xff]  ;;  %v4435_v15 = vld [vmem:[%s5573_s1 + $0x40] sm:$0xff]  ;;  %v4458_v25 = vld [vmem:[%s5573_s1 + $0xf8] sm:$0xff] }
  0x11   : > { %4580 = vmatpush.bf16.msra.mxu3 %v4441_v3  ;;  %2216 = vmatpush.bf16.msra.mxu1 %v4441_v3  ;;  %v3419_v16 = vld [vmem:[%s4675_s16 + $0x240] sm:$0xf]  ;;  %v4364_v17 = vld [vmem:[%s4675_s16 + $0x284] sm:$0xf0]  ;;  %v4355_v18 = vld [vmem:[%s4675_s16 + $0x244] sm:$0xf] }
  0x12   : > { %v3421_v19 = vld [vmem:[%s4675_s16 + $0x288] sm:$0xf0]  ;;  %v3131_v20 = vld [vmem:[%s4675_s16] sm:$0xf]  ;;  %v4292_v21 = vld [vmem:[%s4675_s16 + $0x44] sm:$0xf0]  ;;  %v3420_v26 = vor.u32 %v4364_v17, %v3419_v16 }
  0x13   : > { %v4283_v22 = vld [vmem:[%s4675_s16 + $0x4] sm:$0xf]  ;;  %v3133_v23 = vld [vmem:[%s4675_s16 + $0x48] sm:$0xf0]  ;;  %v3424_v27 = vor.u32 %v4355_v18, %v3421_v19  ;;  %v3132_v28 = vor.u32 %v4292_v21, %v3131_v20  ;;  %v4466_v30 = vld [vmem:[%s5573_s1 + $0x138] sm:$0xff] }
  0x14   : > { %4573 = vmatpush.bf16.msra.mxu2 %v4432_v4  ;;  %2168 = vmatpush.bf16.msra.mxu0 %v4432_v4  ;;  %v3136_v29 = vor.u32 %v4283_v22, %v3133_v23  ;;  %v4474_v31 = vld [vmem:[%s5573_s1 + $0x178] sm:$0xff]  ;;  %v4449_v32 = vld [vmem:[%s5573_s1 + $0xb0] sm:$0xff]  ;;  %v4448_v36 = vld [vmem:[%s5573_s1 + $0xa8] sm:$0xff] }
  0x15   : > { %4581 = vmatpush.bf16.msra.mxu3 %v4440_v5  ;;  %2217 = vmatpush.bf16.msra.mxu1 %v4440_v5  ;;  %v4457_v33 = vld [vmem:[%s5573_s1 + $0xf0] sm:$0xff]  ;;  %v4456_v37 = vld [vmem:[%s5573_s1 + $0xe8] sm:$0xff]  ;;  %v4447_v41 = vld [vmem:[%s5573_s1 + $0xa0] sm:$0xff] }
  0x16   : > { %v4465_v34 = vld [vmem:[%s5573_s1 + $0x130] sm:$0xff]  ;;  %v4464_v38 = vld [vmem:[%s5573_s1 + $0x128] sm:$0xff]  ;;  %v4455_v42 = vld [vmem:[%s5573_s1 + $0xe0] sm:$0xff] }
  0x17   : > { %v4473_v35 = vld [vmem:[%s5573_s1 + $0x170] sm:$0xff]  ;;  %v4472_v39 = vld [vmem:[%s5573_s1 + $0x168] sm:$0xff]  ;;  %v4382_v43 = vld [vmem:[%s4675_s16 + $0x314] sm:$0xf0] }
  0x18   : > { %4574 = vmatpush.bf16.msra.mxu2 %v4431_v6  ;;  %2169 = vmatpush.bf16.msra.mxu0 %v4431_v6  ;;  %v3491_v40 = vld [vmem:[%s4675_s16 + $0x2d0] sm:$0xf]  ;;  %v4373_v44 = vld [vmem:[%s4675_s16 + $0x2d4] sm:$0xf]  ;;  %v3493_v45 = vld [vmem:[%s4675_s16 + $0x318] sm:$0xf0] }
  0x19   : > { %4582 = vmatpush.bf16.msra.mxu3 %v4439_v7  ;;  %2218 = vmatpush.bf16.msra.mxu1 %v4439_v7  ;;  %v3203_v46 = vld [vmem:[%s4675_s16 + $0x90] sm:$0xf]  ;;  %v4310_v47 = vld [vmem:[%s4675_s16 + $0xd4] sm:$0xf0]  ;;  %v4301_v48 = vld [vmem:[%s4675_s16 + $0x94] sm:$0xf]  ;;  %v3492_v54 = vor.u32 %v4382_v43, %v3491_v40  ;;  %v3496_v55 = vor.u32 %v4373_v44, %v3493_v45 }
  0x1a   : > { %v3205_v49 = vld [vmem:[%s4675_s16 + $0xd8] sm:$0xf0]  ;;  %v4463_v50 = vld [vmem:[%s5573_s1 + $0x120] sm:$0xff]  ;;  %v3204_v56 = vor.u32 %v4310_v47, %v3203_v46  ;;  %v4445_v60 = vld [vmem:[%s5573_s1 + $0x90] sm:$0xff] }
  0x1b   : > { %v4471_v51 = vld [vmem:[%s5573_s1 + $0x160] sm:$0xff]  ;;  %v4446_v52 = vld [vmem:[%s5573_s1 + $0x98] sm:$0xff]  ;;  %v3208_v57 = vor.u32 %v4301_v48, %v3205_v49  ;;  %v4453_v61 = vld [vmem:[%s5573_s1 + $0xd0] sm:$0xff] }
  0x1c   : > { %4575 = vmatpush.bf16.msra.mxu2 %v4430_v8  ;;  %2170 = vmatpush.bf16.msra.mxu0 %v4430_v8  ;;  %v4454_v53 = vld [vmem:[%s5573_s1 + $0xd8] sm:$0xff]  ;;  %v4461_v62 = vld [vmem:[%s5573_s1 + $0x110] sm:$0xff]  ;;  %v4444_v0 = vld [vmem:[%s5573_s1 + $0x88] sm:$0xff] }
  0x1d   : > { %4583 = vmatpush.bf16.msra.mxu3 %v4438_v9  ;;  %2219 = vmatpush.bf16.msra.mxu1 %v4438_v9  ;;  %v4462_v58 = vld [vmem:[%s5573_s1 + $0x118] sm:$0xff]  ;;  %v4469_v63 = vld [vmem:[%s5573_s1 + $0x150] sm:$0xff]  ;;  %v4452_v1 = vld [vmem:[%s5573_s1 + $0xc8] sm:$0xff] }
  0x1e   : > { %v4470_v59 = vld [vmem:[%s5573_s1 + $0x158] sm:$0xff]  ;;  %v4460_v2 = vld [vmem:[%s5573_s1 + $0x108] sm:$0xff]  ;;  %v4443_v4 = vld [vmem:[%s5573_s1 + $0x80] sm:$0xff] }
  0x1f   : > { %v4468_v3 = vld [vmem:[%s5573_s1 + $0x148] sm:$0xff]  ;;  %v4451_v5 = vld [vmem:[%s5573_s1 + $0xc0] sm:$0xff]  ;;  %v4482_v20 = vld [vmem:[%s5573_s1 + $0x1b8] sm:$0xff] }
  0x20   : > { %4576 = vmatpush.bf16.msra.mxu2 %v4429_v10  ;;  %2171 = vmatpush.bf16.msra.mxu0 %v4429_v10  ;;  %v3563_v6 = vld [vmem:[%s4675_s16 + $0x360] sm:$0xf]  ;;  %v4400_v7 = vld [vmem:[%s4675_s16 + $0x3a4] sm:$0xf0]  ;;  %v4391_v8 = vld [vmem:[%s4675_s16 + $0x364] sm:$0xf] }
  0x21   : > { %4584 = vmatpush.bf16.msra.mxu3 %v4437_v11  ;;  %2220 = vmatpush.bf16.msra.mxu1 %v4437_v11  ;;  %v3565_v9 = vld [vmem:[%s4675_s16 + $0x3a8] sm:$0xf0]  ;;  %v3275_v10 = vld [vmem:[%s4675_s16 + $0x120] sm:$0xf]  ;;  %v4328_v11 = vld [vmem:[%s4675_s16 + $0x164] sm:$0xf0] }
  0x22   : > { %v3568_v16 = vor.u32 %v4391_v8, %v3565_v9  ;;  %v3276_v17 = vor.u32 %v4328_v11, %v3275_v10  ;;  %v4467_v19 = vld [vmem:[%s5573_s1 + $0x140] sm:$0xff]  ;;  %v4490_v21 = vld [vmem:[%s5573_s1 + $0x1f8] sm:$0xff]  ;;  %v3139_v40 = vld [vmem:[%s4675_s16 + $0x8] sm:$0xf] }
  0x23   : > { %v4498_v22 = vld [vmem:[%s5573_s1 + $0x238] sm:$0xff]  ;;  %v3141_v43 = vld [vmem:[%s4675_s16 + $0x50] sm:$0xf0]  ;;  %v3147_v44 = vld [vmem:[%s4675_s16 + $0x10] sm:$0xf] }
  0x24   : > { %4577 = vmatpush.bf16.msra.mxu2 %v4428_v12  ;;  %2172 = vmatpush.bf16.msra.mxu0 %v4428_v12  ;;  %v4319_v12 = vld [vmem:[%s4675_s16 + $0x124] sm:$0xf]  ;;  %v4506_v23 = vld [vmem:[%s5573_s1 + $0x278] sm:$0xff]  ;;  %v4285_v46 = vld [vmem:[%s4675_s16 + $0x14] sm:$0xf] }
  0x25   : > { %4585 = vmatpush.bf16.msra.mxu3 %v4436_v13  ;;  %2221 = vmatpush.bf16.msra.mxu1 %v4436_v13  ;;  %v3277_v13 = vld [vmem:[%s4675_s16 + $0x168] sm:$0xf0]  ;;  %v4294_v45 = vld [vmem:[%s4675_s16 + $0x54] sm:$0xf0]  ;;  %v3149_v47 = vld [vmem:[%s4675_s16 + $0x58] sm:$0xf0] }
  0x26   : > { %v3280_v18 = vor.u32 %v4319_v12, %v3277_v13  ;;  %v3283_v8 = vld [vmem:[%s4675_s16 + $0x128] sm:$0xf]  ;;  %v4329_v9 = vld [vmem:[%s4675_s16 + $0x16c] sm:$0xf0]  ;;  %v4320_v10 = vld [vmem:[%s4675_s16 + $0x12c] sm:$0xf] }
  0x27   : > { %v3285_v11 = vld [vmem:[%s4675_s16 + $0x170] sm:$0xf0]  ;;  %v3291_v12 = vld [vmem:[%s4675_s16 + $0x130] sm:$0xf]  ;;  %v4330_v13 = vld [vmem:[%s4675_s16 + $0x174] sm:$0xf0] }
  0x28   : > { %4578 = vmatpush.bf16.msra.mxu2 %v4427_v14  ;;  %2173 = vmatpush.bf16.msra.mxu0 %v4427_v14  ;;  %v4459_v14 = vld [vmem:[%s5573_s1 + $0x100] sm:$0xff] }
  0x29   : > { %4586 = vmatpush.bf16.msra.mxu3 %v4435_v15  ;;  %2222 = vmatpush.bf16.msra.mxu1 %v4435_v15  ;;  %v3564_v15 = vor.u32 %v4400_v7, %v3563_v6  ;;  %v4495_v6 = vld [vmem:[%s5573_s1 + $0x220] sm:$0xff] }
  0x2a   : > { %v4503_v7 = vld [vmem:[%s5573_s1 + $0x260] sm:$0xff] }
  0x2b   : > { %2194 = vmatmul.bf16.vlgmr.msra.gmra.mxu2 %v3420_v26  ;;  %2174 = vmatmul.bf16.vlgmr.msra.gmra.mxu0 %v3132_v28  ;;  %v4409_v26 = vld [vmem:[%s4675_s16 + $0x3f4] sm:$0xf]  ;;  %v3347_v28 = vld [vmem:[%s4675_s16 + $0x1b0] sm:$0xf] }
  0x2c   : > { %2264 = vmatpush.bf16.msrb.mxu2 %v4450_v24  ;;  %2243 = vmatmul.bf16.vlgmr.msra.gmra.mxu3 %v3424_v27  ;;  %v3635_v24 = vld [vmem:[%s4675_s16 + $0x3f0] sm:$0xf]  ;;  %v3637_v27 = vld [vmem:[%s4675_s16 + $0x438] sm:$0xf0] }
  0x2d   : > { %2313 = vmatpush.bf16.msrb.mxu3 %v4458_v25  ;;  %2223 = vmatmul.bf16.vlgmr.msra.gmra.mxu1 %v3136_v29  ;;  %v4418_v25 = vld [vmem:[%s4675_s16 + $0x434] sm:$0xf0] }
  0x2e   : > { %2362 = vmatpush.bf16.msrb.mxu0 %v4466_v30  ;;  %2411 = vmatpush.bf16.msrb.mxu1 %v4474_v31  ;;  %v4346_v29 = vld [vmem:[%s4675_s16 + $0x1f4] sm:$0xf0]  ;;  %v4337_v30 = vld [vmem:[%s4675_s16 + $0x1b4] sm:$0xf]  ;;  %v3349_v31 = vld [vmem:[%s4675_s16 + $0x1f8] sm:$0xf0] }
  0x30   : > { %2265 = vmatpush.bf16.msrb.mxu2 %v4449_v32  ;;  %v3636_v32 = vor.u32 %v4418_v25, %v3635_v24  ;;  %v4347_v24 = vld [vmem:[%s4675_s16 + $0x1fc] sm:$0xf0]  ;;  %v4338_v25 = vld [vmem:[%s4675_s16 + $0x1bc] sm:$0xf] }
  0x31   : > { %2314 = vmatpush.bf16.msrb.mxu3 %v4457_v33  ;;  %v3640_v33 = vor.u32 %v4409_v26, %v3637_v27  ;;  %v3357_v26 = vld [vmem:[%s4675_s16 + $0x200] sm:$0xf0]  ;;  %v3363_v27 = vld [vmem:[%s4675_s16 + $0x1c0] sm:$0xf] }
  0x32   : > { %2363 = vmatpush.bf16.msrb.mxu0 %v4465_v34  ;;  %2412 = vmatpush.bf16.msrb.mxu1 %v4473_v35  ;;  %v3348_v34 = vor.u32 %v4346_v29, %v3347_v28  ;;  %v3352_v35 = vor.u32 %v4337_v30, %v3349_v31  ;;  %v4348_v28 = vld [vmem:[%s4675_s16 + $0x204] sm:$0xf0]  ;;  %v4339_v29 = vld [vmem:[%s4675_s16 + $0x1c4] sm:$0xf]  ;;  %v3365_v30 = vld [vmem:[%s4675_s16 + $0x208] sm:$0xf0] }
  0x34   : > { %2266 = vmatpush.bf16.msrb.mxu2 %v4448_v36  ;;  %v4481_v36 = vld [vmem:[%s5573_s1 + $0x1b0] sm:$0xff] }
  0x35   : > { %2315 = vmatpush.bf16.msrb.mxu3 %v4456_v37  ;;  %v4489_v37 = vld [vmem:[%s5573_s1 + $0x1f0] sm:$0xff] }
  0x36   : > { %2364 = vmatpush.bf16.msrb.mxu0 %v4464_v38  ;;  %2413 = vmatpush.bf16.msrb.mxu1 %v4472_v39  ;;  %v4497_v38 = vld [vmem:[%s5573_s1 + $0x230] sm:$0xff] }
  0x37   : > { %v4505_v39 = vld [vmem:[%s5573_s1 + $0x270] sm:$0xff] }
  0x38   : > { %2267 = vmatpush.bf16.msrb.mxu2 %v4447_v41  ;;  %v4293_v41 = vld [vmem:[%s4675_s16 + $0x4c] sm:$0xf0] }
  0x39   : > { %2316 = vmatpush.bf16.msrb.mxu3 %v4455_v42  ;;  %v4284_v42 = vld [vmem:[%s4675_s16 + $0xc] sm:$0xf]  ;;  %v3140_v48 = vor.u32 %v4293_v41, %v3139_v40  ;;  %v4365_v40 = vld [vmem:[%s4675_s16 + $0x28c] sm:$0xf0] }
  0x3a   : > { %2365 = vmatpush.bf16.msrb.mxu0 %v4463_v50  ;;  %2414 = vmatpush.bf16.msrb.mxu1 %v4471_v51  ;;  %v3144_v49 = vor.u32 %v4284_v42, %v3141_v43  ;;  %v3148_v50 = vor.u32 %v4294_v45, %v3147_v44  ;;  %v3152_v51 = vor.u32 %v4285_v46, %v3149_v47  ;;  %v4356_v41 = vld [vmem:[%s4675_s16 + $0x24c] sm:$0xf]  ;;  %v3429_v42 = vld [vmem:[%s4675_s16 + $0x290] sm:$0xf0]  ;;  %v3435_v43 = vld [vmem:[%s4675_s16 + $0x250] sm:$0xf] }
  0x3b   : > { %2199 = vmatmul.bf16.gmra.mxu2 %v3492_v54  ;;  %2179 = vmatmul.bf16.gmra.mxu0 %v3204_v56  ;;  %v4496_v54 = vld [vmem:[%s5573_s1 + $0x228] sm:$0xff]  ;;  %v3211_v56 = vld [vmem:[%s4675_s16 + $0x98] sm:$0xf]  ;;  %v4357_v45 = vld [vmem:[%s4675_s16 + $0x254] sm:$0xf] }
  0x3c   : > { %2268 = vmatpush.bf16.msrb.mxu2 %v4446_v52  ;;  %2248 = vmatmul.bf16.gmra.mxu3 %v3496_v55  ;;  %v4480_v52 = vld [vmem:[%s5573_s1 + $0x1a8] sm:$0xff]  ;;  %v4366_v44 = vld [vmem:[%s4675_s16 + $0x294] sm:$0xf0]  ;;  %v3437_v46 = vld [vmem:[%s4675_s16 + $0x298] sm:$0xf0] }
  0x3d   : > { %2317 = vmatpush.bf16.msrb.mxu3 %v4454_v53  ;;  %2228 = vmatmul.bf16.gmra.mxu1 %v3208_v57  ;;  %v4488_v53 = vld [vmem:[%s5573_s1 + $0x1e8] sm:$0xff]  ;;  %v4311_v57 = vld [vmem:[%s4675_s16 + $0xdc] sm:$0xf0] }
  0x3e   : > { %2366 = vmatpush.bf16.msrb.mxu0 %v4462_v58  ;;  %2415 = vmatpush.bf16.msrb.mxu1 %v4470_v59  ;;  %v4504_v55 = vld [vmem:[%s5573_s1 + $0x268] sm:$0xff]  ;;  %v4302_v58 = vld [vmem:[%s4675_s16 + $0x9c] sm:$0xf]  ;;  %v3213_v59 = vld [vmem:[%s4675_s16 + $0xe0] sm:$0xf0] }
  0x40   : > { %2269 = vmatpush.bf16.msrb.mxu2 %v4445_v60  ;;  %v3219_v60 = vld [vmem:[%s4675_s16 + $0xa0] sm:$0xf] }
  0x41   : > { %2318 = vmatpush.bf16.msrb.mxu3 %v4453_v61  ;;  %v4312_v61 = vld [vmem:[%s4675_s16 + $0xe4] sm:$0xf0] }
  0x42   : > { %2367 = vmatpush.bf16.msrb.mxu0 %v4461_v62  ;;  %2416 = vmatpush.bf16.msrb.mxu1 %v4469_v63  ;;  %v4303_v62 = vld [vmem:[%s4675_s16 + $0xa4] sm:$0xf]  ;;  %v3221_v63 = vld [vmem:[%s4675_s16 + $0xe8] sm:$0xf0] }
  0x44   : > { %2270 = vmatpush.bf16.msrb.mxu2 %v4444_v0  ;;  %v3212_v0 = vor.u32 %v4311_v57, %v3211_v56  ;;  %v4484_v56 = vld [vmem:[%s5573_s1 + $0x1c8] sm:$0xff] }
  0x45   : > { %2319 = vmatpush.bf16.msrb.mxu3 %v4452_v1  ;;  %v3216_v1 = vor.u32 %v4302_v58, %v3213_v59 }
  0x46   : > { %2368 = vmatpush.bf16.msrb.mxu0 %v4460_v2  ;;  %2417 = vmatpush.bf16.msrb.mxu1 %v4468_v3  ;;  %v3220_v2 = vor.u32 %v4312_v61, %v3219_v60  ;;  %v3224_v3 = vor.u32 %v4303_v62, %v3221_v63  ;;  %v4492_v63 = vld [vmem:[%s5573_s1 + $0x208] sm:$0xff] }
  0x48   : > { %2271 = vmatpush.bf16.msrb.mxu2 %v4443_v4  ;;  %v4479_v4 = vld [vmem:[%s5573_s1 + $0x1a0] sm:$0xff] }
  0x49   : > { %2320 = vmatpush.bf16.msrb.mxu3 %v4451_v5  ;;  %v4487_v5 = vld [vmem:[%s5573_s1 + $0x1e0] sm:$0xff] }
  0x4a   : > { %2369 = vmatpush.bf16.msrb.mxu0 %v4459_v14  ;;  %2418 = vmatpush.bf16.msrb.mxu1 %v4467_v19  ;;  %v4321_v14 = vld [vmem:[%s4675_s16 + $0x134] sm:$0xf] }
  0x4b   : > { %2204 = vmatmul.bf16.gmra.mxu2 %v3564_v15  ;;  %2184 = vmatmul.bf16.gmra.mxu0 %v3276_v17  ;;  %v3293_v15 = vld [vmem:[%s4675_s16 + $0x178] sm:$0xf0]  ;;  %v3288_v17 = vor.u32 %v4320_v10, %v3285_v11 }
  0x4c   : > { %2253 = vmatmul.bf16.gmra.mxu3 %v3568_v16  ;;  %2460 = vmatpush.bf16.msra.mxu2 %v4482_v20  ;;  %v3284_v16 = vor.u32 %v4329_v9, %v3283_v8  ;;  %v3296_v19 = vor.u32 %v4321_v14, %v3293_v15  ;;  %v4478_v20 = vld [vmem:[%s5573_s1 + $0x198] sm:$0xff] }
  0x4d   : > { %2233 = vmatmul.bf16.gmra.mxu1 %v3280_v18  ;;  %2509 = vmatpush.bf16.msra.mxu3 %v4490_v21  ;;  %v3292_v18 = vor.u32 %v4330_v13, %v3291_v12  ;;  %v4486_v21 = vld [vmem:[%s5573_s1 + $0x1d8] sm:$0xff]  ;;  %v4500_v13 = vld [vmem:[%s5573_s1 + $0x248] sm:$0xff] }
  0x4e   : > { %2558 = vmatpush.bf16.msra.mxu0 %v4498_v22  ;;  %2607 = vmatpush.bf16.msra.mxu1 %v4506_v23  ;;  %v4494_v22 = vld [vmem:[%s5573_s1 + $0x218] sm:$0xff] }
  0x4f   : > { %v3355_v23 = vld [vmem:[%s4675_s16 + $0x1b8] sm:$0xf] }
  0x50   : > { %2461 = vmatpush.bf16.msra.mxu2 %v4481_v36  ;;  %v3356_v31 = vor.u32 %v4347_v24, %v3355_v23  ;;  %v4477_v36 = vld [vmem:[%s5573_s1 + $0x190] sm:$0xff] }
  0x51   : > { %2510 = vmatpush.bf16.msra.mxu3 %v4489_v37  ;;  %v4485_v37 = vld [vmem:[%s5573_s1 + $0x1d0] sm:$0xff] }
  0x52   : > { %2559 = vmatpush.bf16.msra.mxu0 %v4497_v38  ;;  %2608 = vmatpush.bf16.msra.mxu1 %v4505_v39  ;;  %v4493_v38 = vld [vmem:[%s5573_s1 + $0x210] sm:$0xff]  ;;  %v3427_v39 = vld [vmem:[%s4675_s16 + $0x248] sm:$0xf] }
  0x53   : > { %v3428_v47 = vor.u32 %v4365_v40, %v3427_v39 }
  0x54   : > { %2462 = vmatpush.bf16.msra.mxu2 %v4480_v52 }
  0x55   : > { %2511 = vmatpush.bf16.msra.mxu3 %v4488_v53 }
  0x56   : > { %2560 = vmatpush.bf16.msra.mxu0 %v4496_v54  ;;  %2609 = vmatpush.bf16.msra.mxu1 %v4504_v55  ;;  %v4476_v55 = vld [vmem:[%s5573_s1 + $0x188] sm:$0xff] }
  0x58   : > { %2463 = vmatpush.bf16.msra.mxu2 %v4479_v4  ;;  %v3507_v4 = vld [vmem:[%s4675_s16 + $0x2e0] sm:$0xf] }
  0x59   : > { %2512 = vmatpush.bf16.msra.mxu3 %v4487_v5  ;;  %v4384_v5 = vld [vmem:[%s4675_s16 + $0x324] sm:$0xf0] }
  0x5a   : > { %2561 = vmatpush.bf16.msra.mxu0 %v4495_v6  ;;  %2610 = vmatpush.bf16.msra.mxu1 %v4503_v7  ;;  %v4375_v6 = vld [vmem:[%s4675_s16 + $0x2e4] sm:$0xf]  ;;  %v3509_v7 = vld [vmem:[%s4675_s16 + $0x328] sm:$0xf0]  ;;  %v3508_v14 = vor.u32 %v4384_v5, %v3507_v4 }
  0x5b   : > { %2209 = vmatmul.bf16.gmra.mxu2 %v3636_v32  ;;  %2189 = vmatmul.bf16.gmra.mxu0 %v3348_v34  ;;  %v3360_v32 = vor.u32 %v4338_v25, %v3357_v26  ;;  %v3364_v34 = vor.u32 %v4348_v28, %v3363_v27  ;;  %v3512_v15 = vor.u32 %v4375_v6, %v3509_v7  ;;  %v4491_v27 = vld [vmem:[%s5573_s1 + $0x200] sm:$0xff]  ;;  %v3571_v28 = vld [vmem:[%s4675_s16 + $0x368] sm:$0xf] }
  0x5c   : > { %2258 = vmatmul.bf16.gmra.mxu3 %v3640_v33  ;;  %2464 = vmatpush.bf16.msra.mxu2 %v4478_v20  ;;  %v4502_v33 = vld [vmem:[%s5573_s1 + $0x258] sm:$0xff]  ;;  %v4483_v20 = vld [vmem:[%s5573_s1 + $0x1c0] sm:$0xff] }
  0x5d   : > { %2238 = vmatmul.bf16.gmra.mxu1 %v3352_v35  ;;  %2513 = vmatpush.bf16.msra.mxu3 %v4486_v21  ;;  %v3368_v35 = vor.u32 %v4339_v29, %v3365_v30  ;;  %v4401_v29 = vld [vmem:[%s4675_s16 + $0x3ac] sm:$0xf0]  ;;  %v4392_v30 = vld [vmem:[%s4675_s16 + $0x36c] sm:$0xf] }
  0x5e   : > { %2562 = vmatpush.bf16.msra.mxu0 %v4494_v22  ;;  %2611 = vmatpush.bf16.msra.mxu1 %v4502_v33  ;;  %v4402_v33 = vld [vmem:[%s4675_s16 + $0x3b4] sm:$0xf0]  ;;  %v3572_v39 = vor.u32 %v4401_v29, %v3571_v28  ;;  %v4529_v28 = vld [vmem:[%s5573_s1 + $0x330] sm:$0xff]  ;;  %v4286_v29 = vld [vmem:[%s4675_s16 + $0x1c] sm:$0xf] }
  0x60   : > { %2465 = vmatpush.bf16.msra.mxu2 %v4477_v36 }
  0x61   : > { %2514 = vmatpush.bf16.msra.mxu3 %v4485_v37 }
  0x62   : > { %2563 = vmatpush.bf16.msra.mxu0 %v4493_v38 }
  0x64   : > { %2466 = vmatpush.bf16.msra.mxu2 %v4476_v55 }
  0x65   : > { %2515 = vmatpush.bf16.msra.mxu3 %v4484_v56  ;;  %v3643_v56 = vld [vmem:[%s4675_s16 + $0x3f8] sm:$0xf] }
  0x66   : > { %2564 = vmatpush.bf16.msra.mxu0 %v4492_v63  ;;  %v3651_v63 = vld [vmem:[%s4675_s16 + $0x400] sm:$0xf] }
  0x69   : > { %2516 = vmatpush.bf16.msra.mxu3 %v4483_v20 }
  0x6a   : > { %2565 = vmatpush.bf16.msra.mxu0 %v4491_v27  ;;  %v4295_v27 = vld [vmem:[%s4675_s16 + $0x5c] sm:$0xf0] }
  0x6b   : > { %2272 = vmatmul.bf16.vlgmr.msrb.gmra.mxu2 %v3140_v48  ;;  %2370 = vmatmul.bf16.vlgmr.msrb.gmra.mxu0 %v3148_v50  ;;  %v3432_v48 = vor.u32 %v4356_v41, %v3429_v42  ;;  %v3436_v50 = vor.u32 %v4366_v44, %v3435_v43  ;;  %v4499_v41 = vld [vmem:[%s5573_s1 + $0x240] sm:$0xff] }
  0x6c   : > { %2321 = vmatmul.bf16.vlgmr.msrb.gmra.mxu3 %v3144_v49  ;;  %v4501_v49 = vld [vmem:[%s5573_s1 + $0x250] sm:$0xff] }
  0x6d   : > { %2419 = vmatmul.bf16.vlgmr.msrb.gmra.mxu1 %v3152_v51  ;;  %v3440_v51 = vor.u32 %v4357_v45, %v3437_v46 }
  0x6e   : > { %2612 = vmatpush.bf16.msra.mxu1 %v4501_v49 }
  0x72   : > { %2613 = vmatpush.bf16.msra.mxu1 %v4500_v13 }
  0x76   : > { %2614 = vmatpush.bf16.msra.mxu1 %v4499_v41 }
  0x7b   : > { %2277 = vmatmul.bf16.gmra.mxu2 %v3212_v0  ;;  %2375 = vmatmul.bf16.gmra.mxu0 %v3220_v2  ;;  %v3499_v0 = vld [vmem:[%s4675_s16 + $0x2d8] sm:$0xf]  ;;  %v4374_v2 = vld [vmem:[%s4675_s16 + $0x2dc] sm:$0xf] }
  0x7c   : > { %2326 = vmatmul.bf16.gmra.mxu3 %v3216_v1  ;;  %v4383_v1 = vld [vmem:[%s4675_s16 + $0x31c] sm:$0xf0] }
  0x7d   : > { %2424 = vmatmul.bf16.gmra.mxu1 %v3224_v3  ;;  %v3501_v3 = vld [vmem:[%s4675_s16 + $0x320] sm:$0xf0]  ;;  %v3500_v11 = vor.u32 %v4383_v1, %v3499_v0  ;;  %v4420_v0 = vld [vmem:[%s4675_s16 + $0x444] sm:$0xf0] }
  0x7e   : > { %v3504_v12 = vor.u32 %v4374_v2, %v3501_v3  ;;  %v4411_v1 = vld [vmem:[%s4675_s16 + $0x404] sm:$0xf]  ;;  %v3653_v2 = vld [vmem:[%s4675_s16 + $0x448] sm:$0xf0] }
  0x8b   : > { %2282 = vmatmul.bf16.gmra.mxu2 %v3284_v16  ;;  %2380 = vmatmul.bf16.gmra.mxu0 %v3292_v18 }
  0x8c   : > { %2331 = vmatmul.bf16.gmra.mxu3 %v3288_v17 }
  0x8d   : > { %2429 = vmatmul.bf16.gmra.mxu1 %v3296_v19  ;;  %v4475_v19 = vld [vmem:[%s5573_s1 + $0x180] sm:$0xff] }
  0x8e   : > { %2467 = vmatpush.bf16.msra.mxu2 %v4475_v19 }
  0x9b   : > { %2287 = vmatmul.bf16.gmra.mxu2 %v3356_v31  ;;  %2385 = vmatmul.bf16.gmra.mxu0 %v3364_v34  ;;  %v3573_v31 = vld [vmem:[%s4675_s16 + $0x3b0] sm:$0xf0] }
  0x9c   : > { %2336 = vmatmul.bf16.gmra.mxu3 %v3360_v32  ;;  %v3579_v32 = vld [vmem:[%s4675_s16 + $0x370] sm:$0xf]  ;;  %v4393_v34 = vld [vmem:[%s4675_s16 + $0x374] sm:$0xf]  ;;  %v3576_v40 = vor.u32 %v4392_v30, %v3573_v31  ;;  %v3157_v30 = vld [vmem:[%s4675_s16 + $0x60] sm:$0xf0] }
  0x9d   : > { %2434 = vmatmul.bf16.gmra.mxu1 %v3368_v35  ;;  %v3581_v35 = vld [vmem:[%s4675_s16 + $0x3b8] sm:$0xf0]  ;;  %v3580_v42 = vor.u32 %v4402_v33, %v3579_v32  ;;  %v3163_v31 = vld [vmem:[%s4675_s16 + $0x20] sm:$0xf]  ;;  %v4296_v32 = vld [vmem:[%s4675_s16 + $0x64] sm:$0xf0] }
  0x9e   : > { %v3584_v43 = vor.u32 %v4393_v34, %v3581_v35  ;;  %v4287_v33 = vld [vmem:[%s4675_s16 + $0x24] sm:$0xf]  ;;  %v3165_v34 = vld [vmem:[%s4675_s16 + $0x68] sm:$0xf0]  ;;  %v3164_v41 = vor.u32 %v4296_v32, %v3163_v31 }
  0xa8   : > { %v2175_v52 = vpop.f32.mrf.mxu0 }
  0xaa   : > { %v2224_v53 = vpop.f32.mrf.mxu1 }
  0xab   : > { %v4923_v54 = vadd.f32 %v2224_v53, %v2175_v52  ;;  %2292 = vmatmul.bf16.gmra.mxu2 %v3428_v47  ;;  %2390 = vmatmul.bf16.gmra.mxu0 %v3436_v50  ;;  %v4514_v47 = vld [vmem:[%s5573_s1 + $0x2b8] sm:$0xff] }
  0xac   : > { %2341 = vmatmul.bf16.gmra.mxu3 %v3432_v48  ;;  %v4522_v48 = vld [vmem:[%s5573_s1 + $0x2f8] sm:$0xff]  ;;  %2656 = vmatpush.bf16.msrb.mxu2 %v4514_v47  ;;  %v4512_v47 = vld [vmem:[%s5573_s1 + $0x2a8] sm:$0xff] }
  0xad   : > { %2439 = vmatmul.bf16.gmra.mxu1 %v3440_v51  ;;  %2705 = vmatpush.bf16.msrb.mxu3 %v4522_v48  ;;  %v4520_v48 = vld [vmem:[%s5573_s1 + $0x2e8] sm:$0xff] }
  0xae   : > { %v2195_v57 = vpop.f32.mrf.mxu2 }
  0xaf   : > { %v2244_v58 = vpop.f32.mrf.mxu3 }
  0xb0   : > { %v4931_v59 = vadd.f32 %v2244_v58, %v2195_v57  ;;  %v2177_v60 = vpop.f32.mrf.mxu0  ;;  %v4419_v57 = vld [vmem:[%s4675_s16 + $0x43c] sm:$0xf0]  ;;  %v4530_v58 = vld [vmem:[%s5573_s1 + $0x338] sm:$0xff] }
  0xb1   : > { %2754 = vmatpush.bf16.msrb.mxu0 %v4530_v58  ;;  %v3644_v6 = vor.u32 %v4419_v57, %v3643_v56 }
  0xb2   : > { %v2226_v61 = vpop.f32.mrf.mxu1 }
  0xb3   : > { %v4933_v62 = vadd.f32 %v2226_v61, %v2177_v60  ;;  %v4410_v60 = vld [vmem:[%s4675_s16 + $0x3fc] sm:$0xf]  ;;  %v3645_v61 = vld [vmem:[%s4675_s16 + $0x440] sm:$0xf0] }
  0xb4   : > { %v3648_v7 = vor.u32 %v4410_v60, %v3645_v61  ;;  %v3227_v60 = vld [vmem:[%s4675_s16 + $0xa8] sm:$0xf]  ;;  %v4313_v61 = vld [vmem:[%s4675_s16 + $0xec] sm:$0xf0] }
  0xb5   : > { %2755 = vmatpush.bf16.msrb.mxu0 %v4529_v28 }
  0xb6   : > { %v2197_v8 = vpop.f32.mrf.mxu2 }
  0xb7   : > { %v2246_v9 = vpop.f32.mrf.mxu3 }
  0xb8   : > { %v4946_v10 = vadd.f32 %v2246_v9, %v2197_v8  ;;  %v2180_v16 = vpop.f32.mrf.mxu0  ;;  %v3652_v8 = vor.u32 %v4420_v0, %v3651_v63  ;;  %v3656_v9 = vor.u32 %v4411_v1, %v3653_v2  ;;  %v4528_v63 = vld [vmem:[%s5573_s1 + $0x328] sm:$0xff]  ;;  %v3229_v1 = vld [vmem:[%s4675_s16 + $0xf0] sm:$0xf0]  ;;  %v3235_v2 = vld [vmem:[%s4675_s16 + $0xb0] sm:$0xf] }
  0xb9   : > { %v4304_v0 = vld [vmem:[%s4675_s16 + $0xac] sm:$0xf]  ;;  %2756 = vmatpush.bf16.msrb.mxu0 %v4528_v63  ;;  %v4535_v63 = vld [vmem:[%s5573_s1 + $0x360] sm:$0xff] }
  0xba   : > { %v2229_v17 = vpop.f32.mrf.mxu1 }
  0xbb   : > { %v4951_v18 = vadd.f32 %v2229_v17, %v2180_v16  ;;  %2297 = vmatmul.bf16.gmra.mxu2 %v3500_v11  ;;  %2395 = vmatmul.bf16.gmra.mxu0 %v3508_v14  ;;  %v4538_v14 = vld [vmem:[%s5573_s1 + $0x378] sm:$0xff]  ;;  %v4521_v16 = vld [vmem:[%s5573_s1 + $0x2f0] sm:$0xff] }
  0xbc   : > { %2346 = vmatmul.bf16.gmra.mxu3 %v3504_v12  ;;  %2803 = vmatpush.bf16.msrb.mxu1 %v4538_v14 }
  0xbd   : > { %2444 = vmatmul.bf16.gmra.mxu1 %v3512_v15  ;;  %v4513_v15 = vld [vmem:[%s5573_s1 + $0x2b0] sm:$0xff]  ;;  %2706 = vmatpush.bf16.msrb.mxu3 %v4521_v16 }
  0xbe   : > { %v2200_v21 = vpop.f32.mrf.mxu2  ;;  %2657 = vmatpush.bf16.msrb.mxu2 %v4513_v15 }
  0xbf   : > { %v2249_v22 = vpop.f32.mrf.mxu3 }
  0xc0   : > { %v4959_v23 = vadd.f32 %v2249_v22, %v2200_v21  ;;  %v2182_v24 = vpop.f32.mrf.mxu0 }
  0xc1   : > { %2707 = vmatpush.bf16.msrb.mxu3 %v4520_v48 }
  0xc2   : > { %v2231_v25 = vpop.f32.mrf.mxu1  ;;  %2658 = vmatpush.bf16.msrb.mxu2 %v4512_v47 }
  0xc3   : > { %v4961_v26 = vadd.f32 %v2231_v25, %v2182_v24  ;;  %v3155_v25 = vld [vmem:[%s4675_s16 + $0x18] sm:$0xf] }
  0xc6   : > { %v2202_v36 = vpop.f32.mrf.mxu2 }
  0xc7   : > { %v2251_v37 = vpop.f32.mrf.mxu3 }
  0xc8   : > { %v4974_v38 = vadd.f32 %v2251_v37, %v2202_v36  ;;  %v2185_v44 = vpop.f32.mrf.mxu0 }
  0xca   : > { %v2234_v45 = vpop.f32.mrf.mxu1 }
  0xcb   : > { %v4979_v46 = vadd.f32 %v2234_v45, %v2185_v44  ;;  %2302 = vmatmul.bf16.gmra.mxu2 %v3572_v39  ;;  %2400 = vmatmul.bf16.gmra.mxu0 %v3580_v42  ;;  %v3156_v39 = vor.u32 %v4295_v27, %v3155_v25  ;;  %v3168_v42 = vor.u32 %v4287_v33, %v3165_v34  ;;  %v4537_v45 = vld [vmem:[%s5573_s1 + $0x370] sm:$0xff]  ;;  %v4511_v25 = vld [vmem:[%s5573_s1 + $0x2a0] sm:$0xff] }
  0xcc   : > { %2351 = vmatmul.bf16.gmra.mxu3 %v3576_v40  ;;  %v3160_v40 = vor.u32 %v4286_v29, %v3157_v30  ;;  %2804 = vmatpush.bf16.msrb.mxu1 %v4537_v45  ;;  %v3309_v45 = vld [vmem:[%s4675_s16 + $0x188] sm:$0xf0] }
  0xcd   : > { %2449 = vmatmul.bf16.gmra.mxu1 %v3584_v43  ;;  %2659 = vmatpush.bf16.msrb.mxu2 %v4511_v25 }
  0xce   : > { %v2205_v49 = vpop.f32.mrf.mxu2 }
  0xcf   : > { %v2254_v50 = vpop.f32.mrf.mxu3 }
  0xd0   : > { %v4987_v51 = vadd.f32 %v2254_v50, %v2205_v49  ;;  %v2187_v52 = vpop.f32.mrf.mxu0 }
  0xd2   : > { %v2236_v53 = vpop.f32.mrf.mxu1 }
  0xd3   : > { %v4989_v55 = vadd.f32 %v2236_v53, %v2187_v52 }
  0xd6   : > { %v2207_v3 = vpop.f32.mrf.mxu2 }
  0xd7   : > { %v2256_v4 = vpop.f32.mrf.mxu3 }
  0xd8   : > { %v5002_v5 = vadd.f32 %v2256_v4, %v2207_v3  ;;  %v2190_v11 = vpop.f32.mrf.mxu0  ;;  %v4314_v3 = vld [vmem:[%s4675_s16 + $0xf4] sm:$0xf0]  ;;  %v4305_v4 = vld [vmem:[%s4675_s16 + $0xb4] sm:$0xf] }
  0xd9   : > { %v3236_v14 = vor.u32 %v4314_v3, %v3235_v2 }
  0xda   : > { %v2239_v12 = vpop.f32.mrf.mxu1 }
  0xdb   : > { %v5004_v13 = vadd.f32 %v2239_v12, %v2190_v11  ;;  %2307 = vmatmul.bf16.gmra.mxu2 %v3644_v6  ;;  %2405 = vmatmul.bf16.gmra.mxu0 %v3652_v8  ;;  %v3237_v6 = vld [vmem:[%s4675_s16 + $0xf8] sm:$0xf0]  ;;  %v3228_v11 = vor.u32 %v4313_v61, %v3227_v60  ;;  %v3232_v12 = vor.u32 %v4304_v0, %v3229_v1 }
  0xdc   : > { %2356 = vmatmul.bf16.gmra.mxu3 %v3648_v7  ;;  %v3240_v15 = vor.u32 %v4305_v4, %v3237_v6  ;;  %v4510_v0 = vld [vmem:[%s5573_s1 + $0x298] sm:$0xff] }
  0xdd   : > { %2454 = vmatmul.bf16.gmra.mxu1 %v3656_v9  ;;  %2660 = vmatpush.bf16.msrb.mxu2 %v4510_v0 }
  0xde   : > { %v2210_v17 = vpop.f32.mrf.mxu2 }
  0xdf   : > { %v2259_v19 = vpop.f32.mrf.mxu3 }
  0xe0   : > { %v5015_v20 = vadd.f32 %v2259_v19, %v2210_v17  ;;  %v2192_v21 = vpop.f32.mrf.mxu0 }
  0xe2   : > { %v2241_v22 = vpop.f32.mrf.mxu1 }
  0xe3   : > { %v5017_v24 = vadd.f32 %v2241_v22, %v2192_v21  ;;  %v4536_v22 = vld [vmem:[%s5573_s1 + $0x368] sm:$0xff] }
  0xe4   : > { %2805 = vmatpush.bf16.msrb.mxu1 %v4536_v22  ;;  %v3381_v22 = vld [vmem:[%s4675_s16 + $0x218] sm:$0xf0] }
  0xe6   : > { %v2212_v35 = vpop.f32.mrf.mxu2 }
  0xe7   : > { %v2261_v36 = vpop.f32.mrf.mxu3 }
  0xe8   : > { %v5030_v37 = vadd.f32 %v2261_v36, %v2212_v35  ;;  %v2371_v43 = vpop.f32.mrf.mxu0  ;;  %v3299_v35 = vld [vmem:[%s4675_s16 + $0x138] sm:$0xf]  ;;  %v4331_v36 = vld [vmem:[%s4675_s16 + $0x17c] sm:$0xf0]  ;;  %2806 = vmatpush.bf16.msrb.mxu1 %v4535_v63  ;;  %v3453_v63 = vld [vmem:[%s4675_s16 + $0x2a8] sm:$0xf0] }
  0xea   : > { %v2420_v44 = vpop.f32.mrf.mxu1 }
  0xeb   : > { %2468 = vmatmul.bf16.vlgmr.msra.gmra.mxu2 %v3156_v39  ;;  %2566 = vmatmul.bf16.vlgmr.msra.gmra.mxu0 %v3164_v41  ;;  %v4527_v39 = vld [vmem:[%s5573_s1 + $0x320] sm:$0xff] }
  0xec   : > { %2517 = vmatmul.bf16.vlgmr.msra.gmra.mxu3 %v3160_v40  ;;  %v4322_v40 = vld [vmem:[%s4675_s16 + $0x13c] sm:$0xf]  ;;  %v3301_v41 = vld [vmem:[%s4675_s16 + $0x180] sm:$0xf0]  ;;  %2757 = vmatpush.bf16.msrb.mxu0 %v4527_v39 }
  0xed   : > { %2615 = vmatmul.bf16.vlgmr.msra.gmra.mxu1 %v3168_v42  ;;  %v3307_v42 = vld [vmem:[%s4675_s16 + $0x140] sm:$0xf]  ;;  %v4534_v39 = vld [vmem:[%s5573_s1 + $0x358] sm:$0xff] }
  0xee   : > { %v2273_v49 = vpop.f32.mrf.mxu2  ;;  %2807 = vmatpush.bf16.msrb.mxu1 %v4534_v39  ;;  %v3525_v39 = vld [vmem:[%s4675_s16 + $0x338] sm:$0xf0] }
  0xef   : > { %v2322_v50 = vpop.f32.mrf.mxu3  ;;  %v2274_v52 = vadd.f32 %v2273_v49, %v4923_v54 }
  0xf0   : > { %v2373_v56 = vpop.f32.mrf.mxu0 }
  0xf1   : > { %v2323_v53 = vadd.f32 %v2322_v50, %v2274_v52  ;;  %v3300_v50 = vor.u32 %v4331_v36, %v3299_v35  ;;  %v3304_v52 = vor.u32 %v4322_v40, %v3301_v41  ;;  %v4509_v40 = vld [vmem:[%s5573_s1 + $0x290] sm:$0xff] }
  0xf2   : > { %v2422_v57 = vpop.f32.mrf.mxu1  ;;  %2661 = vmatpush.bf16.msrb.mxu2 %v4509_v40 }
  0xf3   : > { %v2372_v58 = vadd.f32 %v2371_v43, %v2323_v53  ;;  %v4332_v43 = vld [vmem:[%s4675_s16 + $0x184] sm:$0xf0] }
  0xf4   : > { %v3308_v53 = vor.u32 %v4332_v43, %v3307_v42 }
  0xf5   : > { %v5053_v7 = vadd.f32 %v2420_v44, %v2372_v58  ;;  %v4323_v44 = vld [vmem:[%s4675_s16 + $0x144] sm:$0xf] }
  0xf6   : > { %v2275_v54 = vpop.f32.mrf.mxu2 }
  0xf7   : > { %v2324_v8 = vpop.f32.mrf.mxu3  ;;  %v2276_v9 = vadd.f32 %v2275_v54, %v4933_v62  ;;  %v4519_v62 = vld [vmem:[%s5573_s1 + $0x2e0] sm:$0xff] }
  0xf8   : > { %v2376_v17 = vpop.f32.mrf.mxu0  ;;  %2708 = vmatpush.bf16.msrb.mxu3 %v4519_v62 }
  0xf9   : > { %v2325_v16 = vadd.f32 %v2324_v8, %v2276_v9 }
  0xfa   : > { %v2425_v19 = vpop.f32.mrf.mxu1 }
  0xfb   : > { %v2374_v21 = vadd.f32 %v2373_v56, %v2325_v16  ;;  %2473 = vmatmul.bf16.gmra.mxu2 %v3228_v11  ;;  %2571 = vmatmul.bf16.gmra.mxu0 %v3236_v14  ;;  %v3312_v56 = vor.u32 %v4323_v44, %v3309_v45  ;;  %v3371_v11 = vld [vmem:[%s4675_s16 + $0x1c8] sm:$0xf]  ;;  %v4526_v14 = vld [vmem:[%s5573_s1 + $0x318] sm:$0xff]  ;;  %v3373_v16 = vld [vmem:[%s4675_s16 + $0x210] sm:$0xf0] }
  0xfc   : > { %2522 = vmatmul.bf16.gmra.mxu3 %v3232_v12  ;;  %v4349_v12 = vld [vmem:[%s4675_s16 + $0x20c] sm:$0xf0]  ;;  %2758 = vmatpush.bf16.msrb.mxu0 %v4526_v14 }
  0xfd   : > { %2620 = vmatmul.bf16.gmra.mxu1 %v3240_v15  ;;  %v5065_v27 = vadd.f32 %v2422_v57, %v2374_v21  ;;  %v4340_v15 = vld [vmem:[%s4675_s16 + $0x1cc] sm:$0xf]  ;;  %v4341_v21 = vld [vmem:[%s4675_s16 + $0x1d4] sm:$0xf] }
  0xfe   : > { %v2278_v28 = vpop.f32.mrf.mxu2  ;;  %v4533_v14 = vld [vmem:[%s5573_s1 + $0x350] sm:$0xff] }
  0xff   : > { %v2327_v29 = vpop.f32.mrf.mxu3  ;;  %v2279_v30 = vadd.f32 %v2278_v28, %v4951_v18  ;;  %2808 = vmatpush.bf16.msrb.mxu1 %v4533_v14  ;;  %v3597_v14 = vld [vmem:[%s4675_s16 + $0x3c8] sm:$0xf0] }
 0x100   : > { %v2378_v32 = vpop.f32.mrf.mxu0 }
 0x101   : > { %v2328_v31 = vadd.f32 %v2327_v29, %v2279_v30  ;;  %v3372_v29 = vor.u32 %v4349_v12, %v3371_v11  ;;  %v3376_v30 = vor.u32 %v4340_v15, %v3373_v16  ;;  %v4508_v15 = vld [vmem:[%s5573_s1 + $0x288] sm:$0xff] }
 0x102   : > { %v2427_v33 = vpop.f32.mrf.mxu1  ;;  %2662 = vmatpush.bf16.msrb.mxu2 %v4508_v15 }
 0x103   : > { %v2377_v34 = vadd.f32 %v2376_v17, %v2328_v31  ;;  %v3379_v17 = vld [vmem:[%s4675_s16 + $0x1d0] sm:$0xf] }
 0x105   : > { %v5079_v47 = vadd.f32 %v2425_v19, %v2377_v34  ;;  %v4350_v19 = vld [vmem:[%s4675_s16 + $0x214] sm:$0xf0] }
 0x106   : > { %v2280_v18 = vpop.f32.mrf.mxu2  ;;  %v3380_v31 = vor.u32 %v4350_v19, %v3379_v17 }
 0x107   : > { %v2329_v48 = vpop.f32.mrf.mxu3  ;;  %v2281_v49 = vadd.f32 %v2280_v18, %v4961_v26  ;;  %v4518_v26 = vld [vmem:[%s5573_s1 + $0x2d8] sm:$0xff] }
 0x108   : > { %v2381_v58 = vpop.f32.mrf.mxu0  ;;  %2709 = vmatpush.bf16.msrb.mxu3 %v4518_v26 }
 0x109   : > { %v2330_v57 = vadd.f32 %v2329_v48, %v2281_v49 }
 0x10a   : > { %v2430_v60 = vpop.f32.mrf.mxu1 }
 0x10b   : > { %v2379_v61 = vadd.f32 %v2378_v32, %v2330_v57  ;;  %2478 = vmatmul.bf16.gmra.mxu2 %v3300_v50  ;;  %2576 = vmatmul.bf16.gmra.mxu0 %v3308_v53  ;;  %v3384_v32 = vor.u32 %v4341_v21, %v3381_v22  ;;  %v3443_v50 = vld [vmem:[%s4675_s16 + $0x258] sm:$0xf]  ;;  %v4525_v53 = vld [vmem:[%s5573_s1 + $0x310] sm:$0xff]  ;;  %v3445_v57 = vld [vmem:[%s4675_s16 + $0x2a0] sm:$0xf0] }
 0x10c   : > { %2527 = vmatmul.bf16.gmra.mxu3 %v3304_v52  ;;  %v4367_v52 = vld [vmem:[%s4675_s16 + $0x29c] sm:$0xf0]  ;;  %2759 = vmatpush.bf16.msrb.mxu0 %v4525_v53  ;;  %v4532_v53 = vld [vmem:[%s5573_s1 + $0x348] sm:$0xff] }
 0x10d   : > { %2625 = vmatmul.bf16.gmra.mxu1 %v3312_v56  ;;  %v5091_v1 = vadd.f32 %v2427_v33, %v2379_v61  ;;  %v4358_v56 = vld [vmem:[%s4675_s16 + $0x25c] sm:$0xf]  ;;  %v4359_v61 = vld [vmem:[%s4675_s16 + $0x264] sm:$0xf] }
 0x10e   : > { %v2283_v2 = vpop.f32.mrf.mxu2  ;;  %2809 = vmatpush.bf16.msrb.mxu1 %v4532_v53  ;;  %v3669_v53 = vld [vmem:[%s4675_s16 + $0x458] sm:$0xf0] }
 0x10f   : > { %v2332_v3 = vpop.f32.mrf.mxu3  ;;  %v2284_v4 = vadd.f32 %v2283_v2, %v4979_v46 }
 0x110   : > { %v2383_v54 = vpop.f32.mrf.mxu0 }
 0x111   : > { %v2333_v6 = vadd.f32 %v2332_v3, %v2284_v4  ;;  %v3444_v3 = vor.u32 %v4367_v52, %v3443_v50  ;;  %v3448_v4 = vor.u32 %v4358_v56, %v3445_v57  ;;  %v4507_v56 = vld [vmem:[%s5573_s1 + $0x280] sm:$0xff] }
 0x112   : > { %v2432_v8 = vpop.f32.mrf.mxu1  ;;  %2663 = vmatpush.bf16.msrb.mxu2 %v4507_v56 }
 0x113   : > { %v2382_v9 = vadd.f32 %v2381_v58, %v2333_v6  ;;  %v3451_v58 = vld [vmem:[%s4675_s16 + $0x260] sm:$0xf] }
 0x115   : > { %v5105_v25 = vadd.f32 %v2430_v60, %v2382_v9  ;;  %v4368_v60 = vld [vmem:[%s4675_s16 + $0x2a4] sm:$0xf0] }
 0x116   : > { %v2285_v46 = vpop.f32.mrf.mxu2  ;;  %v3452_v6 = vor.u32 %v4368_v60, %v3451_v58 }
 0x117   : > { %v2334_v62 = vpop.f32.mrf.mxu3  ;;  %v2286_v28 = vadd.f32 %v2285_v46, %v4989_v55  ;;  %v4517_v55 = vld [vmem:[%s5573_s1 + $0x2d0] sm:$0xff] }
 0x118   : > { %v2386_v34 = vpop.f32.mrf.mxu0  ;;  %2710 = vmatpush.bf16.msrb.mxu3 %v4517_v55 }
 0x119   : > { %v2335_v33 = vadd.f32 %v2334_v62, %v2286_v28 }
 0x11a   : > { %v2435_v35 = vpop.f32.mrf.mxu1 }
 0x11b   : > { %v2384_v36 = vadd.f32 %v2383_v54, %v2335_v33  ;;  %2483 = vmatmul.bf16.gmra.mxu2 %v3372_v29  ;;  %2581 = vmatmul.bf16.gmra.mxu0 %v3380_v31  ;;  %v3456_v54 = vor.u32 %v4359_v61, %v3453_v63  ;;  %v3515_v29 = vld [vmem:[%s4675_s16 + $0x2e8] sm:$0xf]  ;;  %v3517_v33 = vld [vmem:[%s4675_s16 + $0x330] sm:$0xf0] }
 0x11c   : > { %2532 = vmatmul.bf16.gmra.mxu3 %v3376_v30  ;;  %v4385_v30 = vld [vmem:[%s4675_s16 + $0x32c] sm:$0xf0]  ;;  %v4524_v31 = vld [vmem:[%s5573_s1 + $0x308] sm:$0xff] }
 0x11d   : > { %2630 = vmatmul.bf16.gmra.mxu1 %v3384_v32  ;;  %v5117_v41 = vadd.f32 %v2432_v8, %v2384_v36  ;;  %v4376_v32 = vld [vmem:[%s4675_s16 + $0x2ec] sm:$0xf]  ;;  %v4377_v36 = vld [vmem:[%s4675_s16 + $0x2f4] sm:$0xf]  ;;  %2760 = vmatpush.bf16.msrb.mxu0 %v4524_v31 }
 0x11e   : > { %v2288_v42 = vpop.f32.mrf.mxu2 }
 0x11f   : > { %v2337_v43 = vpop.f32.mrf.mxu3  ;;  %v2289_v44 = vadd.f32 %v2288_v42, %v5004_v13 }
 0x120   : > { %v2388_v18 = vpop.f32.mrf.mxu0 }
 0x121   : > { %v2338_v45 = vadd.f32 %v2337_v43, %v2289_v44  ;;  %v3516_v43 = vor.u32 %v4385_v30, %v3515_v29  ;;  %v3520_v44 = vor.u32 %v4376_v32, %v3517_v33  ;;  %v4531_v30 = vld [vmem:[%s5573_s1 + $0x340] sm:$0xff]  ;;  %v4546_v32 = vld [vmem:[%s5573_s1 + $0x3b8] sm:$0xff] }
 0x122   : > { %v2437_v48 = vpop.f32.mrf.mxu1  ;;  %2810 = vmatpush.bf16.msrb.mxu1 %v4531_v30  ;;  %2852 = vmatpush.bf16.msra.mxu2 %v4546_v32  ;;  %v4289_v30 = vld [vmem:[%s4675_s16 + $0x34] sm:$0xf] }
 0x123   : > { %v2387_v49 = vadd.f32 %v2386_v34, %v2338_v45  ;;  %v3523_v34 = vld [vmem:[%s4675_s16 + $0x2f0] sm:$0xf] }
 0x125   : > { %v5131_v0 = vadd.f32 %v2435_v35, %v2387_v49  ;;  %v4386_v35 = vld [vmem:[%s4675_s16 + $0x334] sm:$0xf0] }
 0x126   : > { %v2290_v13 = vpop.f32.mrf.mxu2  ;;  %v3524_v45 = vor.u32 %v4386_v35, %v3523_v34 }
 0x127   : > { %v2339_v26 = vpop.f32.mrf.mxu3  ;;  %v2291_v2 = vadd.f32 %v2290_v13, %v5017_v24  ;;  %v4516_v24 = vld [vmem:[%s5573_s1 + $0x2c8] sm:$0xff] }
 0x128   : > { %v2391_v9 = vpop.f32.mrf.mxu0  ;;  %2711 = vmatpush.bf16.msrb.mxu3 %v4516_v24 }
 0x129   : > { %v2340_v8 = vadd.f32 %v2339_v26, %v2291_v2 }
 0x12a   : > { %v2440_v11 = vpop.f32.mrf.mxu1 }
 0x12b   : > { %v2389_v12 = vadd.f32 %v2388_v18, %v2340_v8  ;;  %2488 = vmatmul.bf16.gmra.mxu2 %v3444_v3  ;;  %2586 = vmatmul.bf16.gmra.mxu0 %v3452_v6  ;;  %v3528_v18 = vor.u32 %v4377_v36, %v3525_v39  ;;  %v3587_v3 = vld [vmem:[%s4675_s16 + $0x378] sm:$0xf]  ;;  %v4523_v6 = vld [vmem:[%s5573_s1 + $0x300] sm:$0xff] }
 0x12c   : > { %2537 = vmatmul.bf16.gmra.mxu3 %v3448_v4  ;;  %v4403_v4 = vld [vmem:[%s4675_s16 + $0x3bc] sm:$0xf0]  ;;  %v3589_v8 = vld [vmem:[%s4675_s16 + $0x3c0] sm:$0xf0]  ;;  %2761 = vmatpush.bf16.msrb.mxu0 %v4523_v6  ;;  %v4570_v6 = vld [vmem:[%s5573_s1 + $0x478] sm:$0xff] }
 0x12d   : > { %2635 = vmatmul.bf16.gmra.mxu1 %v3456_v54  ;;  %v5143_v16 = vadd.f32 %v2437_v48, %v2389_v12  ;;  %v4394_v54 = vld [vmem:[%s4675_s16 + $0x37c] sm:$0xf]  ;;  %v4395_v12 = vld [vmem:[%s4675_s16 + $0x384] sm:$0xf] }
 0x12e   : > { %v2293_v17 = vpop.f32.mrf.mxu2  ;;  %2999 = vmatpush.bf16.msra.mxu1 %v4570_v6  ;;  %v3253_v6 = vld [vmem:[%s4675_s16 + $0x108] sm:$0xf0] }
 0x12f   : > { %v2342_v19 = vpop.f32.mrf.mxu3  ;;  %v2294_v21 = vadd.f32 %v2293_v17, %v4931_v59 }
 0x130   : > { %v2393_v46 = vpop.f32.mrf.mxu0 }
 0x131   : > { %v2343_v22 = vadd.f32 %v2342_v19, %v2294_v21  ;;  %v3588_v19 = vor.u32 %v4403_v4, %v3587_v3  ;;  %v3592_v21 = vor.u32 %v4394_v54, %v3589_v8  ;;  %v4545_v54 = vld [vmem:[%s5573_s1 + $0x3b0] sm:$0xff] }
 0x132   : > { %v2442_v62 = vpop.f32.mrf.mxu1  ;;  %2853 = vmatpush.bf16.msra.mxu2 %v4545_v54 }
 0x133   : > { %v2392_v28 = vadd.f32 %v2391_v9, %v2343_v22  ;;  %v3595_v9 = vld [vmem:[%s4675_s16 + $0x380] sm:$0xf] }
 0x135   : > { %v5157_v40 = vadd.f32 %v2440_v11, %v2392_v28  ;;  %v4404_v11 = vld [vmem:[%s4675_s16 + $0x3c4] sm:$0xf0] }
 0x136   : > { %v2295_v59 = vpop.f32.mrf.mxu2  ;;  %v3596_v22 = vor.u32 %v4404_v11, %v3595_v9 }
 0x137   : > { %v2344_v55 = vpop.f32.mrf.mxu3  ;;  %v2296_v42 = vadd.f32 %v2295_v59, %v4946_v10  ;;  %v4515_v10 = vld [vmem:[%s5573_s1 + $0x2c0] sm:$0xff] }
 0x138   : > { %v2396_v49 = vpop.f32.mrf.mxu0  ;;  %2712 = vmatpush.bf16.msrb.mxu3 %v4515_v10 }
 0x139   : > { %v2345_v48 = vadd.f32 %v2344_v55, %v2296_v42 }
 0x13a   : > { %v2445_v50 = vpop.f32.mrf.mxu1 }
 0x13b   : > { %v2394_v52 = vadd.f32 %v2393_v46, %v2345_v48  ;;  %2493 = vmatmul.bf16.gmra.mxu2 %v3516_v43  ;;  %2591 = vmatmul.bf16.gmra.mxu0 %v3524_v45  ;;  %v3600_v46 = vor.u32 %v4395_v12, %v3597_v14  ;;  %v3659_v43 = vld [vmem:[%s4675_s16 + $0x408] sm:$0xf]  ;;  %v4562_v45 = vld [vmem:[%s5573_s1 + $0x438] sm:$0xff]  ;;  %v3661_v48 = vld [vmem:[%s4675_s16 + $0x450] sm:$0xf0] }
 0x13c   : > { %2542 = vmatmul.bf16.gmra.mxu3 %v3520_v44  ;;  %v4421_v44 = vld [vmem:[%s4675_s16 + $0x44c] sm:$0xf0]  ;;  %2950 = vmatpush.bf16.msra.mxu0 %v4562_v45 }
 0x13d   : > { %2640 = vmatmul.bf16.gmra.mxu1 %v3528_v18  ;;  %v5169_v57 = vadd.f32 %v2442_v62, %v2394_v52  ;;  %v4412_v18 = vld [vmem:[%s4675_s16 + $0x40c] sm:$0xf]  ;;  %v4413_v52 = vld [vmem:[%s4675_s16 + $0x414] sm:$0xf] }
 0x13e   : > { %v2298_v58 = vpop.f32.mrf.mxu2  ;;  %v4569_v45 = vld [vmem:[%s5573_s1 + $0x470] sm:$0xff] }
 0x13f   : > { %v2347_v60 = vpop.f32.mrf.mxu3  ;;  %v2299_v61 = vadd.f32 %v2298_v58, %v4959_v23  ;;  %3000 = vmatpush.bf16.msra.mxu1 %v4569_v45  ;;  %v3325_v45 = vld [vmem:[%s4675_s16 + $0x198] sm:$0xf0] }
 0x140   : > { %v2398_v13 = vpop.f32.mrf.mxu0 }
 0x141   : > { %v2348_v63 = vadd.f32 %v2347_v60, %v2299_v61  ;;  %v3660_v60 = vor.u32 %v4421_v44, %v3659_v43  ;;  %v3664_v61 = vor.u32 %v4412_v18, %v3661_v48  ;;  %v4544_v18 = vld [vmem:[%s5573_s1 + $0x3a8] sm:$0xff] }
 0x142   : > { %v2447_v26 = vpop.f32.mrf.mxu1  ;;  %2854 = vmatpush.bf16.msra.mxu2 %v4544_v18 }
 0x143   : > { %v2397_v2 = vadd.f32 %v2396_v49, %v2348_v63  ;;  %v3667_v49 = vld [vmem:[%s4675_s16 + $0x410] sm:$0xf] }
 0x145   : > { %v5183_v15 = vadd.f32 %v2445_v50, %v2397_v2  ;;  %v4422_v50 = vld [vmem:[%s4675_s16 + $0x454] sm:$0xf0] }
 0x146   : > { %v2300_v23 = vpop.f32.mrf.mxu2  ;;  %v3668_v63 = vor.u32 %v4422_v50, %v3667_v49 }
 0x147   : > { %v2349_v24 = vpop.f32.mrf.mxu3  ;;  %v2301_v17 = vadd.f32 %v2300_v23, %v4974_v38  ;;  %v4554_v38 = vld [vmem:[%s5573_s1 + $0x3f8] sm:$0xff] }
 0x148   : > { %v2401_v28 = vpop.f32.mrf.mxu0  ;;  %2901 = vmatpush.bf16.msra.mxu3 %v4554_v38 }
 0x149   : > { %v2350_v62 = vadd.f32 %v2349_v24, %v2301_v17 }
 0x14a   : > { %v2450_v29 = vpop.f32.mrf.mxu1 }
 0x14b   : > { %v2399_v31 = vadd.f32 %v2398_v13, %v2350_v62  ;;  %2498 = vmatmul.bf16.gmra.mxu2 %v3588_v19  ;;  %2596 = vmatmul.bf16.gmra.mxu0 %v3596_v22  ;;  %v3672_v13 = vor.u32 %v4413_v52, %v3669_v53  ;;  %v3171_v19 = vld [vmem:[%s4675_s16 + $0x28] sm:$0xf]  ;;  %v4561_v22 = vld [vmem:[%s5573_s1 + $0x430] sm:$0xff] }
 0x14c   : > { %2547 = vmatmul.bf16.gmra.mxu3 %v3592_v21  ;;  %v4297_v21 = vld [vmem:[%s4675_s16 + $0x6c] sm:$0xf0]  ;;  %v3173_v62 = vld [vmem:[%s4675_s16 + $0x70] sm:$0xf0]  ;;  %2951 = vmatpush.bf16.msra.mxu0 %v4561_v22  ;;  %v4568_v22 = vld [vmem:[%s5573_s1 + $0x468] sm:$0xff] }
 0x14d   : > { %2645 = vmatmul.bf16.gmra.mxu1 %v3600_v46  ;;  %v5195_v33 = vadd.f32 %v2447_v26, %v2399_v31  ;;  %v4288_v46 = vld [vmem:[%s4675_s16 + $0x2c] sm:$0xf]  ;;  %v3181_v31 = vld [vmem:[%s4675_s16 + $0x78] sm:$0xf0] }
 0x14e   : > { %v2303_v34 = vpop.f32.mrf.mxu2  ;;  %3001 = vmatpush.bf16.msra.mxu1 %v4568_v22  ;;  %v3397_v22 = vld [vmem:[%s4675_s16 + $0x228] sm:$0xf0] }
 0x14f   : > { %v2352_v35 = vpop.f32.mrf.mxu3  ;;  %v2304_v36 = vadd.f32 %v2303_v34, %v4987_v51 }
 0x150   : > { %v2403_v59 = vpop.f32.mrf.mxu0 }
 0x151   : > { %v2353_v39 = vadd.f32 %v2352_v35, %v2304_v36  ;;  %v3172_v35 = vor.u32 %v4297_v21, %v3171_v19  ;;  %v3176_v36 = vor.u32 %v4288_v46, %v3173_v62  ;;  %v4543_v46 = vld [vmem:[%s5573_s1 + $0x3a0] sm:$0xff] }
 0x152   : > { %v2452_v55 = vpop.f32.mrf.mxu1  ;;  %2855 = vmatpush.bf16.msra.mxu2 %v4543_v46 }
 0x153   : > { %v2402_v42 = vadd.f32 %v2401_v28, %v2353_v39  ;;  %v3179_v28 = vld [vmem:[%s4675_s16 + $0x30] sm:$0xf] }
 0x155   : > { %v5209_v56 = vadd.f32 %v2450_v29, %v2402_v42  ;;  %v4298_v29 = vld [vmem:[%s4675_s16 + $0x74] sm:$0xf0] }
 0x156   : > { %v2305_v51 = vpop.f32.mrf.mxu2  ;;  %v3180_v39 = vor.u32 %v4298_v29, %v3179_v28 }
 0x157   : > { %v2354_v10 = vpop.f32.mrf.mxu3  ;;  %v2306_v58 = vadd.f32 %v2305_v51, %v5002_v5  ;;  %v4553_v5 = vld [vmem:[%s5573_s1 + $0x3f0] sm:$0xff] }
 0x158   : > { %v2406_v2 = vpop.f32.mrf.mxu0  ;;  %2902 = vmatpush.bf16.msra.mxu3 %v4553_v5 }
 0x159   : > { %v2355_v26 = vadd.f32 %v2354_v10, %v2306_v58 }
 0x15a   : > { %v2455_v3 = vpop.f32.mrf.mxu1 }
 0x15b   : > { %v2404_v4 = vadd.f32 %v2403_v59, %v2355_v26  ;;  %2503 = vmatmul.bf16.gmra.mxu2 %v3660_v60  ;;  %2601 = vmatmul.bf16.gmra.mxu0 %v3668_v63  ;;  %v3184_v59 = vor.u32 %v4289_v30, %v3181_v31  ;;  %v3243_v60 = vld [vmem:[%s4675_s16 + $0xb8] sm:$0xf]  ;;  %v4560_v63 = vld [vmem:[%s5573_s1 + $0x428] sm:$0xff]  ;;  %v3245_v26 = vld [vmem:[%s4675_s16 + $0x100] sm:$0xf0] }
 0x15c   : > { %2552 = vmatmul.bf16.gmra.mxu3 %v3664_v61  ;;  %v4315_v61 = vld [vmem:[%s4675_s16 + $0xfc] sm:$0xf0]  ;;  %2952 = vmatpush.bf16.msra.mxu0 %v4560_v63 }
 0x15d   : > { %2650 = vmatmul.bf16.gmra.mxu1 %v3672_v13  ;;  %v5221_v8 = vadd.f32 %v2452_v55, %v2404_v4  ;;  %v4306_v13 = vld [vmem:[%s4675_s16 + $0xbc] sm:$0xf]  ;;  %v4307_v4 = vld [vmem:[%s4675_s16 + $0xc4] sm:$0xf] }
 0x15e   : > { %v2308_v9 = vpop.f32.mrf.mxu2  ;;  %v4567_v63 = vld [vmem:[%s5573_s1 + $0x460] sm:$0xff] }
 0x15f   : > { %v2357_v11 = vpop.f32.mrf.mxu3  ;;  %v2309_v12 = vadd.f32 %v2308_v9, %v5015_v20  ;;  %3002 = vmatpush.bf16.msra.mxu1 %v4567_v63  ;;  %v3469_v63 = vld [vmem:[%s4675_s16 + $0x2b8] sm:$0xf0] }
 0x160   : > { %v2408_v23 = vpop.f32.mrf.mxu0 }
 0x161   : > { %v2358_v14 = vadd.f32 %v2357_v11, %v2309_v12  ;;  %v3244_v11 = vor.u32 %v4315_v61, %v3243_v60  ;;  %v3248_v12 = vor.u32 %v4306_v13, %v3245_v26  ;;  %v4542_v13 = vld [vmem:[%s5573_s1 + $0x398] sm:$0xff] }
 0x162   : > { %v2457_v24 = vpop.f32.mrf.mxu1  ;;  %2856 = vmatpush.bf16.msra.mxu2 %v4542_v13 }
 0x163   : > { %v2407_v17 = vadd.f32 %v2406_v2, %v2358_v14  ;;  %v3251_v2 = vld [vmem:[%s4675_s16 + $0xc0] sm:$0xf] }
 0x165   : > { %v5235_v32 = vadd.f32 %v2455_v3, %v2407_v17  ;;  %v4316_v3 = vld [vmem:[%s4675_s16 + $0x104] sm:$0xf0] }
 0x166   : > { %v2310_v20 = vpop.f32.mrf.mxu2  ;;  %v3252_v14 = vor.u32 %v4316_v3, %v3251_v2 }
 0x167   : > { %v2359_v38 = vpop.f32.mrf.mxu3  ;;  %v2311_v34 = vadd.f32 %v2310_v20, %v5030_v37  ;;  %v4552_v37 = vld [vmem:[%s5573_s1 + $0x3e8] sm:$0xff] }
 0x168   : > { %v2567_v42 = vpop.f32.mrf.mxu0  ;;  %2903 = vmatpush.bf16.msra.mxu3 %v4552_v37 }
 0x169   : > { %v2360_v55 = vadd.f32 %v2359_v38, %v2311_v34 }
 0x16a   : > { %v2616_v43 = vpop.f32.mrf.mxu1 }
 0x16b   : > { %v2409_v44 = vadd.f32 %v2408_v23, %v2360_v55  ;;  %2664 = vmatmul.bf16.vlgmr.msrb.gmra.mxu2 %v3172_v35  ;;  %2762 = vmatmul.bf16.vlgmr.msrb.gmra.mxu0 %v3180_v39  ;;  %v3256_v23 = vor.u32 %v4307_v4, %v3253_v6  ;;  %v3315_v35 = vld [vmem:[%s4675_s16 + $0x148] sm:$0xf]  ;;  %v4559_v39 = vld [vmem:[%s5573_s1 + $0x420] sm:$0xff]  ;;  %v3317_v55 = vld [vmem:[%s4675_s16 + $0x190] sm:$0xf0] }
 0x16c   : > { %2713 = vmatmul.bf16.vlgmr.msrb.gmra.mxu3 %v3176_v36  ;;  %v4333_v36 = vld [vmem:[%s4675_s16 + $0x18c] sm:$0xf0]  ;;  %2953 = vmatpush.bf16.msra.mxu0 %v4559_v39  ;;  %v4566_v39 = vld [vmem:[%s5573_s1 + $0x458] sm:$0xff] }
 0x16d   : > { %2811 = vmatmul.bf16.vlgmr.msrb.gmra.mxu1 %v3184_v59  ;;  %v5247_v48 = vadd.f32 %v2457_v24, %v2409_v44  ;;  %v4324_v59 = vld [vmem:[%s4675_s16 + $0x14c] sm:$0xf]  ;;  %v4325_v44 = vld [vmem:[%s4675_s16 + $0x154] sm:$0xf] }
 0x16e   : > { %v2469_v49 = vpop.f32.mrf.mxu2  ;;  %3003 = vmatpush.bf16.msra.mxu1 %v4566_v39  ;;  %v3541_v39 = vld [vmem:[%s4675_s16 + $0x348] sm:$0xf0] }
 0x16f   : > { %v2518_v50 = vpop.f32.mrf.mxu3  ;;  %v2470_v52 = vadd.f32 %v2469_v49, %v5053_v7 }
 0x170   : > { %v2569_v51 = vpop.f32.mrf.mxu0 }
 0x171   : > { %v2519_v53 = vadd.f32 %v2518_v50, %v2470_v52  ;;  %v3316_v50 = vor.u32 %v4333_v36, %v3315_v35  ;;  %v3320_v52 = vor.u32 %v4324_v59, %v3317_v55  ;;  %v4541_v59 = vld [vmem:[%s5573_s1 + $0x390] sm:$0xff] }
 0x172   : > { %v2618_v10 = vpop.f32.mrf.mxu1  ;;  %2857 = vmatpush.bf16.msra.mxu2 %v4541_v59 }
 0x173   : > { %v2568_v58 = vadd.f32 %v2567_v42, %v2519_v53  ;;  %v3323_v42 = vld [vmem:[%s4675_s16 + $0x150] sm:$0xf] }
 0x175   : > { %v5261_v54 = vadd.f32 %v2616_v43, %v2568_v58  ;;  %v4334_v43 = vld [vmem:[%s4675_s16 + $0x194] sm:$0xf0] }
 0x176   : > { %v2471_v7 = vpop.f32.mrf.mxu2  ;;  %v3324_v53 = vor.u32 %v4334_v43, %v3323_v42 }
 0x177   : > { %v2520_v5 = vpop.f32.mrf.mxu3  ;;  %v2472_v9 = vadd.f32 %v2471_v7, %v5065_v27  ;;  %v4551_v27 = vld [vmem:[%s5573_s1 + $0x3e0] sm:$0xff] }
 0x178   : > { %v2572_v17 = vpop.f32.mrf.mxu0  ;;  %2904 = vmatpush.bf16.msra.mxu3 %v4551_v27 }
 0x179   : > { %v2521_v24 = vadd.f32 %v2520_v5, %v2472_v9 }
 0x17a   : > { %v2621_v19 = vpop.f32.mrf.mxu1 }
 0x17b   : > { %v2570_v21 = vadd.f32 %v2569_v51, %v2521_v24  ;;  %2669 = vmatmul.bf16.gmra.mxu2 %v3244_v11  ;;  %2767 = vmatmul.bf16.gmra.mxu0 %v3252_v14  ;;  %v3328_v51 = vor.u32 %v4325_v44, %v3325_v45  ;;  %v3387_v11 = vld [vmem:[%s4675_s16 + $0x1d8] sm:$0xf]  ;;  %v3389_v24 = vld [vmem:[%s4675_s16 + $0x220] sm:$0xf0] }
 0x17c   : > { %2718 = vmatmul.bf16.gmra.mxu3 %v3248_v12  ;;  %v4351_v12 = vld [vmem:[%s4675_s16 + $0x21c] sm:$0xf0]  ;;  %v4558_v14 = vld [vmem:[%s5573_s1 + $0x418] sm:$0xff] }
 0x17d   : > { %2816 = vmatmul.bf16.gmra.mxu1 %v3256_v23  ;;  %v5273_v62 = vadd.f32 %v2618_v10, %v2570_v21  ;;  %v4342_v23 = vld [vmem:[%s4675_s16 + $0x1dc] sm:$0xf]  ;;  %v4343_v21 = vld [vmem:[%s4675_s16 + $0x1e4] sm:$0xf]  ;;  %2954 = vmatpush.bf16.msra.mxu0 %v4558_v14  ;;  %v4565_v14 = vld [vmem:[%s5573_s1 + $0x450] sm:$0xff] }
 0x17e   : > { %v2474_v28 = vpop.f32.mrf.mxu2  ;;  %3004 = vmatpush.bf16.msra.mxu1 %v4565_v14  ;;  %v3613_v14 = vld [vmem:[%s4675_s16 + $0x3d8] sm:$0xf0] }
 0x17f   : > { %v2523_v29 = vpop.f32.mrf.mxu3  ;;  %v2475_v30 = vadd.f32 %v2474_v28, %v5079_v47 }
 0x180   : > { %v2574_v20 = vpop.f32.mrf.mxu0 }
 0x181   : > { %v2524_v31 = vadd.f32 %v2523_v29, %v2475_v30  ;;  %v3388_v29 = vor.u32 %v4351_v12, %v3387_v11  ;;  %v3392_v30 = vor.u32 %v4342_v23, %v3389_v24  ;;  %v4540_v23 = vld [vmem:[%s5573_s1 + $0x388] sm:$0xff] }
 0x182   : > { %v2623_v38 = vpop.f32.mrf.mxu1  ;;  %2858 = vmatpush.bf16.msra.mxu2 %v4540_v23 }
 0x183   : > { %v2573_v34 = vadd.f32 %v2572_v17, %v2524_v31  ;;  %v3395_v17 = vld [vmem:[%s4675_s16 + $0x1e0] sm:$0xf] }
 0x185   : > { %v5287_v18 = vadd.f32 %v2621_v19, %v2573_v34  ;;  %v4352_v19 = vld [vmem:[%s4675_s16 + $0x224] sm:$0xf0] }
 0x186   : > { %v2476_v47 = vpop.f32.mrf.mxu2  ;;  %v3396_v31 = vor.u32 %v4352_v19, %v3395_v17 }
 0x187   : > { %v2525_v37 = vpop.f32.mrf.mxu3  ;;  %v2477_v49 = vadd.f32 %v2476_v47, %v5091_v1  ;;  %v4550_v1 = vld [vmem:[%s5573_s1 + $0x3d8] sm:$0xff] }
 0x188   : > { %v2577_v58 = vpop.f32.mrf.mxu0  ;;  %2905 = vmatpush.bf16.msra.mxu3 %v4550_v1 }
 0x189   : > { %v2526_v10 = vadd.f32 %v2525_v37, %v2477_v49 }
 0x18a   : > { %v2626_v60 = vpop.f32.mrf.mxu1 }
 0x18b   : > { %v2575_v61 = vadd.f32 %v2574_v20, %v2526_v10  ;;  %2674 = vmatmul.bf16.gmra.mxu2 %v3316_v50  ;;  %2772 = vmatmul.bf16.gmra.mxu0 %v3324_v53  ;;  %v3400_v20 = vor.u32 %v4343_v21, %v3397_v22  ;;  %v3459_v50 = vld [vmem:[%s4675_s16 + $0x268] sm:$0xf]  ;;  %v4557_v53 = vld [vmem:[%s5573_s1 + $0x410] sm:$0xff] }
 0x18c   : > { %2723 = vmatmul.bf16.gmra.mxu3 %v3320_v52  ;;  %v4369_v52 = vld [vmem:[%s4675_s16 + $0x2ac] sm:$0xf0]  ;;  %v3461_v10 = vld [vmem:[%s4675_s16 + $0x2b0] sm:$0xf0]  ;;  %2955 = vmatpush.bf16.msra.mxu0 %v4557_v53  ;;  %v4564_v53 = vld [vmem:[%s5573_s1 + $0x448] sm:$0xff] }
 0x18d   : > { %2821 = vmatmul.bf16.gmra.mxu1 %v3328_v51  ;;  %v5299_v26 = vadd.f32 %v2623_v38, %v2575_v61  ;;  %v4360_v51 = vld [vmem:[%s4675_s16 + $0x26c] sm:$0xf]  ;;  %v4361_v61 = vld [vmem:[%s4675_s16 + $0x274] sm:$0xf] }
 0x18e   : > { %v2479_v2 = vpop.f32.mrf.mxu2  ;;  %3005 = vmatpush.bf16.msra.mxu1 %v4564_v53 }
 0x18f   : > { %v2528_v3 = vpop.f32.mrf.mxu3  ;;  %v2480_v4 = vadd.f32 %v2479_v2, %v5105_v25 }
 0x190   : > { %v2579_v7 = vpop.f32.mrf.mxu0 }
 0x191   : > { %v2529_v6 = vadd.f32 %v2528_v3, %v2480_v4  ;;  %v3460_v3 = vor.u32 %v4369_v52, %v3459_v50  ;;  %v3464_v4 = vor.u32 %v4360_v51, %v3461_v10  ;;  %v4539_v51 = vld [vmem:[%s5573_s1 + $0x380] sm:$0xff] }
 0x192   : > { %v2628_v5 = vpop.f32.mrf.mxu1  ;;  %2859 = vmatpush.bf16.msra.mxu2 %v4539_v51 }
 0x193   : > { %v2578_v9 = vadd.f32 %v2577_v58, %v2529_v6  ;;  %v3467_v58 = vld [vmem:[%s4675_s16 + $0x270] sm:$0xf] }
 0x195   : > { %v5313_v46 = vadd.f32 %v2626_v60, %v2578_v9  ;;  %v4370_v60 = vld [vmem:[%s4675_s16 + $0x2b4] sm:$0xf0] }
 0x196   : > { %v2481_v25 = vpop.f32.mrf.mxu2  ;;  %v3468_v6 = vor.u32 %v4370_v60, %v3467_v58 }
 0x197   : > { %v2530_v27 = vpop.f32.mrf.mxu3  ;;  %v2482_v28 = vadd.f32 %v2481_v25, %v5117_v41  ;;  %v4549_v41 = vld [vmem:[%s5573_s1 + $0x3d0] sm:$0xff] }
 0x198   : > { %v2582_v34 = vpop.f32.mrf.mxu0  ;;  %2906 = vmatpush.bf16.msra.mxu3 %v4549_v41 }
 0x199   : > { %v2531_v38 = vadd.f32 %v2530_v27, %v2482_v28 }
 0x19a   : > { %v2631_v35 = vpop.f32.mrf.mxu1 }
 0x19b   : > { %v2580_v36 = vadd.f32 %v2579_v7, %v2531_v38  ;;  %2679 = vmatmul.bf16.gmra.mxu2 %v3388_v29  ;;  %2777 = vmatmul.bf16.gmra.mxu0 %v3396_v31  ;;  %v3472_v7 = vor.u32 %v4361_v61, %v3469_v63  ;;  %v3531_v29 = vld [vmem:[%s4675_s16 + $0x2f8] sm:$0xf]  ;;  %v4556_v31 = vld [vmem:[%s5573_s1 + $0x408] sm:$0xff]  ;;  %v3533_v38 = vld [vmem:[%s4675_s16 + $0x340] sm:$0xf0] }
 0x19c   : > { %2728 = vmatmul.bf16.gmra.mxu3 %v3392_v30  ;;  %v4387_v30 = vld [vmem:[%s4675_s16 + $0x33c] sm:$0xf0]  ;;  %2956 = vmatpush.bf16.msra.mxu0 %v4556_v31 }
 0x19d   : > { %2826 = vmatmul.bf16.gmra.mxu1 %v3400_v20  ;;  %v5325_v55 = vadd.f32 %v2628_v5, %v2580_v36  ;;  %v4378_v20 = vld [vmem:[%s4675_s16 + $0x2fc] sm:$0xf]  ;;  %v4379_v36 = vld [vmem:[%s4675_s16 + $0x304] sm:$0xf] }
 0x19e   : > { %v2484_v42 = vpop.f32.mrf.mxu2 }
 0x19f   : > { %v2533_v43 = vpop.f32.mrf.mxu3  ;;  %v2485_v44 = vadd.f32 %v2484_v42, %v5131_v0 }
 0x1a0   : > { %v2584_v47 = vpop.f32.mrf.mxu0 }
 0x1a1   : > { %v2534_v45 = vadd.f32 %v2533_v43, %v2485_v44  ;;  %v3532_v43 = vor.u32 %v4387_v30, %v3531_v29  ;;  %v3536_v44 = vor.u32 %v4378_v20, %v3533_v38  ;;  %v4563_v30 = vld [vmem:[%s5573_s1 + $0x440] sm:$0xff] }
 0x1a2   : > { %v2633_v37 = vpop.f32.mrf.mxu1  ;;  %3006 = vmatpush.bf16.msra.mxu1 %v4563_v30 }
 0x1a3   : > { %v2583_v49 = vadd.f32 %v2582_v34, %v2534_v45  ;;  %v3539_v34 = vld [vmem:[%s4675_s16 + $0x300] sm:$0xf] }
 0x1a5   : > { %v5339_v13 = vadd.f32 %v2631_v35, %v2583_v49  ;;  %v4388_v35 = vld [vmem:[%s4675_s16 + $0x344] sm:$0xf0] }
 0x1a6   : > { %v2486_v0 = vpop.f32.mrf.mxu2  ;;  %v3540_v45 = vor.u32 %v4388_v35, %v3539_v34 }
 0x1a7   : > { %v2535_v1 = vpop.f32.mrf.mxu3  ;;  %v2487_v2 = vadd.f32 %v2486_v0, %v5143_v16  ;;  %v4548_v16 = vld [vmem:[%s5573_s1 + $0x3c8] sm:$0xff] }
 0x1a8   : > { %v2587_v9 = vpop.f32.mrf.mxu0  ;;  %2907 = vmatpush.bf16.msra.mxu3 %v4548_v16 }
 0x1a9   : > { %v2536_v5 = vadd.f32 %v2535_v1, %v2487_v2 }
 0x1aa   : > { %v2636_v11 = vpop.f32.mrf.mxu1 }
 0x1ab   : > { %v2585_v12 = vadd.f32 %v2584_v47, %v2536_v5  ;;  %2684 = vmatmul.bf16.gmra.mxu2 %v3460_v3  ;;  %2782 = vmatmul.bf16.gmra.mxu0 %v3468_v6  ;;  %v3544_v47 = vor.u32 %v4379_v36, %v3541_v39  ;;  %v3603_v3 = vld [vmem:[%s4675_s16 + $0x388] sm:$0xf]  ;;  %v4555_v6 = vld [vmem:[%s5573_s1 + $0x400] sm:$0xff]  ;;  %v3605_v5 = vld [vmem:[%s4675_s16 + $0x3d0] sm:$0xf0] }
 0x1ac   : > { %2733 = vmatmul.bf16.gmra.mxu3 %v3464_v4  ;;  %v4405_v4 = vld [vmem:[%s4675_s16 + $0x3cc] sm:$0xf0]  ;;  %2957 = vmatpush.bf16.msra.mxu0 %v4555_v6 }
 0x1ad   : > { %2831 = vmatmul.bf16.gmra.mxu1 %v3472_v7  ;;  %v5351_v24 = vadd.f32 %v2633_v37, %v2585_v12  ;;  %v4396_v7 = vld [vmem:[%s4675_s16 + $0x38c] sm:$0xf]  ;;  %v4397_v12 = vld [vmem:[%s4675_s16 + $0x394] sm:$0xf] }
 0x1ae   : > { %v2489_v17 = vpop.f32.mrf.mxu2 }
 0x1af   : > { %v2538_v19 = vpop.f32.mrf.mxu3  ;;  %v2490_v21 = vadd.f32 %v2489_v17, %v5157_v40 }
 0x1b0   : > { %v2589_v25 = vpop.f32.mrf.mxu0 }
 0x1b1   : > { %v2539_v22 = vadd.f32 %v2538_v19, %v2490_v21  ;;  %v3604_v19 = vor.u32 %v4405_v4, %v3603_v3  ;;  %v3608_v21 = vor.u32 %v4396_v7, %v3605_v5 }
 0x1b2   : > { %v2638_v27 = vpop.f32.mrf.mxu1 }
 0x1b3   : > { %v2588_v28 = vadd.f32 %v2587_v9, %v2539_v22  ;;  %v3611_v9 = vld [vmem:[%s4675_s16 + $0x390] sm:$0xf] }
 0x1b5   : > { %v5365_v59 = vadd.f32 %v2636_v11, %v2588_v28  ;;  %v4406_v11 = vld [vmem:[%s4675_s16 + $0x3d4] sm:$0xf0] }
 0x1b6   : > { %v2491_v40 = vpop.f32.mrf.mxu2  ;;  %v3612_v22 = vor.u32 %v4406_v11, %v3611_v9  ;;  %v3187_v11 = vld [vmem:[%s4675_s16 + $0x38] sm:$0xf] }
 0x1b7   : > { %v2540_v41 = vpop.f32.mrf.mxu3  ;;  %v2492_v42 = vadd.f32 %v2491_v40, %v5169_v57  ;;  %v4547_v57 = vld [vmem:[%s5573_s1 + $0x3c0] sm:$0xff] }
 0x1b8   : > { %v2592_v49 = vpop.f32.mrf.mxu0  ;;  %2908 = vmatpush.bf16.msra.mxu3 %v4547_v57 }
 0x1b9   : > { %v2541_v37 = vadd.f32 %v2540_v41, %v2492_v42  ;;  %v3675_v41 = vld [vmem:[%s4675_s16 + $0x418] sm:$0xf]  ;;  %v4423_v42 = vld [vmem:[%s4675_s16 + $0x45c] sm:$0xf0] }
 0x1ba   : > { %v2641_v50 = vpop.f32.mrf.mxu1  ;;  %v3676_v57 = vor.u32 %v4423_v42, %v3675_v41 }
 0x1bb   : > { %v2590_v52 = vadd.f32 %v2589_v25, %v2541_v37  ;;  %2689 = vmatmul.bf16.gmra.mxu2 %v3532_v43  ;;  %2787 = vmatmul.bf16.gmra.mxu0 %v3540_v45  ;;  %v3616_v25 = vor.u32 %v4397_v12, %v3613_v14  ;;  %v4414_v43 = vld [vmem:[%s4675_s16 + $0x41c] sm:$0xf]  ;;  %v3683_v45 = vld [vmem:[%s4675_s16 + $0x420] sm:$0xf]  ;;  %v4415_v37 = vld [vmem:[%s4675_s16 + $0x424] sm:$0xf] }
 0x1bc   : > { %2738 = vmatmul.bf16.gmra.mxu3 %v3536_v44  ;;  %v3677_v44 = vld [vmem:[%s4675_s16 + $0x460] sm:$0xf0]  ;;  %v4299_v12 = vld [vmem:[%s4675_s16 + $0x7c] sm:$0xf0]  ;;  %v4290_v14 = vld [vmem:[%s4675_s16 + $0x3c] sm:$0xf] }
 0x1bd   : > { %2836 = vmatmul.bf16.gmra.mxu1 %v3544_v47  ;;  %v5377_v10 = vadd.f32 %v2638_v27, %v2590_v52  ;;  %v4424_v47 = vld [vmem:[%s4675_s16 + $0x464] sm:$0xf0] }
 0x1be   : > { %v2494_v58 = vpop.f32.mrf.mxu2 }
 0x1bf   : > { %v2543_v60 = vpop.f32.mrf.mxu3  ;;  %v2495_v61 = vadd.f32 %v2494_v58, %v5183_v15  ;;  %v3684_v58 = vor.u32 %v4424_v47, %v3683_v45  ;;  %v3259_v45 = vld [vmem:[%s4675_s16 + $0xc8] sm:$0xf]  ;;  %v4317_v47 = vld [vmem:[%s4675_s16 + $0x10c] sm:$0xf0] }
 0x1c0   : > { %v2594_v0 = vpop.f32.mrf.mxu0 }
 0x1c1   : > { %v2544_v63 = vadd.f32 %v2543_v60, %v2495_v61 }
 0x1c2   : > { %v2643_v1 = vpop.f32.mrf.mxu1 }
 0x1c3   : > { %v2593_v2 = vadd.f32 %v2592_v49, %v2544_v63  ;;  %v3685_v49 = vld [vmem:[%s4675_s16 + $0x468] sm:$0xf0] }
 0x1c4   : > { %v3688_v60 = vor.u32 %v4415_v37, %v3685_v49  ;;  %v4308_v37 = vld [vmem:[%s4675_s16 + $0xcc] sm:$0xf]  ;;  %v3261_v49 = vld [vmem:[%s4675_s16 + $0x110] sm:$0xf0] }
 0x1c5   : > { %v5391_v23 = vadd.f32 %v2641_v50, %v2593_v2 }
 0x1c6   : > { %v2496_v15 = vpop.f32.mrf.mxu2 }
 0x1c7   : > { %v2545_v16 = vpop.f32.mrf.mxu3  ;;  %v2497_v17 = vadd.f32 %v2496_v15, %v5195_v33  ;;  %v3189_v15 = vld [vmem:[%s4675_s16 + $0x80] sm:$0xf0] }
 0x1c8   : > { %v2597_v28 = vpop.f32.mrf.mxu0 }
 0x1c9   : > { %v2546_v27 = vadd.f32 %v2545_v16, %v2497_v17  ;;  %v3195_v16 = vld [vmem:[%s4675_s16 + $0x40] sm:$0xf]  ;;  %v4300_v17 = vld [vmem:[%s4675_s16 + $0x84] sm:$0xf0] }
 0x1ca   : > { %v2646_v29 = vpop.f32.mrf.mxu1  ;;  %v3196_v30 = vor.u32 %v4300_v17, %v3195_v16  ;;  %v3331_v16 = vld [vmem:[%s4675_s16 + $0x158] sm:$0xf]  ;;  %v4335_v17 = vld [vmem:[%s4675_s16 + $0x19c] sm:$0xf0] }
 0x1cb   : > { %v2595_v31 = vadd.f32 %v2594_v0, %v2546_v27  ;;  %2694 = vmatmul.bf16.gmra.mxu2 %v3604_v19  ;;  %2792 = vmatmul.bf16.gmra.mxu0 %v3612_v22  ;;  %v4291_v19 = vld [vmem:[%s4675_s16 + $0x44] sm:$0xf] }
 0x1cc   : > { %2743 = vmatmul.bf16.gmra.mxu3 %v3608_v21  ;;  %v3197_v21 = vld [vmem:[%s4675_s16 + $0x88] sm:$0xf0] }
 0x1cd   : > { %2841 = vmatmul.bf16.gmra.mxu1 %v3616_v25  ;;  %v5397_v33 = vadd.f32 %v2643_v1, %v2595_v31  ;;  %v3200_v31 = vor.u32 %v4291_v19, %v3197_v21  ;;  %v4326_v19 = vld [vmem:[%s4675_s16 + $0x15c] sm:$0xf]  ;;  %v3333_v21 = vld [vmem:[%s4675_s16 + $0x1a0] sm:$0xf0] }
 0x1ce   : > { %v2499_v20 = vpop.f32.mrf.mxu2 }
 0x1cf   : > { %v2548_v38 = vpop.f32.mrf.mxu3  ;;  %v2500_v34 = vadd.f32 %v2499_v20, %v5209_v56  ;;  %v3680_v56 = vor.u32 %v4414_v43, %v3677_v44 }
 0x1d0   : > { %v2599_v36 = vpop.f32.mrf.mxu0 }
 0x1d1   : > { %v2549_v35 = vadd.f32 %v2548_v38, %v2500_v34 }
 0x1d2   : > { %v2648_v39 = vpop.f32.mrf.mxu1 }
 0x1d3   : > { %v2598_v40 = vadd.f32 %v2597_v28, %v2549_v35 }
 0x1d5   : > { %v5408_v50 = vadd.f32 %v2646_v29, %v2598_v40  ;;  %v3188_v29 = vor.u32 %v4299_v12, %v3187_v11 }
 0x1d6   : > { %v2501_v52 = vpop.f32.mrf.mxu2 }
 0x1d7   : > { %v2550_v53 = vpop.f32.mrf.mxu3  ;;  %v2502_v51 = vadd.f32 %v2501_v52, %v5221_v8  ;;  %v3267_v52 = vld [vmem:[%s4675_s16 + $0xd0] sm:$0xf] }
 0x1d8   : > { %v2602_v63 = vpop.f32.mrf.mxu0 }
 0x1d9   : > { %v2551_v61 = vadd.f32 %v2550_v53, %v2502_v51  ;;  %v4318_v53 = vld [vmem:[%s4675_s16 + $0x114] sm:$0xf0]  ;;  %v4309_v51 = vld [vmem:[%s4675_s16 + $0xd4] sm:$0xf] }
 0x1da   : > { %v2651_v0 = vpop.f32.mrf.mxu1 }
 0x1db   : > { %v2600_v1 = vadd.f32 %v2599_v36, %v2551_v61  ;;  %2699 = vmatmul.bf16.gmra.mxu2 %v3676_v57  ;;  %2797 = vmatmul.bf16.gmra.mxu0 %v3684_v58  ;;  %v3269_v57 = vld [vmem:[%s4675_s16 + $0x118] sm:$0xf0] }
 0x1dc   : > { %2748 = vmatmul.bf16.gmra.mxu3 %v3680_v56 }
 0x1dd   : > { %2846 = vmatmul.bf16.gmra.mxu1 %v3688_v60  ;;  %v5411_v8 = vadd.f32 %v2648_v39, %v2600_v1  ;;  %v3272_v1 = vor.u32 %v4309_v51, %v3269_v57  ;;  %v4344_v51 = vld [vmem:[%s4675_s16 + $0x1ec] sm:$0xf]  ;;  %v3405_v57 = vld [vmem:[%s4675_s16 + $0x230] sm:$0xf0] }
 0x1de   : > { %v2504_v2 = vpop.f32.mrf.mxu2 }
 0x1df   : > { %v2553_v3 = vpop.f32.mrf.mxu3  ;;  %v2505_v4 = vadd.f32 %v2504_v2, %v5235_v32  ;;  %v3192_v32 = vor.u32 %v4290_v14, %v3189_v15 }
 0x1e0   : > { %v2604_v7 = vpop.f32.mrf.mxu0 }
 0x1e1   : > { %v2554_v6 = vadd.f32 %v2553_v3, %v2505_v4 }
 0x1e2   : > { %v2653_v5 = vpop.f32.mrf.mxu1 }
 0x1e3   : > { %v2603_v9 = vadd.f32 %v2602_v63, %v2554_v6  ;;  %v3260_v63 = vor.u32 %v4317_v47, %v3259_v45 }
 0x1e5   : > { %v5422_v22 = vadd.f32 %v2651_v0, %v2603_v9  ;;  %v3268_v0 = vor.u32 %v4318_v53, %v3267_v52  ;;  %v3403_v52 = vld [vmem:[%s4675_s16 + $0x1e8] sm:$0xf]  ;;  %v4353_v53 = vld [vmem:[%s4675_s16 + $0x22c] sm:$0xf0] }
 0x1e6   : > { %v2506_v25 = vpop.f32.mrf.mxu2 }
 0x1e7   : > { %v2555_v27 = vpop.f32.mrf.mxu3  ;;  %v2507_v28 = vadd.f32 %v2506_v25, %v5247_v48  ;;  %v3339_v25 = vld [vmem:[%s4675_s16 + $0x160] sm:$0xf] }
 0x1e8   : > { %v2763_v38 = vpop.f32.mrf.mxu0 }
 0x1e9   : > { %v2556_v20 = vadd.f32 %v2555_v27, %v2507_v28  ;;  %v4336_v27 = vld [vmem:[%s4675_s16 + $0x1a4] sm:$0xf0]  ;;  %v4327_v28 = vld [vmem:[%s4675_s16 + $0x164] sm:$0xf] }
 0x1ea   : > { %v2812_v34 = vpop.f32.mrf.mxu1 }
 0x1eb   : > { %v2605_v35 = vadd.f32 %v2604_v7, %v2556_v20  ;;  %2860 = vmatmul.bf16.vlgmr.msra.gmra.mxu2 %v3188_v29  ;;  %2958 = vmatmul.bf16.vlgmr.msra.gmra.mxu0 %v3196_v30  ;;  %v3341_v29 = vld [vmem:[%s4675_s16 + $0x1a8] sm:$0xf0] }
 0x1ec   : > { %2909 = vmatmul.bf16.vlgmr.msra.gmra.mxu3 %v3192_v32 }
 0x1ed   : > { %3007 = vmatmul.bf16.vlgmr.msra.gmra.mxu1 %v3200_v31  ;;  %v5425_v48 = vadd.f32 %v2653_v5, %v2605_v35  ;;  %v3344_v35 = vor.u32 %v4327_v28, %v3341_v29  ;;  %v4362_v28 = vld [vmem:[%s4675_s16 + $0x27c] sm:$0xf]  ;;  %v3477_v29 = vld [vmem:[%s4675_s16 + $0x2c0] sm:$0xf0] }
 0x1ee   : > { %v2665_v36 = vpop.f32.mrf.mxu2 }
 0x1ef   : > { %v2714_v39 = vpop.f32.mrf.mxu3  ;;  %v2666_v40 = vadd.f32 %v2665_v36, %v5261_v54  ;;  %v3264_v54 = vor.u32 %v4308_v37, %v3261_v49 }
 0x1f0   : > { %v2765_v42 = vpop.f32.mrf.mxu0 }
 0x1f1   : > { %v2715_v41 = vadd.f32 %v2714_v39, %v2666_v40 }
 0x1f2   : > { %v2814_v43 = vpop.f32.mrf.mxu1 }
 0x1f3   : > { %v2764_v44 = vadd.f32 %v2763_v38, %v2715_v41  ;;  %v3332_v38 = vor.u32 %v4335_v17, %v3331_v16 }
 0x1f5   : > { %v5436_v56 = vadd.f32 %v2812_v34, %v2764_v44  ;;  %v3340_v34 = vor.u32 %v4336_v27, %v3339_v25  ;;  %v3475_v25 = vld [vmem:[%s4675_s16 + $0x278] sm:$0xf]  ;;  %v4371_v27 = vld [vmem:[%s4675_s16 + $0x2bc] sm:$0xf0] }
 0x1f6   : > { %v2667_v58 = vpop.f32.mrf.mxu2 }
 0x1f7   : > { %v2716_v60 = vpop.f32.mrf.mxu3  ;;  %v2668_v61 = vadd.f32 %v2667_v58, %v5273_v62  ;;  %v3411_v58 = vld [vmem:[%s4675_s16 + $0x1f0] sm:$0xf] }
 0x1f8   : > { %v2768_v3 = vpop.f32.mrf.mxu0 }
 0x1f9   : > { %v2717_v2 = vadd.f32 %v2716_v60, %v2668_v61  ;;  %v4354_v60 = vld [vmem:[%s4675_s16 + $0x234] sm:$0xf0]  ;;  %v4345_v61 = vld [vmem:[%s4675_s16 + $0x1f4] sm:$0xf] }
 0x1fa   : > { %v2817_v4 = vpop.f32.mrf.mxu1 }
 0x1fb   : > { %v2766_v6 = vadd.f32 %v2765_v42, %v2717_v2  ;;  %2865 = vmatmul.bf16.gmra.mxu2 %v3260_v63  ;;  %2963 = vmatmul.bf16.gmra.mxu0 %v3268_v0  ;;  %v3413_v63 = vld [vmem:[%s4675_s16 + $0x238] sm:$0xf0] }
 0x1fc   : > { %2914 = vmatmul.bf16.gmra.mxu3 %v3264_v54 }
 0x1fd   : > { %3012 = vmatmul.bf16.gmra.mxu1 %v3272_v1  ;;  %v5439_v62 = vadd.f32 %v2814_v43, %v2766_v6  ;;  %v3416_v6 = vor.u32 %v4345_v61, %v3413_v63  ;;  %v4380_v61 = vld [vmem:[%s4675_s16 + $0x30c] sm:$0xf]  ;;  %v3549_v63 = vld [vmem:[%s4675_s16 + $0x350] sm:$0xf0] }
 0x1fe   : > { %v2670_v7 = vpop.f32.mrf.mxu2 }
 0x1ff   : > { %v2719_v5 = vpop.f32.mrf.mxu3  ;;  %v2671_v9 = vadd.f32 %v2670_v7, %v5287_v18  ;;  %v3336_v18 = vor.u32 %v4326_v19, %v3333_v21 }
 0x200   : > { %v2770_v12 = vpop.f32.mrf.mxu0 }
 0x201   : > { %v2720_v11 = vadd.f32 %v2719_v5, %v2671_v9 }
 0x202   : > { %v2819_v14 = vpop.f32.mrf.mxu1 }
 0x203   : > { %v2769_v15 = vadd.f32 %v2768_v3, %v2720_v11  ;;  %v3404_v3 = vor.u32 %v4353_v53, %v3403_v52 }
 0x205   : > { %v5450_v32 = vadd.f32 %v2817_v4, %v2769_v15  ;;  %v3412_v4 = vor.u32 %v4354_v60, %v3411_v58  ;;  %v3547_v58 = vld [vmem:[%s4675_s16 + $0x308] sm:$0xf]  ;;  %v4389_v60 = vld [vmem:[%s4675_s16 + $0x34c] sm:$0xf0] }
 0x206   : > { %v2672_v30 = vpop.f32.mrf.mxu2 }
 0x207   : > { %v2721_v31 = vpop.f32.mrf.mxu3  ;;  %v2673_v20 = vadd.f32 %v2672_v30, %v5299_v26  ;;  %v3483_v30 = vld [vmem:[%s4675_s16 + $0x280] sm:$0xf] }
 0x208   : > { %v2773_v39 = vpop.f32.mrf.mxu0 }
 0x209   : > { %v2722_v36 = vadd.f32 %v2721_v31, %v2673_v20  ;;  %v4372_v31 = vld [vmem:[%s4675_s16 + $0x2c4] sm:$0xf0]  ;;  %v4363_v20 = vld [vmem:[%s4675_s16 + $0x284] sm:$0xf] }
 0x20a   : > { %v2822_v40 = vpop.f32.mrf.mxu1 }
 0x20b   : > { %v2771_v41 = vadd.f32 %v2770_v12, %v2722_v36  ;;  %2870 = vmatmul.bf16.gmra.mxu2 %v3332_v38  ;;  %2968 = vmatmul.bf16.gmra.mxu0 %v3340_v34  ;;  %v3485_v38 = vld [vmem:[%s4675_s16 + $0x2c8] sm:$0xf0] }
 0x20c   : > { %2919 = vmatmul.bf16.gmra.mxu3 %v3336_v18 }
 0x20d   : > { %3017 = vmatmul.bf16.gmra.mxu1 %v3344_v35  ;;  %v5453_v26 = vadd.f32 %v2819_v14, %v2771_v41  ;;  %v3488_v41 = vor.u32 %v4363_v20, %v3485_v38  ;;  %v4398_v20 = vld [vmem:[%s4675_s16 + $0x39c] sm:$0xf]  ;;  %v3621_v38 = vld [vmem:[%s4675_s16 + $0x3e0] sm:$0xf0] }
 0x20e   : > { %v2675_v42 = vpop.f32.mrf.mxu2 }
 0x20f   : > { %v2724_v43 = vpop.f32.mrf.mxu3  ;;  %v2676_v44 = vadd.f32 %v2675_v42, %v5313_v46  ;;  %v3408_v46 = vor.u32 %v4344_v51, %v3405_v57 }
 0x210   : > { %v2775_v47 = vpop.f32.mrf.mxu0 }
 0x211   : > { %v2725_v45 = vadd.f32 %v2724_v43, %v2676_v44 }
 0x212   : > { %v2824_v37 = vpop.f32.mrf.mxu1 }
 0x213   : > { %v2774_v49 = vadd.f32 %v2773_v39, %v2725_v45  ;;  %v3476_v39 = vor.u32 %v4371_v27, %v3475_v25 }
 0x215   : > { %v5464_v54 = vadd.f32 %v2822_v40, %v2774_v49  ;;  %v3484_v40 = vor.u32 %v4372_v31, %v3483_v30  ;;  %v3619_v30 = vld [vmem:[%s4675_s16 + $0x398] sm:$0xf]  ;;  %v4407_v31 = vld [vmem:[%s4675_s16 + $0x3dc] sm:$0xf0] }
 0x216   : > { %v2677_v0 = vpop.f32.mrf.mxu2 }
 0x217   : > { %v2726_v1 = vpop.f32.mrf.mxu3  ;;  %v2678_v2 = vadd.f32 %v2677_v0, %v5325_v55  ;;  %v3555_v0 = vld [vmem:[%s4675_s16 + $0x310] sm:$0xf] }
 0x218   : > { %v2778_v5 = vpop.f32.mrf.mxu0 }
 0x219   : > { %v2727_v7 = vadd.f32 %v2726_v1, %v2678_v2  ;;  %v4390_v1 = vld [vmem:[%s4675_s16 + $0x354] sm:$0xf0]  ;;  %v4381_v2 = vld [vmem:[%s4675_s16 + $0x314] sm:$0xf] }
 0x21a   : > { %v2827_v9 = vpop.f32.mrf.mxu1 }
 0x21b   : > { %v2776_v11 = vadd.f32 %v2775_v47, %v2727_v7  ;;  %2875 = vmatmul.bf16.gmra.mxu2 %v3404_v3  ;;  %2973 = vmatmul.bf16.gmra.mxu0 %v3412_v4  ;;  %v3557_v3 = vld [vmem:[%s4675_s16 + $0x358] sm:$0xf0] }
 0x21c   : > { %2924 = vmatmul.bf16.gmra.mxu3 %v3408_v46 }
 0x21d   : > { %3022 = vmatmul.bf16.gmra.mxu1 %v3416_v6  ;;  %v5467_v55 = vadd.f32 %v2824_v37, %v2776_v11  ;;  %v3560_v11 = vor.u32 %v4381_v2, %v3557_v3  ;;  %v4416_v2 = vld [vmem:[%s4675_s16 + $0x42c] sm:$0xf]  ;;  %v3693_v3 = vld [vmem:[%s4675_s16 + $0x470] sm:$0xf0] }
 0x21e   : > { %v2680_v12 = vpop.f32.mrf.mxu2 }
 0x21f   : > { %v2729_v14 = vpop.f32.mrf.mxu3  ;;  %v2681_v15 = vadd.f32 %v2680_v12, %v5339_v13  ;;  %v3480_v13 = vor.u32 %v4362_v28, %v3477_v29 }
 0x220   : > { %v2780_v17 = vpop.f32.mrf.mxu0 }
 0x221   : > { %v2730_v16 = vadd.f32 %v2729_v14, %v2681_v15 }
 0x222   : > { %v2829_v19 = vpop.f32.mrf.mxu1 }
 0x223   : > { %v2779_v21 = vadd.f32 %v2778_v5, %v2730_v16  ;;  %v3548_v5 = vor.u32 %v4389_v60, %v3547_v58 }
 0x225   : > { %v5478_v18 = vadd.f32 %v2827_v9, %v2779_v21  ;;  %v3556_v9 = vor.u32 %v4390_v1, %v3555_v0  ;;  %v3691_v0 = vld [vmem:[%s4675_s16 + $0x428] sm:$0xf]  ;;  %v4425_v1 = vld [vmem:[%s4675_s16 + $0x46c] sm:$0xf0] }
 0x226   : > { %v2682_v34 = vpop.f32.mrf.mxu2 }
 0x227   : > { %v2731_v35 = vpop.f32.mrf.mxu3  ;;  %v2683_v36 = vadd.f32 %v2682_v34, %v5351_v24  ;;  %v3627_v34 = vld [vmem:[%s4675_s16 + $0x3a0] sm:$0xf] }
 0x228   : > { %v2783_v43 = vpop.f32.mrf.mxu0 }
 0x229   : > { %v2732_v42 = vadd.f32 %v2731_v35, %v2683_v36  ;;  %v4408_v35 = vld [vmem:[%s4675_s16 + $0x3e4] sm:$0xf0]  ;;  %v4399_v36 = vld [vmem:[%s4675_s16 + $0x3a4] sm:$0xf] }
 0x22a   : > { %v2832_v44 = vpop.f32.mrf.mxu1 }
 0x22b   : > { %v2781_v45 = vadd.f32 %v2780_v17, %v2732_v42  ;;  %2880 = vmatmul.bf16.gmra.mxu2 %v3476_v39  ;;  %2978 = vmatmul.bf16.gmra.mxu0 %v3484_v40  ;;  %v3629_v39 = vld [vmem:[%s4675_s16 + $0x3e8] sm:$0xf0] }
 0x22c   : > { %2929 = vmatmul.bf16.gmra.mxu3 %v3480_v13 }
 0x22d   : > { %3027 = vmatmul.bf16.gmra.mxu1 %v3488_v41  ;;  %v5481_v24 = vadd.f32 %v2829_v19, %v2781_v45  ;;  %v3632_v45 = vor.u32 %v4399_v36, %v3629_v39 }
 0x22e   : > { %v2685_v47 = vpop.f32.mrf.mxu2 }
 0x22f   : > { %v2734_v37 = vpop.f32.mrf.mxu3  ;;  %v2686_v49 = vadd.f32 %v2685_v47, %v5365_v59  ;;  %v3552_v59 = vor.u32 %v4380_v61, %v3549_v63 }
 0x230   : > { %v2785_v53 = vpop.f32.mrf.mxu0 }
 0x231   : > { %v2735_v52 = vadd.f32 %v2734_v37, %v2686_v49 }
 0x232   : > { %v2834_v51 = vpop.f32.mrf.mxu1 }
 0x233   : > { %v2784_v57 = vadd.f32 %v2783_v43, %v2735_v52  ;;  %v3620_v43 = vor.u32 %v4407_v31, %v3619_v30 }
 0x235   : > { %v5492_v46 = vadd.f32 %v2832_v44, %v2784_v57  ;;  %v3628_v44 = vor.u32 %v4408_v35, %v3627_v34 }
 0x236   : > { %v2687_v4 = vpop.f32.mrf.mxu2 }
 0x237   : > { %v2736_v6 = vpop.f32.mrf.mxu3  ;;  %v2688_v7 = vadd.f32 %v2687_v4, %v5377_v10  ;;  %v3699_v4 = vld [vmem:[%s4675_s16 + $0x430] sm:$0xf] }
 0x238   : > { %v2788_v14 = vpop.f32.mrf.mxu0 }
 0x239   : > { %v2737_v12 = vadd.f32 %v2736_v6, %v2688_v7  ;;  %v4426_v6 = vld [vmem:[%s4675_s16 + $0x474] sm:$0xf0]  ;;  %v4417_v7 = vld [vmem:[%s4675_s16 + $0x434] sm:$0xf] }
 0x23a   : > { %v2837_v15 = vpop.f32.mrf.mxu1 }
 0x23b   : > { %v2786_v16 = vadd.f32 %v2785_v53, %v2737_v12  ;;  %2885 = vmatmul.bf16.gmra.mxu2 %v3548_v5  ;;  %2983 = vmatmul.bf16.gmra.mxu0 %v3556_v9  ;;  %v3701_v5 = vld [vmem:[%s4675_s16 + $0x478] sm:$0xf0]  ;;  %s3128_s16 = sshll.u32 %s5576_s23, 3 }
 0x23c   : > { %2934 = vmatmul.bf16.gmra.mxu3 %v3552_v59  ;;  %s5536_s30 = scalar_lea.vmem %s5574_s2, %s3128_s16 }
 0x23d   : > { %3032 = vmatmul.bf16.gmra.mxu1 %v3560_v11  ;;  %v5495_v10 = vadd.f32 %v2834_v51, %v2786_v16  ;;  %v3704_v16 = vor.u32 %v4417_v7, %v3701_v5 }
 0x23e   : > { %v2690_v17 = vpop.f32.mrf.mxu2 }
 0x23f   : > { %v2739_v19 = vpop.f32.mrf.mxu3  ;;  %v2691_v21 = vadd.f32 %v2690_v17, %v5391_v23  ;;  %v3624_v23 = vor.u32 %v4398_v20, %v3621_v38 }
 0x240   : > { %v2790_v27 = vpop.f32.mrf.mxu0 }
 0x241   : > { %v2740_v25 = vadd.f32 %v2739_v19, %v2691_v21 }
 0x242   : > { %v2839_v28 = vpop.f32.mrf.mxu1 }
 0x243   : > { %v2789_v29 = vadd.f32 %v2788_v14, %v2740_v25  ;;  %v3692_v14 = vor.u32 %v4425_v1, %v3691_v0 }
 0x245   : > { %v5506_v13 = vadd.f32 %v2837_v15, %v2789_v29  ;;  %v3700_v15 = vor.u32 %v4426_v6, %v3699_v4 }
 0x246   : > { %v2692_v40 = vpop.f32.mrf.mxu2 }
 0x247   : > { %v2741_v41 = vpop.f32.mrf.mxu3  ;;  %v2693_v42 = vadd.f32 %v2692_v40, %v5397_v33 }
 0x248   : > { %v2793_v37 = vpop.f32.mrf.mxu0 }
 0x249   : > { %v2742_v47 = vadd.f32 %v2741_v41, %v2693_v42 }
 0x24a   : > { %v2842_v49 = vpop.f32.mrf.mxu1 }
 0x24b   : > { %v2791_v52 = vadd.f32 %v2790_v27, %v2742_v47  ;;  %2890 = vmatmul.bf16.gmra.mxu2 %v3620_v43  ;;  %2988 = vmatmul.bf16.gmra.mxu0 %v3628_v44 }
 0x24c   : > { %2939 = vmatmul.bf16.gmra.mxu3 %v3624_v23 }
 0x24d   : > { %3037 = vmatmul.bf16.gmra.mxu1 %v3632_v45  ;;  %v5509_v33 = vadd.f32 %v2839_v28, %v2791_v52 }
 0x24e   : > { %v2695_v53 = vpop.f32.mrf.mxu2 }
 0x24f   : > { %v2744_v51 = vpop.f32.mrf.mxu3  ;;  %v2696_v57 = vadd.f32 %v2695_v53, %v5408_v50  ;;  %v3696_v50 = vor.u32 %v4416_v2, %v3693_v3 }
 0x250   : > { %v2795_v60 = vpop.f32.mrf.mxu0 }
 0x251   : > { %v2745_v58 = vadd.f32 %v2744_v51, %v2696_v57 }
 0x252   : > { %v2844_v61 = vpop.f32.mrf.mxu1 }
 0x253   : > { %v2794_v63 = vadd.f32 %v2793_v37, %v2745_v58 }
 0x255   : > { %v5520_v59 = vadd.f32 %v2842_v49, %v2794_v63 }
 0x256   : > { %v2697_v9 = vpop.f32.mrf.mxu2 }
 0x257   : > { %v2746_v11 = vpop.f32.mrf.mxu3  ;;  %v2698_v12 = vadd.f32 %v2697_v9, %v5411_v8 }
 0x258   : > { %v2798_v19 = vpop.f32.mrf.mxu0 }
 0x259   : > { %v2747_v17 = vadd.f32 %v2746_v11, %v2698_v12 }
 0x25a   : > { %v2847_v21 = vpop.f32.mrf.mxu1 }
 0x25b   : > { %v2796_v25 = vadd.f32 %v2795_v60, %v2747_v17  ;;  %2895 = vmatmul.bf16.gmra.mxu2 %v3692_v14  ;;  %2993 = vmatmul.bf16.gmra.mxu0 %v3700_v15 }
 0x25c   : > { %2944 = vmatmul.bf16.gmra.mxu3 %v3696_v50 }
 0x25d   : > { %3042 = vmatmul.bf16.gmra.mxu1 %v3704_v16  ;;  %v5523_v27 = vadd.f32 %v2844_v61, %v2796_v25 }
 0x25e   : > { %v2700_v28 = vpop.f32.mrf.mxu2 }
 0x25f   : > { %v2749_v29 = vpop.f32.mrf.mxu3  ;;  %v2701_v30 = vadd.f32 %v2700_v28, %v5422_v22 }
 0x260   : > { %v2800_v8 = vpop.f32.mrf.mxu0 }
 0x261   : > { %v2750_v31 = vadd.f32 %v2749_v29, %v2701_v30 }
 0x262   : > { %v2849_v20 = vpop.f32.mrf.mxu1 }
 0x263   : > { %v2799_v38 = vadd.f32 %v2798_v19, %v2750_v31 }
 0x265   : > { %v5526_v34 = vadd.f32 %v2847_v21, %v2799_v38 }
 0x266   : > { %v2702_v35 = vpop.f32.mrf.mxu2 }
 0x267   : > { %v2751_v36 = vpop.f32.mrf.mxu3  ;;  %v2703_v39 = vadd.f32 %v2702_v35, %v5425_v48 }
 0x268   : > { %v2959_v41 = vpop.f32.mrf.mxu0 }
 0x269   : > { %v2752_v40 = vadd.f32 %v2751_v36, %v2703_v39 }
 0x26a   : > { %v3008_v42 = vpop.f32.mrf.mxu1 }
 0x26b   : > { %v2801_v43 = vadd.f32 %v2800_v8, %v2752_v40 }
 0x26d   : > { %v5529_v23 = vadd.f32 %v2849_v20, %v2801_v43 }
 0x26e   : > { %v2861_v44 = vpop.f32.mrf.mxu2 }
 0x26f   : > { %v2910_v45 = vpop.f32.mrf.mxu3  ;;  %v2862_v22 = vadd.f32 %v2861_v44, %v5436_v56 }
 0x270   : > { %v2961_v37 = vpop.f32.mrf.mxu0 }
 0x271   : > { %v2911_v47 = vadd.f32 %v2910_v45, %v2862_v22 }
 0x272   : > { %v3010_v49 = vpop.f32.mrf.mxu1 }
 0x273   : > { %v2960_v52 = vadd.f32 %v2959_v41, %v2911_v47 }
 0x275   : > { %v3009_v48 = vadd.f32 %v3008_v42, %v2960_v52 }
 0x276   : > { %v2863_v53 = vpop.f32.mrf.mxu2 }
 0x277   : > { %v2912_v51 = vpop.f32.mrf.mxu3  ;;  %3048 = vst [vmem:[%s5536_s30] sm:$0xff] %v3009_v48  ;;  %v2864_v57 = vadd.f32 %v2863_v53, %v5439_v62 }
 0x278   : > { %v2964_v56 = vpop.f32.mrf.mxu0 }
 0x279   : > { %v2913_v58 = vadd.f32 %v2912_v51, %v2864_v57 }
 0x27a   : > { %v3013_v60 = vpop.f32.mrf.mxu1 }
 0x27b   : > { %v2962_v61 = vadd.f32 %v2961_v37, %v2913_v58 }
 0x27d   : > { %v3011_v63 = vadd.f32 %v3010_v49, %v2962_v61 }
 0x27e   : > { %v2866_v0 = vpop.f32.mrf.mxu2 }
 0x27f   : > { %v2915_v1 = vpop.f32.mrf.mxu3  ;;  %3049 = vst [vmem:[%s5536_s30 + $0x8] sm:$0xff] %v3011_v63  ;;  %v2867_v2 = vadd.f32 %v2866_v0, %v5450_v32 }
 0x280   : > { %v2966_v4 = vpop.f32.mrf.mxu0 }
 0x281   : > { %v2916_v3 = vadd.f32 %v2915_v1, %v2867_v2 }
 0x282   : > { %v3015_v6 = vpop.f32.mrf.mxu1 }
 0x283   : > { %v2965_v7 = vadd.f32 %v2964_v56, %v2916_v3 }
 0x285   : > { %v3014_v5 = vadd.f32 %v3013_v60, %v2965_v7 }
 0x286   : > { %v2868_v9 = vpop.f32.mrf.mxu2 }
 0x287   : > { %v2917_v11 = vpop.f32.mrf.mxu3  ;;  %3050 = vst [vmem:[%s5536_s30 + $0x10] sm:$0xff] %v3014_v5  ;;  %v2869_v62 = vadd.f32 %v2868_v9, %v5453_v26 }
 0x288   : > { %v2969_v14 = vpop.f32.mrf.mxu0 }
 0x289   : > { %v2918_v12 = vadd.f32 %v2917_v11, %v2869_v62 }
 0x28a   : > { %v3018_v50 = vpop.f32.mrf.mxu1 }
 0x28b   : > { %v2967_v15 = vadd.f32 %v2966_v4, %v2918_v12 }
 0x28d   : > { %v3016_v16 = vadd.f32 %v3015_v6, %v2967_v15 }
 0x28e   : > { %v2871_v17 = vpop.f32.mrf.mxu2 }
 0x28f   : > { %v2920_v19 = vpop.f32.mrf.mxu3  ;;  %3051 = vst [vmem:[%s5536_s30 + $0x18] sm:$0xff] %v3016_v16  ;;  %v2872_v32 = vadd.f32 %v2871_v17, %v5464_v54 }
 0x290   : > { %v2971_v25 = vpop.f32.mrf.mxu0 }
 0x291   : > { %v2921_v21 = vadd.f32 %v2920_v19, %v2872_v32 }
 0x292   : > { %v3020_v28 = vpop.f32.mrf.mxu1 }
 0x293   : > { %v2970_v29 = vadd.f32 %v2969_v14, %v2921_v21 }
 0x295   : > { %v3019_v30 = vadd.f32 %v3018_v50, %v2970_v29 }
 0x296   : > { %v2873_v31 = vpop.f32.mrf.mxu2 }
 0x297   : > { %v2922_v8 = vpop.f32.mrf.mxu3  ;;  %3052 = vst [vmem:[%s5536_s30 + $0x20] sm:$0xff] %v3019_v30  ;;  %v2874_v26 = vadd.f32 %v2873_v31, %v5467_v55 }
 0x298   : > { %v2974_v38 = vpop.f32.mrf.mxu0 }
 0x299   : > { %v2923_v20 = vadd.f32 %v2922_v8, %v2874_v26 }
 0x29a   : > { %v3023_v35 = vpop.f32.mrf.mxu1 }
 0x29b   : > { %v2972_v36 = vadd.f32 %v2971_v25, %v2923_v20 }
 0x29d   : > { %v3021_v39 = vadd.f32 %v3020_v28, %v2972_v36 }
 0x29e   : > { %v2876_v40 = vpop.f32.mrf.mxu2 }
 0x29f   : > { %v2925_v41 = vpop.f32.mrf.mxu3  ;;  %3053 = vst [vmem:[%s5536_s30 + $0x28] sm:$0xff] %v3021_v39  ;;  %v2877_v54 = vadd.f32 %v2876_v40, %v5478_v18 }
 0x2a0   : > { %v2976_v43 = vpop.f32.mrf.mxu0 }
 0x2a1   : > { %v2926_v42 = vadd.f32 %v2925_v41, %v2877_v54 }
 0x2a2   : > { %v3025_v44 = vpop.f32.mrf.mxu1 }
 0x2a3   : > { %v2975_v45 = vadd.f32 %v2974_v38, %v2926_v42 }
 0x2a5   : > { %v3024_v22 = vadd.f32 %v3023_v35, %v2975_v45 }
 0x2a6   : > { %v2878_v47 = vpop.f32.mrf.mxu2 }
 0x2a7   : > { %v2927_v37 = vpop.f32.mrf.mxu3  ;;  %3054 = vst [vmem:[%s5536_s30 + $0x30] sm:$0xff] %v3024_v22  ;;  %v2879_v55 = vadd.f32 %v2878_v47, %v5481_v24 }
 0x2a8   : > { %v2979_v52 = vpop.f32.mrf.mxu0 }
 0x2a9   : > { %v2928_v49 = vadd.f32 %v2927_v37, %v2879_v55 }
 0x2aa   : > { %v3028_v48 = vpop.f32.mrf.mxu1 }
 0x2ab   : > { %v2977_v53 = vadd.f32 %v2976_v43, %v2928_v49 }
 0x2ad   : > { %v3026_v51 = vadd.f32 %v3025_v44, %v2977_v53 }
 0x2ae   : > { %v2881_v57 = vpop.f32.mrf.mxu2 }
 0x2af   : > { %v2930_v58 = vpop.f32.mrf.mxu3  ;;  %3055 = vst [vmem:[%s5536_s30 + $0x38] sm:$0xff] %v3026_v51  ;;  %v2882_v18 = vadd.f32 %v2881_v57, %v5492_v46 }
 0x2b0   : > { %v2981_v60 = vpop.f32.mrf.mxu0 }
 0x2b1   : > { %v2931_v56 = vadd.f32 %v2930_v58, %v2882_v18 }
 0x2b2   : > { %v3030_v61 = vpop.f32.mrf.mxu1 }
 0x2b3   : > { %v2980_v63 = vadd.f32 %v2979_v52, %v2931_v56 }
 0x2b5   : > { %v3029_v0 = vadd.f32 %v3028_v48, %v2980_v63 }
 0x2b6   : > { %v2883_v1 = vpop.f32.mrf.mxu2 }
 0x2b7   : > { %v2932_v2 = vpop.f32.mrf.mxu3  ;;  %3056 = vst [vmem:[%s5536_s30 + $0x40] sm:$0xff] %v3029_v0  ;;  %v2884_v24 = vadd.f32 %v2883_v1, %v5495_v10 }
 0x2b8   : > { %v2984_v4 = vpop.f32.mrf.mxu0 }
 0x2b9   : > { %v2933_v3 = vadd.f32 %v2932_v2, %v2884_v24 }
 0x2ba   : > { %v3033_v6 = vpop.f32.mrf.mxu1 }
 0x2bb   : > { %v2982_v7 = vadd.f32 %v2981_v60, %v2933_v3 }
 0x2bd   : > { %v3031_v5 = vadd.f32 %v3030_v61, %v2982_v7 }
 0x2be   : > { %v2886_v9 = vpop.f32.mrf.mxu2 }
 0x2bf   : > { %v2935_v11 = vpop.f32.mrf.mxu3  ;;  %3057 = vst [vmem:[%s5536_s30 + $0x48] sm:$0xff] %v3031_v5  ;;  %v2887_v46 = vadd.f32 %v2886_v9, %v5506_v13 }
 0x2c0   : > { %v2986_v12 = vpop.f32.mrf.mxu0 }
 0x2c1   : > { %v2936_v62 = vadd.f32 %v2935_v11, %v2887_v46 }
 0x2c2   : > { %v3035_v50 = vpop.f32.mrf.mxu1 }
 0x2c3   : > { %v2985_v14 = vadd.f32 %v2984_v4, %v2936_v62 }
 0x2c5   : > { %v3034_v15 = vadd.f32 %v3033_v6, %v2985_v14 }
 0x2c6   : > { %v2888_v16 = vpop.f32.mrf.mxu2 }
 0x2c7   : > { %v2937_v17 = vpop.f32.mrf.mxu3  ;;  %3058 = vst [vmem:[%s5536_s30 + $0x50] sm:$0xff] %v3034_v15  ;;  %v2889_v10 = vadd.f32 %v2888_v16, %v5509_v33 }
 0x2c8   : > { %v2989_v21 = vpop.f32.mrf.mxu0 }
 0x2c9   : > { %v2938_v19 = vadd.f32 %v2937_v17, %v2889_v10 }
 0x2ca   : > { %v3038_v28 = vpop.f32.mrf.mxu1 }
 0x2cb   : > { %v2987_v32 = vadd.f32 %v2986_v12, %v2938_v19 }
 0x2cd   : > { %v3036_v25 = vadd.f32 %v3035_v50, %v2987_v32 }
 0x2ce   : > { %v2891_v29 = vpop.f32.mrf.mxu2 }
 0x2cf   : > { %v2940_v30 = vpop.f32.mrf.mxu3  ;;  %3059 = vst [vmem:[%s5536_s30 + $0x58] sm:$0xff] %v3036_v25  ;;  %v2892_v13 = vadd.f32 %v2891_v29, %v5520_v59 }
 0x2d0   : > { %v2991_v20 = vpop.f32.mrf.mxu0 }
 0x2d1   : > { %v2941_v31 = vadd.f32 %v2940_v30, %v2892_v13 }
 0x2d2   : > { %v3040_v36 = vpop.f32.mrf.mxu1 }
 0x2d3   : > { %v2990_v8 = vadd.f32 %v2989_v21, %v2941_v31 }
 0x2d5   : > { %v3039_v26 = vadd.f32 %v3038_v28, %v2990_v8 }
 0x2d6   : > { %v2893_v38 = vpop.f32.mrf.mxu2 }
 0x2d7   : > { %v2942_v35 = vpop.f32.mrf.mxu3  ;;  %3060 = vst [vmem:[%s5536_s30 + $0x60] sm:$0xff] %v3039_v26  ;;  %v2894_v33 = vadd.f32 %v2893_v38, %v5523_v27 }
 0x2d8   : > { %v2994_v43 = vpop.f32.mrf.mxu0 }
 0x2d9   : > { %v2943_v39 = vadd.f32 %v2942_v35, %v2894_v33 }
 0x2da   : > { %v3043_v45 = vpop.f32.mrf.mxu1 }
 0x2db   : > { %v2992_v40 = vadd.f32 %v2991_v20, %v2943_v39 }
 0x2dd   : > { %v3041_v41 = vadd.f32 %v3040_v36, %v2992_v40 }
 0x2de   : > { %v2896_v54 = vpop.f32.mrf.mxu2 }
 0x2df   : > { %v2945_v42 = vpop.f32.mrf.mxu3  ;;  %3061 = vst [vmem:[%s5536_s30 + $0x68] sm:$0xff] %v3041_v41  ;;  %v2897_v59 = vadd.f32 %v2896_v54, %v5526_v34 }
 0x2e0   : > { %v2996_v52 = vpop.f32.mrf.mxu0 }
 0x2e1   : > { %v2946_v44 = vadd.f32 %v2945_v42, %v2897_v59 }
 0x2e2   : > { %v3045_v53 = vpop.f32.mrf.mxu1 }
 0x2e3   : > { %v2995_v22 = vadd.f32 %v2994_v43, %v2946_v44 }
 0x2e5   : > { %v3044_v47 = vadd.f32 %v3043_v45, %v2995_v22 }
 0x2e6   : > { %v2898_v37 = vpop.f32.mrf.mxu2 }
 0x2e7   : > { %3062 = vst [vmem:[%s5536_s30 + $0x70] sm:$0xff] %v3044_v47  ;;  %v2899_v55 = vadd.f32 %v2898_v37, %v5529_v23  ;;  %v2947_v27 = vpop.f32.mrf.mxu3 }
 0x2e9   : > { %v2948_v49 = vadd.f32 %v2947_v27, %v2899_v55 }
 0x2eb   : > { %v2997_v48 = vadd.f32 %v2996_v52, %v2948_v49 }
 0x2ed   : > { %v3046_v51 = vadd.f32 %v3045_v53, %v2997_v48 }
 0x2ef   : > { %3063 = vst [vmem:[%s5536_s30 + $0x78] sm:$0xff] %v3046_v51 }
 0x2f0 PF: > { %s12_s9 = sadd.s32 1, %s4602_s9  }
 0x2f1   : > { %p9_p4 = scmp.ge.s32.totalorder %s12_s9, 6  }
 0x2f3   :  { %11 = sbr.rel (!%p9_p4) target bundleno = 1 (0x1), region = 58 }

</bundles_post_ra>
